<compile_context>
chip_gen: v7x
topology: tpu7x:2x2x1
jax: 0.10.0
libtpu: 0.0.40
codegen_flags: <defaults>
</compile_context>

<pallas_src>
import functools

import jax
import jax.numpy as jnp
from jax.experimental import pallas as pl
from jax.experimental.pallas import tpu as pltpu  # noqa: F401  (TPU backend)

# ---- small, module-consistent hyper-parameters -------------------------------
D_MODEL = 32
D_FF = 64
HEADS = 4
N_LAYERS = 2        # encoder layers
N_AGG_LAYERS = 1    # aggregator layers
HEAD_DIM = D_MODEL // HEADS
EPS = 1e-5
NEG_INF = -1e9


def _layer_norm(y, g, b):
    mu = jnp.mean(y, axis=-1, keepdims=True)
    var = jnp.mean(jnp.square(y - mu), axis=-1, keepdims=True)
    return (y - mu) * jax.lax.rsqrt(var + EPS) * g + b


def _fused_jepa_kernel(x_ref, enc_mask_ref, agg_mask_ref,
                       wqkv_ref, bqkv_ref, wo_ref, bo_ref,
                       w1_ref, b1_ref, w2_ref, b2_ref,
                       ln1g_ref, ln1b_ref, ln2g_ref, ln2b_ref,
                       o_ref, *, B, S, D, H, n_enc_layers, n_total_layers):
    """Entire JEPAEncoder forward on VMEM-resident data."""
    dh = D // H
    scale = 1.0 / (dh ** 0.5)

    x = x_ref[...]                      # (B*S, D) f32
    enc_mask = enc_mask_ref[...]        # (B, S) f32, 1.0 = valid
    agg_mask = agg_mask_ref[...]        # (B, S) f32

    # Additive key-mask biases built in-kernel (one VPU select each).
    enc_bias = jnp.where(enc_mask > 0.5, 0.0, NEG_INF)   # (B, S)
    agg_bias = jnp.where(agg_mask > 0.5, 0.0, NEG_INF)   # (B, S)

    for layer in range(n_total_layers):                  # static unroll (3 layers)
        bias = enc_bias if layer < n_enc_layers else agg_bias

        wqkv = wqkv_ref[layer]          # (D, 3D)
        bqkv = bqkv_ref[layer]          # (1, 3D)
        wo = wo_ref[layer]              # (D, D)
        bo = bo_ref[layer]              # (1, D)
        w1 = w1_ref[layer]              # (D, D_FF)
        b1 = b1_ref[layer]              # (1, D_FF)
        w2 = w2_ref[layer]              # (D_FF, D)
        b2 = b2_ref[layer]              # (1, D)
        ln1g = ln1g_ref[layer]; ln1b = ln1b_ref[layer]   # (1, D)
        ln2g = ln2g_ref[layer]; ln2b = ln2b_ref[layer]   # (1, D)

        # Fused QKV projection: one MXU matmul for q, k and v of all tokens.
        qkv = jnp.dot(x, wqkv, preferred_element_type=jnp.float32) + bqkv   # (B*S, 3D)

        attn_rows = []
        for b in range(B):                                # static unroll (B small)
            qkv_b = qkv[b * S:(b + 1) * S, :]             # (S, 3D)
            bias_b = bias[b:b + 1, :]                     # (1, S) -> broadcasts over queries
            head_outs = []
            for h in range(H):                            # heads = static column slices
                q = qkv_b[:, h * dh:(h + 1) * dh]                     # (S, dh)
                k = qkv_b[:, D + h * dh:D + (h + 1) * dh]             # (S, dh)
                v = qkv_b[:, 2 * D + h * dh:2 * D + (h + 1) * dh]     # (S, dh)
                # scores = q @ k^T  (contract last dims; no explicit transpose)
                s = jax.lax.dot_general(
                    q, k, (((1,), (1,)), ((), ())),
                    preferred_element_type=jnp.float32) * scale + bias_b      # (S, S)
                s = s - jnp.max(s, axis=-1, keepdims=True)
                p = jnp.exp(s)
                inv = pl.reciprocal(jnp.sum(p, axis=-1, keepdims=True), approx=True)
                p = p * inv
                head_outs.append(
                    jnp.dot(p, v, preferred_element_type=jnp.float32))        # (S, dh)
            attn_rows.append(jnp.concatenate(head_outs, axis=-1))             # (S, D)
        attn = jnp.concatenate(attn_rows, axis=0)                             # (B*S, D)

        # Output projection + post-LN residual.
        attn = jnp.dot(attn, wo, preferred_element_type=jnp.float32) + bo
        x = _layer_norm(attn + x, ln1g, ln1b)

        # GELU FFN + post-LN residual.
        h1 = jax.nn.gelu(
            jnp.dot(x, w1, preferred_element_type=jnp.float32) + b1,
            approximate=True)
        h2 = jnp.dot(h1, w2, preferred_element_type=jnp.float32) + b2
        x = _layer_norm(h2 + x, ln2g, ln2b)

    # Aggregator tail: masked mean pooling over the sequence -> (B, D).
    pooled = []
    for b in range(B):
        m = agg_mask[b:b + 1, :]                          # (1, S)
        xb = x[b * S:(b + 1) * S, :]                      # (S, D)
        num = jnp.dot(m, xb, preferred_element_type=jnp.float32)       # (1, D)
        den = jnp.maximum(jnp.sum(m, axis=-1, keepdims=True), 1.0)     # (1, 1)
        pooled.append(num * pl.reciprocal(den, approx=True))
    o_ref[...] = jnp.concatenate(pooled, axis=0).astype(o_ref.dtype)   # (B, D)


# ---- wrapper: stack weights per layer, one pallas_call ------------------------
def jepa_encoder_forward(x, mask, agg_mask, enc_params, agg_params):
    B, S, D = x.shape
    # Semantics of JEPAEncoder.forward:
    if agg_mask is None:
        agg_mask = mask
    else:
        agg_mask = jnp.logical_and(agg_mask, mask)

    enc_mask_f = mask.astype(jnp.float32)        # (B, S)
    agg_mask_f = agg_mask.astype(jnp.float32)    # (B, S)

    params = list(enc_params) + list(agg_params)

    def stack(name):
        return jnp.stack([p[name] for p in params], axis=0)

    def stack_row(name, width):
        return jnp.stack([p[name].reshape(1, width) for p in params], axis=0)

    # Fuse wq/wk/wv into one (D, 3D) weight per layer.
    wqkv = jnp.stack(
        [jnp.concatenate([p["wq"], p["wk"], p["wv"]], axis=1) for p in params], axis=0)
    bqkv = jnp.stack(
        [jnp.concatenate([p["bq"], p["bk"], p["bv"]], axis=0).reshape(1, 3 * D)
         for p in params], axis=0)

    wo = stack("wo");  bo = stack_row("bo", D)
    w1 = stack("w1");  b1 = stack_row("b1", D_FF)
    w2 = stack("w2");  b2 = stack_row("b2", D)
    ln1g = stack_row("ln1_g", D); ln1b = stack_row("ln1_b", D)
    ln2g = stack_row("ln2_g", D); ln2b = stack_row("ln2_b", D)

    kernel = functools.partial(
        _fused_jepa_kernel,
        B=B, S=S, D=D, H=HEADS,
        n_enc_layers=len(enc_params),
        n_total_layers=len(params))

    # No grid / BlockSpecs: every operand is a single full-array VMEM block.
    return pl.pallas_call(
        kernel,
        out_shape=jax.ShapeDtypeStruct((B, D), x.dtype),
        compiler_params=pltpu.CompilerParams(vmem_limit_bytes=32 * 1024 * 1024),
    )(x.reshape(B * S, D), enc_mask_f, agg_mask_f,
      wqkv, bqkv, wo, bo, w1, b1, w2, b2, ln1g, ln1b, ln2g, ln2b)


# ---- deterministic parameter init ---------------------------------------------
def init_layer_params(key):
    ks = jax.random.split(key, 6)

    def w(k, shape):
        return jax.random.normal(k, shape, jnp.float32) * 0.02

    z = lambda n: jnp.zeros((n,), jnp.float32)
    o = lambda n: jnp.ones((n,), jnp.float32)
    return dict(
        wq=w(ks[0], (D_MODEL, D_MODEL)), bq=z(D_MODEL),
        wk=w(ks[1], (D_MODEL, D_MODEL)), bk=z(D_MODEL),
        wv=w(ks[2], (D_MODEL, D_MODEL)), bv=z(D_MODEL),
        wo=w(ks[3], (D_MODEL, D_MODEL)), bo=z(D_MODEL),
        w1=w(ks[4], (D_MODEL, D_FF)),    b1=z(D_FF),
        w2=w(ks[5], (D_FF, D_MODEL)),    b2=z(D_MODEL),
        ln1_g=o(D_MODEL), ln1_b=z(D_MODEL),
        ln2_g=o(D_MODEL), ln2_b=z(D_MODEL),
    )


if __name__ == "__main__":
    key = jax.random.PRNGKey(0)
    k_x, k_p = jax.random.split(key)

    B, S = 2, 8
    x = jax.random.normal(k_x, (B, S, D_MODEL), jnp.float32)
    mask = jnp.array([[True] * S,
                      [True] * 5 + [False] * (S - 5)])
    agg_mask = None  # exercises the `agg_mask = mask` branch

    layer_keys = jax.random.split(k_p, N_LAYERS + N_AGG_LAYERS)
    enc_params = [init_layer_params(layer_keys[i]) for i in range(N_LAYERS)]
    agg_params = [init_layer_params(layer_keys[N_LAYERS + i])
                  for i in range(N_AGG_LAYERS)]

    out = jepa_encoder_forward(x, mask, agg_mask, enc_params, agg_params)
    out = jax.block_until_ready(out)
    assert out.shape == (B, D_MODEL) and out.dtype == jnp.float32
    assert bool(jnp.all(jnp.isfinite(out)))
    print("KERNEL_OK")
</pallas_src>

<mosaic_0001>
module attributes {stable_mosaic.version = 11 : i64} {
  func.func @_fused_jepa_kernel(%arg0: memref<16x32xf32, #tpu.memory_space<vmem>>, %arg1: memref<2x8xf32, #tpu.memory_space<vmem>>, %arg2: memref<2x8xf32, #tpu.memory_space<vmem>>, %arg3: memref<3x32x96xf32, #tpu.memory_space<vmem>>, %arg4: memref<3x1x96xf32, #tpu.memory_space<vmem>>, %arg5: memref<3x32x32xf32, #tpu.memory_space<vmem>>, %arg6: memref<3x1x32xf32, #tpu.memory_space<vmem>>, %arg7: memref<3x32x64xf32, #tpu.memory_space<vmem>>, %arg8: memref<3x1x64xf32, #tpu.memory_space<vmem>>, %arg9: memref<3x64x32xf32, #tpu.memory_space<vmem>>, %arg10: memref<3x1x32xf32, #tpu.memory_space<vmem>>, %arg11: memref<3x1x32xf32, #tpu.memory_space<vmem>>, %arg12: memref<3x1x32xf32, #tpu.memory_space<vmem>>, %arg13: memref<3x1x32xf32, #tpu.memory_space<vmem>>, %arg14: memref<3x1x32xf32, #tpu.memory_space<vmem>>, %arg15: memref<2x32xf32, #tpu.memory_space<vmem>>) attributes {dimension_semantics = [], scalar_prefetch = 0 : i64, scratch_operands = 0 : i64, tpu.core_type = #tpu.core_type<tc>} {
    %c0 = arith.constant 0 : index
    %c0_0 = arith.constant 0 : index
    %0 = vector.load %arg0[%c0, %c0_0] : memref<16x32xf32, #tpu.memory_space<vmem>>, vector<16x32xf32>
    %c0_1 = arith.constant 0 : index
    %c0_2 = arith.constant 0 : index
    %1 = vector.load %arg1[%c0_1, %c0_2] : memref<2x8xf32, #tpu.memory_space<vmem>>, vector<2x8xf32>
    %c0_3 = arith.constant 0 : index
    %c0_4 = arith.constant 0 : index
    %2 = vector.load %arg2[%c0_3, %c0_4] : memref<2x8xf32, #tpu.memory_space<vmem>>, vector<2x8xf32>
    %cst = arith.constant 5.000000e-01 : f32
    %3 = vector.broadcast %cst : f32 to vector<2x8xf32>
    %4 = arith.cmpf ogt, %1, %3 : vector<2x8xf32>
    %cst_5 = arith.constant 0.000000e+00 : f32
    %cst_6 = arith.constant -1.000000e+09 : f32
    %5 = vector.broadcast %cst_5 : f32 to vector<2x8xf32>
    %6 = vector.broadcast %cst_6 : f32 to vector<2x8xf32>
    %7 = arith.select %4, %5, %6 : vector<2x8xi1>, vector<2x8xf32>
    %cst_7 = arith.constant 5.000000e-01 : f32
    %8 = vector.broadcast %cst_7 : f32 to vector<2x8xf32>
    %9 = arith.cmpf ogt, %2, %8 : vector<2x8xf32>
    %cst_8 = arith.constant 0.000000e+00 : f32
    %cst_9 = arith.constant -1.000000e+09 : f32
    %10 = vector.broadcast %cst_8 : f32 to vector<2x8xf32>
    %11 = vector.broadcast %cst_9 : f32 to vector<2x8xf32>
    %12 = arith.select %9, %10, %11 : vector<2x8xi1>, vector<2x8xf32>
    %c0_10 = arith.constant 0 : index
    %c0_11 = arith.constant 0 : index
    %c0_12 = arith.constant 0 : index
    %13 = vector.load %arg3[%c0_10, %c0_11, %c0_12] : memref<3x32x96xf32, #tpu.memory_space<vmem>>, vector<1x32x96xf32>
    %14 = vector.shape_cast %13 : vector<1x32x96xf32> to vector<32x96xf32>
    %c0_13 = arith.constant 0 : index
    %c0_14 = arith.constant 0 : index
    %c0_15 = arith.constant 0 : index
    %15 = vector.load %arg4[%c0_13, %c0_14, %c0_15] : memref<3x1x96xf32, #tpu.memory_space<vmem>>, vector<1x1x96xf32>
    %16 = vector.shape_cast %15 : vector<1x1x96xf32> to vector<1x96xf32>
    %c0_16 = arith.constant 0 : index
    %c0_17 = arith.constant 0 : index
    %c0_18 = arith.constant 0 : index
    %17 = vector.load %arg5[%c0_16, %c0_17, %c0_18] : memref<3x32x32xf32, #tpu.memory_space<vmem>>, vector<1x32x32xf32>
    %18 = vector.shape_cast %17 : vector<1x32x32xf32> to vector<32x32xf32>
    %c0_19 = arith.constant 0 : index
    %c0_20 = arith.constant 0 : index
    %c0_21 = arith.constant 0 : index
    %19 = vector.load %arg6[%c0_19, %c0_20, %c0_21] : memref<3x1x32xf32, #tpu.memory_space<vmem>>, vector<1x1x32xf32>
    %20 = vector.shape_cast %19 : vector<1x1x32xf32> to vector<1x32xf32>
    %c0_22 = arith.constant 0 : index
    %c0_23 = arith.constant 0 : index
    %c0_24 = arith.constant 0 : index
    %21 = vector.load %arg7[%c0_22, %c0_23, %c0_24] : memref<3x32x64xf32, #tpu.memory_space<vmem>>, vector<1x32x64xf32>
    %22 = vector.shape_cast %21 : vector<1x32x64xf32> to vector<32x64xf32>
    %c0_25 = arith.constant 0 : index
    %c0_26 = arith.constant 0 : index
    %c0_27 = arith.constant 0 : index
    %23 = vector.load %arg8[%c0_25, %c0_26, %c0_27] : memref<3x1x64xf32, #tpu.memory_space<vmem>>, vector<1x1x64xf32>
    %24 = vector.shape_cast %23 : vector<1x1x64xf32> to vector<1x64xf32>
    %c0_28 = arith.constant 0 : index
    %c0_29 = arith.constant 0 : index
    %c0_30 = arith.constant 0 : index
    %25 = vector.load %arg9[%c0_28, %c0_29, %c0_30] : memref<3x64x32xf32, #tpu.memory_space<vmem>>, vector<1x64x32xf32>
    %26 = vector.shape_cast %25 : vector<1x64x32xf32> to vector<64x32xf32>
    %c0_31 = arith.constant 0 : index
    %c0_32 = arith.constant 0 : index
    %c0_33 = arith.constant 0 : index
    %27 = vector.load %arg10[%c0_31, %c0_32, %c0_33] : memref<3x1x32xf32, #tpu.memory_space<vmem>>, vector<1x1x32xf32>
    %28 = vector.shape_cast %27 : vector<1x1x32xf32> to vector<1x32xf32>
    %c0_34 = arith.constant 0 : index
    %c0_35 = arith.constant 0 : index
    %c0_36 = arith.constant 0 : index
    %29 = vector.load %arg11[%c0_34, %c0_35, %c0_36] : memref<3x1x32xf32, #tpu.memory_space<vmem>>, vector<1x1x32xf32>
    %30 = vector.shape_cast %29 : vector<1x1x32xf32> to vector<1x32xf32>
    %c0_37 = arith.constant 0 : index
    %c0_38 = arith.constant 0 : index
    %c0_39 = arith.constant 0 : index
    %31 = vector.load %arg12[%c0_37, %c0_38, %c0_39] : memref<3x1x32xf32, #tpu.memory_space<vmem>>, vector<1x1x32xf32>
    %32 = vector.shape_cast %31 : vector<1x1x32xf32> to vector<1x32xf32>
    %c0_40 = arith.constant 0 : index
    %c0_41 = arith.constant 0 : index
    %c0_42 = arith.constant 0 : index
    %33 = vector.load %arg13[%c0_40, %c0_41, %c0_42] : memref<3x1x32xf32, #tpu.memory_space<vmem>>, vector<1x1x32xf32>
    %34 = vector.shape_cast %33 : vector<1x1x32xf32> to vector<1x32xf32>
    %c0_43 = arith.constant 0 : index
    %c0_44 = arith.constant 0 : index
    %c0_45 = arith.constant 0 : index
    %35 = vector.load %arg14[%c0_43, %c0_44, %c0_45] : memref<3x1x32xf32, #tpu.memory_space<vmem>>, vector<1x1x32xf32>
    %36 = vector.shape_cast %35 : vector<1x1x32xf32> to vector<1x32xf32>
    %cst_46 = arith.constant dense<0.000000e+00> : vector<16x96xf32>
    %37 = tpu.matmul %0, %14, %cst_46 {dimension_numbers = #tpu.dot_dimension_numbers<[1], [0], [0], [1], [0, 0, 1, 1], [], []>} : vector<16x32xf32>, vector<32x96xf32>, vector<16x96xf32> -> vector<16x96xf32>
    %38 = vector.broadcast %16 : vector<1x96xf32> to vector<16x96xf32>
    %39 = arith.addf %37, %38 : vector<16x96xf32>
    %40 = vector.extract_strided_slice %39 {offsets = [0, 0], sizes = [8, 96], strides = [1, 1]} : vector<16x96xf32> to vector<8x96xf32>
    %41 = vector.extract_strided_slice %7 {offsets = [0, 0], sizes = [1, 8], strides = [1, 1]} : vector<2x8xf32> to vector<1x8xf32>
    %42 = vector.extract_strided_slice %40 {offsets = [0, 0], sizes = [8, 8], strides = [1, 1]} : vector<8x96xf32> to vector<8x8xf32>
    %43 = vector.extract_strided_slice %40 {offsets = [0, 32], sizes = [8, 8], strides = [1, 1]} : vector<8x96xf32> to vector<8x8xf32>
    %44 = vector.extract_strided_slice %40 {offsets = [0, 64], sizes = [8, 8], strides = [1, 1]} : vector<8x96xf32> to vector<8x8xf32>
    %cst_47 = arith.constant dense<0.000000e+00> : vector<8x8xf32>
    %45 = tpu.matmul %42, %43, %cst_47 {dimension_numbers = #tpu.dot_dimension_numbers<[1], [1], [0], [0], [0, 0, 1, 0], [], []>} : vector<8x8xf32>, vector<8x8xf32>, vector<8x8xf32> -> vector<8x8xf32>
    %cst_48 = arith.constant 0.353553385 : f32
    %46 = vector.broadcast %cst_48 : f32 to vector<8x8xf32>
    %47 = arith.mulf %45, %46 : vector<8x8xf32>
    %48 = vector.broadcast %41 : vector<1x8xf32> to vector<8x8xf32>
    %49 = arith.addf %47, %48 : vector<8x8xf32>
    %cst_49 = arith.constant dense<0xFF800000> : vector<8xf32>
    %50 = vector.multi_reduction <maximumf>, %49, %cst_49 [1] : vector<8x8xf32> to vector<8xf32>
    %51 = vector.shape_cast %50 : vector<8xf32> to vector<8x1xf32>
    %52 = vector.broadcast %51 : vector<8x1xf32> to vector<8x8xf32>
    %53 = arith.subf %49, %52 : vector<8x8xf32>
    %54 = math.exp %53 : vector<8x8xf32>
    %cst_50 = arith.constant dense<0.000000e+00> : vector<8xf32>
    %55 = vector.multi_reduction <add>, %54, %cst_50 [1] : vector<8x8xf32> to vector<8xf32>
    %56 = vector.shape_cast %55 : vector<8xf32> to vector<8x1xf32>
    %57 = tpu.reciprocal %56 {approx = true} : vector<8x1xf32> -> vector<8x1xf32>
    %58 = vector.broadcast %57 : vector<8x1xf32> to vector<8x8xf32>
    %59 = arith.mulf %54, %58 : vector<8x8xf32>
    %cst_51 = arith.constant dense<0.000000e+00> : vector<8x8xf32>
    %60 = tpu.matmul %59, %44, %cst_51 {dimension_numbers = #tpu.dot_dimension_numbers<[1], [0], [0], [1], [0, 0, 1, 1], [], []>} : vector<8x8xf32>, vector<8x8xf32>, vector<8x8xf32> -> vector<8x8xf32>
    %61 = vector.extract_strided_slice %40 {offsets = [0, 8], sizes = [8, 8], strides = [1, 1]} : vector<8x96xf32> to vector<8x8xf32>
    %62 = vector.extract_strided_slice %40 {offsets = [0, 40], sizes = [8, 8], strides = [1, 1]} : vector<8x96xf32> to vector<8x8xf32>
    %63 = vector.extract_strided_slice %40 {offsets = [0, 72], sizes = [8, 8], strides = [1, 1]} : vector<8x96xf32> to vector<8x8xf32>
    %cst_52 = arith.constant dense<0.000000e+00> : vector<8x8xf32>
    %64 = tpu.matmul %61, %62, %cst_52 {dimension_numbers = #tpu.dot_dimension_numbers<[1], [1], [0], [0], [0, 0, 1, 0], [], []>} : vector<8x8xf32>, vector<8x8xf32>, vector<8x8xf32> -> vector<8x8xf32>
    %cst_53 = arith.constant 0.353553385 : f32
    %65 = vector.broadcast %cst_53 : f32 to vector<8x8xf32>
    %66 = arith.mulf %64, %65 : vector<8x8xf32>
    %67 = vector.broadcast %41 : vector<1x8xf32> to vector<8x8xf32>
    %68 = arith.addf %66, %67 : vector<8x8xf32>
    %cst_54 = arith.constant dense<0xFF800000> : vector<8xf32>
    %69 = vector.multi_reduction <maximumf>, %68, %cst_54 [1] : vector<8x8xf32> to vector<8xf32>
    %70 = vector.shape_cast %69 : vector<8xf32> to vector<8x1xf32>
    %71 = vector.broadcast %70 : vector<8x1xf32> to vector<8x8xf32>
    %72 = arith.subf %68, %71 : vector<8x8xf32>
    %73 = math.exp %72 : vector<8x8xf32>
    %cst_55 = arith.constant dense<0.000000e+00> : vector<8xf32>
    %74 = vector.multi_reduction <add>, %73, %cst_55 [1] : vector<8x8xf32> to vector<8xf32>
    %75 = vector.shape_cast %74 : vector<8xf32> to vector<8x1xf32>
    %76 = tpu.reciprocal %75 {approx = true} : vector<8x1xf32> -> vector<8x1xf32>
    %77 = vector.broadcast %76 : vector<8x1xf32> to vector<8x8xf32>
    %78 = arith.mulf %73, %77 : vector<8x8xf32>
    %cst_56 = arith.constant dense<0.000000e+00> : vector<8x8xf32>
    %79 = tpu.matmul %78, %63, %cst_56 {dimension_numbers = #tpu.dot_dimension_numbers<[1], [0], [0], [1], [0, 0, 1, 1], [], []>} : vector<8x8xf32>, vector<8x8xf32>, vector<8x8xf32> -> vector<8x8xf32>
    %80 = vector.extract_strided_slice %40 {offsets = [0, 16], sizes = [8, 8], strides = [1, 1]} : vector<8x96xf32> to vector<8x8xf32>
    %81 = vector.extract_strided_slice %40 {offsets = [0, 48], sizes = [8, 8], strides = [1, 1]} : vector<8x96xf32> to vector<8x8xf32>
    %82 = vector.extract_strided_slice %40 {offsets = [0, 80], sizes = [8, 8], strides = [1, 1]} : vector<8x96xf32> to vector<8x8xf32>
    %cst_57 = arith.constant dense<0.000000e+00> : vector<8x8xf32>
    %83 = tpu.matmul %80, %81, %cst_57 {dimension_numbers = #tpu.dot_dimension_numbers<[1], [1], [0], [0], [0, 0, 1, 0], [], []>} : vector<8x8xf32>, vector<8x8xf32>, vector<8x8xf32> -> vector<8x8xf32>
    %cst_58 = arith.constant 0.353553385 : f32
    %84 = vector.broadcast %cst_58 : f32 to vector<8x8xf32>
    %85 = arith.mulf %83, %84 : vector<8x8xf32>
    %86 = vector.broadcast %41 : vector<1x8xf32> to vector<8x8xf32>
    %87 = arith.addf %85, %86 : vector<8x8xf32>
    %cst_59 = arith.constant dense<0xFF800000> : vector<8xf32>
    %88 = vector.multi_reduction <maximumf>, %87, %cst_59 [1] : vector<8x8xf32> to vector<8xf32>
    %89 = vector.shape_cast %88 : vector<8xf32> to vector<8x1xf32>
    %90 = vector.broadcast %89 : vector<8x1xf32> to vector<8x8xf32>
    %91 = arith.subf %87, %90 : vector<8x8xf32>
    %92 = math.exp %91 : vector<8x8xf32>
    %cst_60 = arith.constant dense<0.000000e+00> : vector<8xf32>
    %93 = vector.multi_reduction <add>, %92, %cst_60 [1] : vector<8x8xf32> to vector<8xf32>
    %94 = vector.shape_cast %93 : vector<8xf32> to vector<8x1xf32>
    %95 = tpu.reciprocal %94 {approx = true} : vector<8x1xf32> -> vector<8x1xf32>
    %96 = vector.broadcast %95 : vector<8x1xf32> to vector<8x8xf32>
    %97 = arith.mulf %92, %96 : vector<8x8xf32>
    %cst_61 = arith.constant dense<0.000000e+00> : vector<8x8xf32>
    %98 = tpu.matmul %97, %82, %cst_61 {dimension_numbers = #tpu.dot_dimension_numbers<[1], [0], [0], [1], [0, 0, 1, 1], [], []>} : vector<8x8xf32>, vector<8x8xf32>, vector<8x8xf32> -> vector<8x8xf32>
    %99 = vector.extract_strided_slice %40 {offsets = [0, 24], sizes = [8, 8], strides = [1, 1]} : vector<8x96xf32> to vector<8x8xf32>
    %100 = vector.extract_strided_slice %40 {offsets = [0, 56], sizes = [8, 8], strides = [1, 1]} : vector<8x96xf32> to vector<8x8xf32>
    %101 = vector.extract_strided_slice %40 {offsets = [0, 88], sizes = [8, 8], strides = [1, 1]} : vector<8x96xf32> to vector<8x8xf32>
    %cst_62 = arith.constant dense<0.000000e+00> : vector<8x8xf32>
    %102 = tpu.matmul %99, %100, %cst_62 {dimension_numbers = #tpu.dot_dimension_numbers<[1], [1], [0], [0], [0, 0, 1, 0], [], []>} : vector<8x8xf32>, vector<8x8xf32>, vector<8x8xf32> -> vector<8x8xf32>
    %cst_63 = arith.constant 0.353553385 : f32
    %103 = vector.broadcast %cst_63 : f32 to vector<8x8xf32>
    %104 = arith.mulf %102, %103 : vector<8x8xf32>
    %105 = vector.broadcast %41 : vector<1x8xf32> to vector<8x8xf32>
    %106 = arith.addf %104, %105 : vector<8x8xf32>
    %cst_64 = arith.constant dense<0xFF800000> : vector<8xf32>
    %107 = vector.multi_reduction <maximumf>, %106, %cst_64 [1] : vector<8x8xf32> to vector<8xf32>
    %108 = vector.shape_cast %107 : vector<8xf32> to vector<8x1xf32>
    %109 = vector.broadcast %108 : vector<8x1xf32> to vector<8x8xf32>
    %110 = arith.subf %106, %109 : vector<8x8xf32>
    %111 = math.exp %110 : vector<8x8xf32>
    %cst_65 = arith.constant dense<0.000000e+00> : vector<8xf32>
    %112 = vector.multi_reduction <add>, %111, %cst_65 [1] : vector<8x8xf32> to vector<8xf32>
    %113 = vector.shape_cast %112 : vector<8xf32> to vector<8x1xf32>
    %114 = tpu.reciprocal %113 {approx = true} : vector<8x1xf32> -> vector<8x1xf32>
    %115 = vector.broadcast %114 : vector<8x1xf32> to vector<8x8xf32>
    %116 = arith.mulf %111, %115 : vector<8x8xf32>
    %cst_66 = arith.constant dense<0.000000e+00> : vector<8x8xf32>
    %117 = tpu.matmul %116, %101, %cst_66 {dimension_numbers = #tpu.dot_dimension_numbers<[1], [0], [0], [1], [0, 0, 1, 1], [], []>} : vector<8x8xf32>, vector<8x8xf32>, vector<8x8xf32> -> vector<8x8xf32>
    %118 = tpu.concatenate %60, %79, %98, %117 in 1 : vector<8x8xf32>, vector<8x8xf32>, vector<8x8xf32>, vector<8x8xf32> -> vector<8x32xf32>
    %119 = vector.extract_strided_slice %39 {offsets = [8, 0], sizes = [8, 96], strides = [1, 1]} : vector<16x96xf32> to vector<8x96xf32>
    %120 = vector.extract_strided_slice %7 {offsets = [1, 0], sizes = [1, 8], strides = [1, 1]} : vector<2x8xf32> to vector<1x8xf32>
    %121 = vector.extract_strided_slice %119 {offsets = [0, 0], sizes = [8, 8], strides = [1, 1]} : vector<8x96xf32> to vector<8x8xf32>
    %122 = vector.extract_strided_slice %119 {offsets = [0, 32], sizes = [8, 8], strides = [1, 1]} : vector<8x96xf32> to vector<8x8xf32>
    %123 = vector.extract_strided_slice %119 {offsets = [0, 64], sizes = [8, 8], strides = [1, 1]} : vector<8x96xf32> to vector<8x8xf32>
    %cst_67 = arith.constant dense<0.000000e+00> : vector<8x8xf32>
    %124 = tpu.matmul %121, %122, %cst_67 {dimension_numbers = #tpu.dot_dimension_numbers<[1], [1], [0], [0], [0, 0, 1, 0], [], []>} : vector<8x8xf32>, vector<8x8xf32>, vector<8x8xf32> -> vector<8x8xf32>
    %cst_68 = arith.constant 0.353553385 : f32
    %125 = vector.broadcast %cst_68 : f32 to vector<8x8xf32>
    %126 = arith.mulf %124, %125 : vector<8x8xf32>
    %127 = vector.broadcast %120 : vector<1x8xf32> to vector<8x8xf32>
    %128 = arith.addf %126, %127 : vector<8x8xf32>
    %cst_69 = arith.constant dense<0xFF800000> : vector<8xf32>
    %129 = vector.multi_reduction <maximumf>, %128, %cst_69 [1] : vector<8x8xf32> to vector<8xf32>
    %130 = vector.shape_cast %129 : vector<8xf32> to vector<8x1xf32>
    %131 = vector.broadcast %130 : vector<8x1xf32> to vector<8x8xf32>
    %132 = arith.subf %128, %131 : vector<8x8xf32>
    %133 = math.exp %132 : vector<8x8xf32>
    %cst_70 = arith.constant dense<0.000000e+00> : vector<8xf32>
    %134 = vector.multi_reduction <add>, %133, %cst_70 [1] : vector<8x8xf32> to vector<8xf32>
    %135 = vector.shape_cast %134 : vector<8xf32> to vector<8x1xf32>
    %136 = tpu.reciprocal %135 {approx = true} : vector<8x1xf32> -> vector<8x1xf32>
    %137 = vector.broadcast %136 : vector<8x1xf32> to vector<8x8xf32>
    %138 = arith.mulf %133, %137 : vector<8x8xf32>
    %cst_71 = arith.constant dense<0.000000e+00> : vector<8x8xf32>
    %139 = tpu.matmul %138, %123, %cst_71 {dimension_numbers = #tpu.dot_dimension_numbers<[1], [0], [0], [1], [0, 0, 1, 1], [], []>} : vector<8x8xf32>, vector<8x8xf32>, vector<8x8xf32> -> vector<8x8xf32>
    %140 = vector.extract_strided_slice %119 {offsets = [0, 8], sizes = [8, 8], strides = [1, 1]} : vector<8x96xf32> to vector<8x8xf32>
    %141 = vector.extract_strided_slice %119 {offsets = [0, 40], sizes = [8, 8], strides = [1, 1]} : vector<8x96xf32> to vector<8x8xf32>
    %142 = vector.extract_strided_slice %119 {offsets = [0, 72], sizes = [8, 8], strides = [1, 1]} : vector<8x96xf32> to vector<8x8xf32>
    %cst_72 = arith.constant dense<0.000000e+00> : vector<8x8xf32>
    %143 = tpu.matmul %140, %141, %cst_72 {dimension_numbers = #tpu.dot_dimension_numbers<[1], [1], [0], [0], [0, 0, 1, 0], [], []>} : vector<8x8xf32>, vector<8x8xf32>, vector<8x8xf32> -> vector<8x8xf32>
    %cst_73 = arith.constant 0.353553385 : f32
    %144 = vector.broadcast %cst_73 : f32 to vector<8x8xf32>
    %145 = arith.mulf %143, %144 : vector<8x8xf32>
    %146 = vector.broadcast %120 : vector<1x8xf32> to vector<8x8xf32>
    %147 = arith.addf %145, %146 : vector<8x8xf32>
    %cst_74 = arith.constant dense<0xFF800000> : vector<8xf32>
    %148 = vector.multi_reduction <maximumf>, %147, %cst_74 [1] : vector<8x8xf32> to vector<8xf32>
    %149 = vector.shape_cast %148 : vector<8xf32> to vector<8x1xf32>
    %150 = vector.broadcast %149 : vector<8x1xf32> to vector<8x8xf32>
    %151 = arith.subf %147, %150 : vector<8x8xf32>
    %152 = math.exp %151 : vector<8x8xf32>
    %cst_75 = arith.constant dense<0.000000e+00> : vector<8xf32>
    %153 = vector.multi_reduction <add>, %152, %cst_75 [1] : vector<8x8xf32> to vector<8xf32>
    %154 = vector.shape_cast %153 : vector<8xf32> to vector<8x1xf32>
    %155 = tpu.reciprocal %154 {approx = true} : vector<8x1xf32> -> vector<8x1xf32>
    %156 = vector.broadcast %155 : vector<8x1xf32> to vector<8x8xf32>
    %157 = arith.mulf %152, %156 : vector<8x8xf32>
    %cst_76 = arith.constant dense<0.000000e+00> : vector<8x8xf32>
    %158 = tpu.matmul %157, %142, %cst_76 {dimension_numbers = #tpu.dot_dimension_numbers<[1], [0], [0], [1], [0, 0, 1, 1], [], []>} : vector<8x8xf32>, vector<8x8xf32>, vector<8x8xf32> -> vector<8x8xf32>
    %159 = vector.extract_strided_slice %119 {offsets = [0, 16], sizes = [8, 8], strides = [1, 1]} : vector<8x96xf32> to vector<8x8xf32>
    %160 = vector.extract_strided_slice %119 {offsets = [0, 48], sizes = [8, 8], strides = [1, 1]} : vector<8x96xf32> to vector<8x8xf32>
    %161 = vector.extract_strided_slice %119 {offsets = [0, 80], sizes = [8, 8], strides = [1, 1]} : vector<8x96xf32> to vector<8x8xf32>
    %cst_77 = arith.constant dense<0.000000e+00> : vector<8x8xf32>
    %162 = tpu.matmul %159, %160, %cst_77 {dimension_numbers = #tpu.dot_dimension_numbers<[1], [1], [0], [0], [0, 0, 1, 0], [], []>} : vector<8x8xf32>, vector<8x8xf32>, vector<8x8xf32> -> vector<8x8xf32>
    %cst_78 = arith.constant 0.353553385 : f32
    %163 = vector.broadcast %cst_78 : f32 to vector<8x8xf32>
    %164 = arith.mulf %162, %163 : vector<8x8xf32>
    %165 = vector.broadcast %120 : vector<1x8xf32> to vector<8x8xf32>
    %166 = arith.addf %164, %165 : vector<8x8xf32>
    %cst_79 = arith.constant dense<0xFF800000> : vector<8xf32>
    %167 = vector.multi_reduction <maximumf>, %166, %cst_79 [1] : vector<8x8xf32> to vector<8xf32>
    %168 = vector.shape_cast %167 : vector<8xf32> to vector<8x1xf32>
    %169 = vector.broadcast %168 : vector<8x1xf32> to vector<8x8xf32>
    %170 = arith.subf %166, %169 : vector<8x8xf32>
    %171 = math.exp %170 : vector<8x8xf32>
    %cst_80 = arith.constant dense<0.000000e+00> : vector<8xf32>
    %172 = vector.multi_reduction <add>, %171, %cst_80 [1] : vector<8x8xf32> to vector<8xf32>
    %173 = vector.shape_cast %172 : vector<8xf32> to vector<8x1xf32>
    %174 = tpu.reciprocal %173 {approx = true} : vector<8x1xf32> -> vector<8x1xf32>
    %175 = vector.broadcast %174 : vector<8x1xf32> to vector<8x8xf32>
    %176 = arith.mulf %171, %175 : vector<8x8xf32>
    %cst_81 = arith.constant dense<0.000000e+00> : vector<8x8xf32>
    %177 = tpu.matmul %176, %161, %cst_81 {dimension_numbers = #tpu.dot_dimension_numbers<[1], [0], [0], [1], [0, 0, 1, 1], [], []>} : vector<8x8xf32>, vector<8x8xf32>, vector<8x8xf32> -> vector<8x8xf32>
    %178 = vector.extract_strided_slice %119 {offsets = [0, 24], sizes = [8, 8], strides = [1, 1]} : vector<8x96xf32> to vector<8x8xf32>
    %179 = vector.extract_strided_slice %119 {offsets = [0, 56], sizes = [8, 8], strides = [1, 1]} : vector<8x96xf32> to vector<8x8xf32>
    %180 = vector.extract_strided_slice %119 {offsets = [0, 88], sizes = [8, 8], strides = [1, 1]} : vector<8x96xf32> to vector<8x8xf32>
    %cst_82 = arith.constant dense<0.000000e+00> : vector<8x8xf32>
    %181 = tpu.matmul %178, %179, %cst_82 {dimension_numbers = #tpu.dot_dimension_numbers<[1], [1], [0], [0], [0, 0, 1, 0], [], []>} : vector<8x8xf32>, vector<8x8xf32>, vector<8x8xf32> -> vector<8x8xf32>
    %cst_83 = arith.constant 0.353553385 : f32
    %182 = vector.broadcast %cst_83 : f32 to vector<8x8xf32>
    %183 = arith.mulf %181, %182 : vector<8x8xf32>
    %184 = vector.broadcast %120 : vector<1x8xf32> to vector<8x8xf32>
    %185 = arith.addf %183, %184 : vector<8x8xf32>
    %cst_84 = arith.constant dense<0xFF800000> : vector<8xf32>
    %186 = vector.multi_reduction <maximumf>, %185, %cst_84 [1] : vector<8x8xf32> to vector<8xf32>
    %187 = vector.shape_cast %186 : vector<8xf32> to vector<8x1xf32>
    %188 = vector.broadcast %187 : vector<8x1xf32> to vector<8x8xf32>
    %189 = arith.subf %185, %188 : vector<8x8xf32>
    %190 = math.exp %189 : vector<8x8xf32>
    %cst_85 = arith.constant dense<0.000000e+00> : vector<8xf32>
    %191 = vector.multi_reduction <add>, %190, %cst_85 [1] : vector<8x8xf32> to vector<8xf32>
    %192 = vector.shape_cast %191 : vector<8xf32> to vector<8x1xf32>
    %193 = tpu.reciprocal %192 {approx = true} : vector<8x1xf32> -> vector<8x1xf32>
    %194 = vector.broadcast %193 : vector<8x1xf32> to vector<8x8xf32>
    %195 = arith.mulf %190, %194 : vector<8x8xf32>
    %cst_86 = arith.constant dense<0.000000e+00> : vector<8x8xf32>
    %196 = tpu.matmul %195, %180, %cst_86 {dimension_numbers = #tpu.dot_dimension_numbers<[1], [0], [0], [1], [0, 0, 1, 1], [], []>} : vector<8x8xf32>, vector<8x8xf32>, vector<8x8xf32> -> vector<8x8xf32>
    %197 = tpu.concatenate %139, %158, %177, %196 in 1 : vector<8x8xf32>, vector<8x8xf32>, vector<8x8xf32>, vector<8x8xf32> -> vector<8x32xf32>
    %198 = tpu.concatenate %118, %197 in 0 : vector<8x32xf32>, vector<8x32xf32> -> vector<16x32xf32>
    %cst_87 = arith.constant dense<0.000000e+00> : vector<16x32xf32>
    %199 = tpu.matmul %198, %18, %cst_87 {dimension_numbers = #tpu.dot_dimension_numbers<[1], [0], [0], [1], [0, 0, 1, 1], [], []>} : vector<16x32xf32>, vector<32x32xf32>, vector<16x32xf32> -> vector<16x32xf32>
    %200 = vector.broadcast %20 : vector<1x32xf32> to vector<16x32xf32>
    %201 = arith.addf %199, %200 : vector<16x32xf32>
    %202 = arith.addf %201, %0 : vector<16x32xf32>
    %cst_88 = arith.constant dense<0.000000e+00> : vector<16xf32>
    %203 = vector.multi_reduction <add>, %202, %cst_88 [1] : vector<16x32xf32> to vector<16xf32>
    %204 = vector.shape_cast %203 : vector<16xf32> to vector<16x1xf32>
    %cst_89 = arith.constant 3.200000e+01 : f32
    %205 = vector.broadcast %cst_89 : f32 to vector<16x1xf32>
    %206 = arith.divf %204, %205 : vector<16x1xf32>
    %207 = vector.broadcast %206 : vector<16x1xf32> to vector<16x32xf32>
    %208 = arith.subf %202, %207 : vector<16x32xf32>
    %209 = arith.mulf %208, %208 : vector<16x32xf32>
    %cst_90 = arith.constant dense<0.000000e+00> : vector<16xf32>
    %210 = vector.multi_reduction <add>, %209, %cst_90 [1] : vector<16x32xf32> to vector<16xf32>
    %211 = vector.shape_cast %210 : vector<16xf32> to vector<16x1xf32>
    %cst_91 = arith.constant 3.200000e+01 : f32
    %212 = vector.broadcast %cst_91 : f32 to vector<16x1xf32>
    %213 = arith.divf %211, %212 : vector<16x1xf32>
    %214 = vector.broadcast %206 : vector<16x1xf32> to vector<16x32xf32>
    %215 = arith.subf %202, %214 : vector<16x32xf32>
    %cst_92 = arith.constant 9.99999974E-6 : f32
    %216 = vector.broadcast %cst_92 : f32 to vector<16x1xf32>
    %217 = arith.addf %213, %216 : vector<16x1xf32>
    %218 = math.rsqrt %217 : vector<16x1xf32>
    %219 = vector.broadcast %218 : vector<16x1xf32> to vector<16x32xf32>
    %220 = arith.mulf %215, %219 : vector<16x32xf32>
    %221 = vector.broadcast %30 : vector<1x32xf32> to vector<16x32xf32>
    %222 = arith.mulf %220, %221 : vector<16x32xf32>
    %223 = vector.broadcast %32 : vector<1x32xf32> to vector<16x32xf32>
    %224 = arith.addf %222, %223 : vector<16x32xf32>
    %cst_93 = arith.constant dense<0.000000e+00> : vector<16x64xf32>
    %225 = tpu.matmul %224, %22, %cst_93 {dimension_numbers = #tpu.dot_dimension_numbers<[1], [0], [0], [1], [0, 0, 1, 1], [], []>} : vector<16x32xf32>, vector<32x64xf32>, vector<16x64xf32> -> vector<16x64xf32>
    %226 = vector.broadcast %24 : vector<1x64xf32> to vector<16x64xf32>
    %227 = arith.addf %225, %226 : vector<16x64xf32>
    %228 = arith.mulf %227, %227 : vector<16x64xf32>
    %229 = arith.mulf %227, %228 : vector<16x64xf32>
    %cst_94 = arith.constant 4.471500e-02 : f32
    %230 = vector.broadcast %cst_94 : f32 to vector<16x64xf32>
    %231 = arith.mulf %230, %229 : vector<16x64xf32>
    %232 = arith.addf %227, %231 : vector<16x64xf32>
    %cst_95 = arith.constant 0.797884583 : f32
    %233 = vector.broadcast %cst_95 : f32 to vector<16x64xf32>
    %234 = arith.mulf %233, %232 : vector<16x64xf32>
    %235 = math.tanh %234 : vector<16x64xf32>
    %cst_96 = arith.constant 1.000000e+00 : f32
    %236 = vector.broadcast %cst_96 : f32 to vector<16x64xf32>
    %237 = arith.addf %236, %235 : vector<16x64xf32>
    %cst_97 = arith.constant 5.000000e-01 : f32
    %238 = vector.broadcast %cst_97 : f32 to vector<16x64xf32>
    %239 = arith.mulf %238, %237 : vector<16x64xf32>
    %240 = arith.mulf %227, %239 : vector<16x64xf32>
    %cst_98 = arith.constant dense<0.000000e+00> : vector<16x32xf32>
    %241 = tpu.matmul %240, %26, %cst_98 {dimension_numbers = #tpu.dot_dimension_numbers<[1], [0], [0], [1], [0, 0, 1, 1], [], []>} : vector<16x64xf32>, vector<64x32xf32>, vector<16x32xf32> -> vector<16x32xf32>
    %242 = vector.broadcast %28 : vector<1x32xf32> to vector<16x32xf32>
    %243 = arith.addf %241, %242 : vector<16x32xf32>
    %244 = arith.addf %243, %224 : vector<16x32xf32>
    %cst_99 = arith.constant dense<0.000000e+00> : vector<16xf32>
    %245 = vector.multi_reduction <add>, %244, %cst_99 [1] : vector<16x32xf32> to vector<16xf32>
    %246 = vector.shape_cast %245 : vector<16xf32> to vector<16x1xf32>
    %cst_100 = arith.constant 3.200000e+01 : f32
    %247 = vector.broadcast %cst_100 : f32 to vector<16x1xf32>
    %248 = arith.divf %246, %247 : vector<16x1xf32>
    %249 = vector.broadcast %248 : vector<16x1xf32> to vector<16x32xf32>
    %250 = arith.subf %244, %249 : vector<16x32xf32>
    %251 = arith.mulf %250, %250 : vector<16x32xf32>
    %cst_101 = arith.constant dense<0.000000e+00> : vector<16xf32>
    %252 = vector.multi_reduction <add>, %251, %cst_101 [1] : vector<16x32xf32> to vector<16xf32>
    %253 = vector.shape_cast %252 : vector<16xf32> to vector<16x1xf32>
    %cst_102 = arith.constant 3.200000e+01 : f32
    %254 = vector.broadcast %cst_102 : f32 to vector<16x1xf32>
    %255 = arith.divf %253, %254 : vector<16x1xf32>
    %256 = vector.broadcast %248 : vector<16x1xf32> to vector<16x32xf32>
    %257 = arith.subf %244, %256 : vector<16x32xf32>
    %cst_103 = arith.constant 9.99999974E-6 : f32
    %258 = vector.broadcast %cst_103 : f32 to vector<16x1xf32>
    %259 = arith.addf %255, %258 : vector<16x1xf32>
    %260 = math.rsqrt %259 : vector<16x1xf32>
    %261 = vector.broadcast %260 : vector<16x1xf32> to vector<16x32xf32>
    %262 = arith.mulf %257, %261 : vector<16x32xf32>
    %263 = vector.broadcast %34 : vector<1x32xf32> to vector<16x32xf32>
    %264 = arith.mulf %262, %263 : vector<16x32xf32>
    %265 = vector.broadcast %36 : vector<1x32xf32> to vector<16x32xf32>
    %266 = arith.addf %264, %265 : vector<16x32xf32>
    %c1 = arith.constant 1 : index
    %c0_104 = arith.constant 0 : index
    %c0_105 = arith.constant 0 : index
    %267 = vector.load %arg3[%c1, %c0_104, %c0_105] : memref<3x32x96xf32, #tpu.memory_space<vmem>>, vector<1x32x96xf32>
    %268 = vector.shape_cast %267 : vector<1x32x96xf32> to vector<32x96xf32>
    %c1_106 = arith.constant 1 : index
    %c0_107 = arith.constant 0 : index
    %c0_108 = arith.constant 0 : index
    %269 = vector.load %arg4[%c1_106, %c0_107, %c0_108] : memref<3x1x96xf32, #tpu.memory_space<vmem>>, vector<1x1x96xf32>
    %270 = vector.shape_cast %269 : vector<1x1x96xf32> to vector<1x96xf32>
    %c1_109 = arith.constant 1 : index
    %c0_110 = arith.constant 0 : index
    %c0_111 = arith.constant 0 : index
    %271 = vector.load %arg5[%c1_109, %c0_110, %c0_111] : memref<3x32x32xf32, #tpu.memory_space<vmem>>, vector<1x32x32xf32>
    %272 = vector.shape_cast %271 : vector<1x32x32xf32> to vector<32x32xf32>
    %c1_112 = arith.constant 1 : index
    %c0_113 = arith.constant 0 : index
    %c0_114 = arith.constant 0 : index
    %273 = vector.load %arg6[%c1_112, %c0_113, %c0_114] : memref<3x1x32xf32, #tpu.memory_space<vmem>>, vector<1x1x32xf32>
    %274 = vector.shape_cast %273 : vector<1x1x32xf32> to vector<1x32xf32>
    %c1_115 = arith.constant 1 : index
    %c0_116 = arith.constant 0 : index
    %c0_117 = arith.constant 0 : index
    %275 = vector.load %arg7[%c1_115, %c0_116, %c0_117] : memref<3x32x64xf32, #tpu.memory_space<vmem>>, vector<1x32x64xf32>
    %276 = vector.shape_cast %275 : vector<1x32x64xf32> to vector<32x64xf32>
    %c1_118 = arith.constant 1 : index
    %c0_119 = arith.constant 0 : index
    %c0_120 = arith.constant 0 : index
    %277 = vector.load %arg8[%c1_118, %c0_119, %c0_120] : memref<3x1x64xf32, #tpu.memory_space<vmem>>, vector<1x1x64xf32>
    %278 = vector.shape_cast %277 : vector<1x1x64xf32> to vector<1x64xf32>
    %c1_121 = arith.constant 1 : index
    %c0_122 = arith.constant 0 : index
    %c0_123 = arith.constant 0 : index
    %279 = vector.load %arg9[%c1_121, %c0_122, %c0_123] : memref<3x64x32xf32, #tpu.memory_space<vmem>>, vector<1x64x32xf32>
    %280 = vector.shape_cast %279 : vector<1x64x32xf32> to vector<64x32xf32>
    %c1_124 = arith.constant 1 : index
    %c0_125 = arith.constant 0 : index
    %c0_126 = arith.constant 0 : index
    %281 = vector.load %arg10[%c1_124, %c0_125, %c0_126] : memref<3x1x32xf32, #tpu.memory_space<vmem>>, vector<1x1x32xf32>
    %282 = vector.shape_cast %281 : vector<1x1x32xf32> to vector<1x32xf32>
    %c1_127 = arith.constant 1 : index
    %c0_128 = arith.constant 0 : index
    %c0_129 = arith.constant 0 : index
    %283 = vector.load %arg11[%c1_127, %c0_128, %c0_129] : memref<3x1x32xf32, #tpu.memory_space<vmem>>, vector<1x1x32xf32>
    %284 = vector.shape_cast %283 : vector<1x1x32xf32> to vector<1x32xf32>
    %c1_130 = arith.constant 1 : index
    %c0_131 = arith.constant 0 : index
    %c0_132 = arith.constant 0 : index
    %285 = vector.load %arg12[%c1_130, %c0_131, %c0_132] : memref<3x1x32xf32, #tpu.memory_space<vmem>>, vector<1x1x32xf32>
    %286 = vector.shape_cast %285 : vector<1x1x32xf32> to vector<1x32xf32>
    %c1_133 = arith.constant 1 : index
    %c0_134 = arith.constant 0 : index
    %c0_135 = arith.constant 0 : index
    %287 = vector.load %arg13[%c1_133, %c0_134, %c0_135] : memref<3x1x32xf32, #tpu.memory_space<vmem>>, vector<1x1x32xf32>
    %288 = vector.shape_cast %287 : vector<1x1x32xf32> to vector<1x32xf32>
    %c1_136 = arith.constant 1 : index
    %c0_137 = arith.constant 0 : index
    %c0_138 = arith.constant 0 : index
    %289 = vector.load %arg14[%c1_136, %c0_137, %c0_138] : memref<3x1x32xf32, #tpu.memory_space<vmem>>, vector<1x1x32xf32>
    %290 = vector.shape_cast %289 : vector<1x1x32xf32> to vector<1x32xf32>
    %cst_139 = arith.constant dense<0.000000e+00> : vector<16x96xf32>
    %291 = tpu.matmul %266, %268, %cst_139 {dimension_numbers = #tpu.dot_dimension_numbers<[1], [0], [0], [1], [0, 0, 1, 1], [], []>} : vector<16x32xf32>, vector<32x96xf32>, vector<16x96xf32> -> vector<16x96xf32>
    %292 = vector.broadcast %270 : vector<1x96xf32> to vector<16x96xf32>
    %293 = arith.addf %291, %292 : vector<16x96xf32>
    %294 = vector.extract_strided_slice %293 {offsets = [0, 0], sizes = [8, 96], strides = [1, 1]} : vector<16x96xf32> to vector<8x96xf32>
    %295 = vector.extract_strided_slice %7 {offsets = [0, 0], sizes = [1, 8], strides = [1, 1]} : vector<2x8xf32> to vector<1x8xf32>
    %296 = vector.extract_strided_slice %294 {offsets = [0, 0], sizes = [8, 8], strides = [1, 1]} : vector<8x96xf32> to vector<8x8xf32>
    %297 = vector.extract_strided_slice %294 {offsets = [0, 32], sizes = [8, 8], strides = [1, 1]} : vector<8x96xf32> to vector<8x8xf32>
    %298 = vector.extract_strided_slice %294 {offsets = [0, 64], sizes = [8, 8], strides = [1, 1]} : vector<8x96xf32> to vector<8x8xf32>
    %cst_140 = arith.constant dense<0.000000e+00> : vector<8x8xf32>
    %299 = tpu.matmul %296, %297, %cst_140 {dimension_numbers = #tpu.dot_dimension_numbers<[1], [1], [0], [0], [0, 0, 1, 0], [], []>} : vector<8x8xf32>, vector<8x8xf32>, vector<8x8xf32> -> vector<8x8xf32>
    %cst_141 = arith.constant 0.353553385 : f32
    %300 = vector.broadcast %cst_141 : f32 to vector<8x8xf32>
    %301 = arith.mulf %299, %300 : vector<8x8xf32>
    %302 = vector.broadcast %295 : vector<1x8xf32> to vector<8x8xf32>
    %303 = arith.addf %301, %302 : vector<8x8xf32>
    %cst_142 = arith.constant dense<0xFF800000> : vector<8xf32>
    %304 = vector.multi_reduction <maximumf>, %303, %cst_142 [1] : vector<8x8xf32> to vector<8xf32>
    %305 = vector.shape_cast %304 : vector<8xf32> to vector<8x1xf32>
    %306 = vector.broadcast %305 : vector<8x1xf32> to vector<8x8xf32>
    %307 = arith.subf %303, %306 : vector<8x8xf32>
    %308 = math.exp %307 : vector<8x8xf32>
    %cst_143 = arith.constant dense<0.000000e+00> : vector<8xf32>
    %309 = vector.multi_reduction <add>, %308, %cst_143 [1] : vector<8x8xf32> to vector<8xf32>
    %310 = vector.shape_cast %309 : vector<8xf32> to vector<8x1xf32>
    %311 = tpu.reciprocal %310 {approx = true} : vector<8x1xf32> -> vector<8x1xf32>
    %312 = vector.broadcast %311 : vector<8x1xf32> to vector<8x8xf32>
    %313 = arith.mulf %308, %312 : vector<8x8xf32>
    %cst_144 = arith.constant dense<0.000000e+00> : vector<8x8xf32>
    %314 = tpu.matmul %313, %298, %cst_144 {dimension_numbers = #tpu.dot_dimension_numbers<[1], [0], [0], [1], [0, 0, 1, 1], [], []>} : vector<8x8xf32>, vector<8x8xf32>, vector<8x8xf32> -> vector<8x8xf32>
    %315 = vector.extract_strided_slice %294 {offsets = [0, 8], sizes = [8, 8], strides = [1, 1]} : vector<8x96xf32> to vector<8x8xf32>
    %316 = vector.extract_strided_slice %294 {offsets = [0, 40], sizes = [8, 8], strides = [1, 1]} : vector<8x96xf32> to vector<8x8xf32>
    %317 = vector.extract_strided_slice %294 {offsets = [0, 72], sizes = [8, 8], strides = [1, 1]} : vector<8x96xf32> to vector<8x8xf32>
    %cst_145 = arith.constant dense<0.000000e+00> : vector<8x8xf32>
    %318 = tpu.matmul %315, %316, %cst_145 {dimension_numbers = #tpu.dot_dimension_numbers<[1], [1], [0], [0], [0, 0, 1, 0], [], []>} : vector<8x8xf32>, vector<8x8xf32>, vector<8x8xf32> -> vector<8x8xf32>
    %cst_146 = arith.constant 0.353553385 : f32
    %319 = vector.broadcast %cst_146 : f32 to vector<8x8xf32>
    %320 = arith.mulf %318, %319 : vector<8x8xf32>
    %321 = vector.broadcast %295 : vector<1x8xf32> to vector<8x8xf32>
    %322 = arith.addf %320, %321 : vector<8x8xf32>
    %cst_147 = arith.constant dense<0xFF800000> : vector<8xf32>
    %323 = vector.multi_reduction <maximumf>, %322, %cst_147 [1] : vector<8x8xf32> to vector<8xf32>
    %324 = vector.shape_cast %323 : vector<8xf32> to vector<8x1xf32>
    %325 = vector.broadcast %324 : vector<8x1xf32> to vector<8x8xf32>
    %326 = arith.subf %322, %325 : vector<8x8xf32>
    %327 = math.exp %326 : vector<8x8xf32>
    %cst_148 = arith.constant dense<0.000000e+00> : vector<8xf32>
    %328 = vector.multi_reduction <add>, %327, %cst_148 [1] : vector<8x8xf32> to vector<8xf32>
    %329 = vector.shape_cast %328 : vector<8xf32> to vector<8x1xf32>
    %330 = tpu.reciprocal %329 {approx = true} : vector<8x1xf32> -> vector<8x1xf32>
    %331 = vector.broadcast %330 : vector<8x1xf32> to vector<8x8xf32>
    %332 = arith.mulf %327, %331 : vector<8x8xf32>
    %cst_149 = arith.constant dense<0.000000e+00> : vector<8x8xf32>
    %333 = tpu.matmul %332, %317, %cst_149 {dimension_numbers = #tpu.dot_dimension_numbers<[1], [0], [0], [1], [0, 0, 1, 1], [], []>} : vector<8x8xf32>, vector<8x8xf32>, vector<8x8xf32> -> vector<8x8xf32>
    %334 = vector.extract_strided_slice %294 {offsets = [0, 16], sizes = [8, 8], strides = [1, 1]} : vector<8x96xf32> to vector<8x8xf32>
    %335 = vector.extract_strided_slice %294 {offsets = [0, 48], sizes = [8, 8], strides = [1, 1]} : vector<8x96xf32> to vector<8x8xf32>
    %336 = vector.extract_strided_slice %294 {offsets = [0, 80], sizes = [8, 8], strides = [1, 1]} : vector<8x96xf32> to vector<8x8xf32>
    %cst_150 = arith.constant dense<0.000000e+00> : vector<8x8xf32>
    %337 = tpu.matmul %334, %335, %cst_150 {dimension_numbers = #tpu.dot_dimension_numbers<[1], [1], [0], [0], [0, 0, 1, 0], [], []>} : vector<8x8xf32>, vector<8x8xf32>, vector<8x8xf32> -> vector<8x8xf32>
    %cst_151 = arith.constant 0.353553385 : f32
    %338 = vector.broadcast %cst_151 : f32 to vector<8x8xf32>
    %339 = arith.mulf %337, %338 : vector<8x8xf32>
    %340 = vector.broadcast %295 : vector<1x8xf32> to vector<8x8xf32>
    %341 = arith.addf %339, %340 : vector<8x8xf32>
    %cst_152 = arith.constant dense<0xFF800000> : vector<8xf32>
    %342 = vector.multi_reduction <maximumf>, %341, %cst_152 [1] : vector<8x8xf32> to vector<8xf32>
    %343 = vector.shape_cast %342 : vector<8xf32> to vector<8x1xf32>
    %344 = vector.broadcast %343 : vector<8x1xf32> to vector<8x8xf32>
    %345 = arith.subf %341, %344 : vector<8x8xf32>
    %346 = math.exp %345 : vector<8x8xf32>
    %cst_153 = arith.constant dense<0.000000e+00> : vector<8xf32>
    %347 = vector.multi_reduction <add>, %346, %cst_153 [1] : vector<8x8xf32> to vector<8xf32>
    %348 = vector.shape_cast %347 : vector<8xf32> to vector<8x1xf32>
    %349 = tpu.reciprocal %348 {approx = true} : vector<8x1xf32> -> vector<8x1xf32>
    %350 = vector.broadcast %349 : vector<8x1xf32> to vector<8x8xf32>
    %351 = arith.mulf %346, %350 : vector<8x8xf32>
    %cst_154 = arith.constant dense<0.000000e+00> : vector<8x8xf32>
    %352 = tpu.matmul %351, %336, %cst_154 {dimension_numbers = #tpu.dot_dimension_numbers<[1], [0], [0], [1], [0, 0, 1, 1], [], []>} : vector<8x8xf32>, vector<8x8xf32>, vector<8x8xf32> -> vector<8x8xf32>
    %353 = vector.extract_strided_slice %294 {offsets = [0, 24], sizes = [8, 8], strides = [1, 1]} : vector<8x96xf32> to vector<8x8xf32>
    %354 = vector.extract_strided_slice %294 {offsets = [0, 56], sizes = [8, 8], strides = [1, 1]} : vector<8x96xf32> to vector<8x8xf32>
    %355 = vector.extract_strided_slice %294 {offsets = [0, 88], sizes = [8, 8], strides = [1, 1]} : vector<8x96xf32> to vector<8x8xf32>
    %cst_155 = arith.constant dense<0.000000e+00> : vector<8x8xf32>
    %356 = tpu.matmul %353, %354, %cst_155 {dimension_numbers = #tpu.dot_dimension_numbers<[1], [1], [0], [0], [0, 0, 1, 0], [], []>} : vector<8x8xf32>, vector<8x8xf32>, vector<8x8xf32> -> vector<8x8xf32>
    %cst_156 = arith.constant 0.353553385 : f32
    %357 = vector.broadcast %cst_156 : f32 to vector<8x8xf32>
    %358 = arith.mulf %356, %357 : vector<8x8xf32>
    %359 = vector.broadcast %295 : vector<1x8xf32> to vector<8x8xf32>
    %360 = arith.addf %358, %359 : vector<8x8xf32>
    %cst_157 = arith.constant dense<0xFF800000> : vector<8xf32>
    %361 = vector.multi_reduction <maximumf>, %360, %cst_157 [1] : vector<8x8xf32> to vector<8xf32>
    %362 = vector.shape_cast %361 : vector<8xf32> to vector<8x1xf32>
    %363 = vector.broadcast %362 : vector<8x1xf32> to vector<8x8xf32>
    %364 = arith.subf %360, %363 : vector<8x8xf32>
    %365 = math.exp %364 : vector<8x8xf32>
    %cst_158 = arith.constant dense<0.000000e+00> : vector<8xf32>
    %366 = vector.multi_reduction <add>, %365, %cst_158 [1] : vector<8x8xf32> to vector<8xf32>
    %367 = vector.shape_cast %366 : vector<8xf32> to vector<8x1xf32>
    %368 = tpu.reciprocal %367 {approx = true} : vector<8x1xf32> -> vector<8x1xf32>
    %369 = vector.broadcast %368 : vector<8x1xf32> to vector<8x8xf32>
    %370 = arith.mulf %365, %369 : vector<8x8xf32>
    %cst_159 = arith.constant dense<0.000000e+00> : vector<8x8xf32>
    %371 = tpu.matmul %370, %355, %cst_159 {dimension_numbers = #tpu.dot_dimension_numbers<[1], [0], [0], [1], [0, 0, 1, 1], [], []>} : vector<8x8xf32>, vector<8x8xf32>, vector<8x8xf32> -> vector<8x8xf32>
    %372 = tpu.concatenate %314, %333, %352, %371 in 1 : vector<8x8xf32>, vector<8x8xf32>, vector<8x8xf32>, vector<8x8xf32> -> vector<8x32xf32>
    %373 = vector.extract_strided_slice %293 {offsets = [8, 0], sizes = [8, 96], strides = [1, 1]} : vector<16x96xf32> to vector<8x96xf32>
    %374 = vector.extract_strided_slice %7 {offsets = [1, 0], sizes = [1, 8], strides = [1, 1]} : vector<2x8xf32> to vector<1x8xf32>
    %375 = vector.extract_strided_slice %373 {offsets = [0, 0], sizes = [8, 8], strides = [1, 1]} : vector<8x96xf32> to vector<8x8xf32>
    %376 = vector.extract_strided_slice %373 {offsets = [0, 32], sizes = [8, 8], strides = [1, 1]} : vector<8x96xf32> to vector<8x8xf32>
    %377 = vector.extract_strided_slice %373 {offsets = [0, 64], sizes = [8, 8], strides = [1, 1]} : vector<8x96xf32> to vector<8x8xf32>
    %cst_160 = arith.constant dense<0.000000e+00> : vector<8x8xf32>
    %378 = tpu.matmul %375, %376, %cst_160 {dimension_numbers = #tpu.dot_dimension_numbers<[1], [1], [0], [0], [0, 0, 1, 0], [], []>} : vector<8x8xf32>, vector<8x8xf32>, vector<8x8xf32> -> vector<8x8xf32>
    %cst_161 = arith.constant 0.353553385 : f32
    %379 = vector.broadcast %cst_161 : f32 to vector<8x8xf32>
    %380 = arith.mulf %378, %379 : vector<8x8xf32>
    %381 = vector.broadcast %374 : vector<1x8xf32> to vector<8x8xf32>
    %382 = arith.addf %380, %381 : vector<8x8xf32>
    %cst_162 = arith.constant dense<0xFF800000> : vector<8xf32>
    %383 = vector.multi_reduction <maximumf>, %382, %cst_162 [1] : vector<8x8xf32> to vector<8xf32>
    %384 = vector.shape_cast %383 : vector<8xf32> to vector<8x1xf32>
    %385 = vector.broadcast %384 : vector<8x1xf32> to vector<8x8xf32>
    %386 = arith.subf %382, %385 : vector<8x8xf32>
    %387 = math.exp %386 : vector<8x8xf32>
    %cst_163 = arith.constant dense<0.000000e+00> : vector<8xf32>
    %388 = vector.multi_reduction <add>, %387, %cst_163 [1] : vector<8x8xf32> to vector<8xf32>
    %389 = vector.shape_cast %388 : vector<8xf32> to vector<8x1xf32>
    %390 = tpu.reciprocal %389 {approx = true} : vector<8x1xf32> -> vector<8x1xf32>
    %391 = vector.broadcast %390 : vector<8x1xf32> to vector<8x8xf32>
    %392 = arith.mulf %387, %391 : vector<8x8xf32>
    %cst_164 = arith.constant dense<0.000000e+00> : vector<8x8xf32>
    %393 = tpu.matmul %392, %377, %cst_164 {dimension_numbers = #tpu.dot_dimension_numbers<[1], [0], [0], [1], [0, 0, 1, 1], [], []>} : vector<8x8xf32>, vector<8x8xf32>, vector<8x8xf32> -> vector<8x8xf32>
    %394 = vector.extract_strided_slice %373 {offsets = [0, 8], sizes = [8, 8], strides = [1, 1]} : vector<8x96xf32> to vector<8x8xf32>
    %395 = vector.extract_strided_slice %373 {offsets = [0, 40], sizes = [8, 8], strides = [1, 1]} : vector<8x96xf32> to vector<8x8xf32>
    %396 = vector.extract_strided_slice %373 {offsets = [0, 72], sizes = [8, 8], strides = [1, 1]} : vector<8x96xf32> to vector<8x8xf32>
    %cst_165 = arith.constant dense<0.000000e+00> : vector<8x8xf32>
    %397 = tpu.matmul %394, %395, %cst_165 {dimension_numbers = #tpu.dot_dimension_numbers<[1], [1], [0], [0], [0, 0, 1, 0], [], []>} : vector<8x8xf32>, vector<8x8xf32>, vector<8x8xf32> -> vector<8x8xf32>
    %cst_166 = arith.constant 0.353553385 : f32
    %398 = vector.broadcast %cst_166 : f32 to vector<8x8xf32>
    %399 = arith.mulf %397, %398 : vector<8x8xf32>
    %400 = vector.broadcast %374 : vector<1x8xf32> to vector<8x8xf32>
    %401 = arith.addf %399, %400 : vector<8x8xf32>
    %cst_167 = arith.constant dense<0xFF800000> : vector<8xf32>
    %402 = vector.multi_reduction <maximumf>, %401, %cst_167 [1] : vector<8x8xf32> to vector<8xf32>
    %403 = vector.shape_cast %402 : vector<8xf32> to vector<8x1xf32>
    %404 = vector.broadcast %403 : vector<8x1xf32> to vector<8x8xf32>
    %405 = arith.subf %401, %404 : vector<8x8xf32>
    %406 = math.exp %405 : vector<8x8xf32>
    %cst_168 = arith.constant dense<0.000000e+00> : vector<8xf32>
    %407 = vector.multi_reduction <add>, %406, %cst_168 [1] : vector<8x8xf32> to vector<8xf32>
    %408 = vector.shape_cast %407 : vector<8xf32> to vector<8x1xf32>
    %409 = tpu.reciprocal %408 {approx = true} : vector<8x1xf32> -> vector<8x1xf32>
    %410 = vector.broadcast %409 : vector<8x1xf32> to vector<8x8xf32>
    %411 = arith.mulf %406, %410 : vector<8x8xf32>
    %cst_169 = arith.constant dense<0.000000e+00> : vector<8x8xf32>
    %412 = tpu.matmul %411, %396, %cst_169 {dimension_numbers = #tpu.dot_dimension_numbers<[1], [0], [0], [1], [0, 0, 1, 1], [], []>} : vector<8x8xf32>, vector<8x8xf32>, vector<8x8xf32> -> vector<8x8xf32>
    %413 = vector.extract_strided_slice %373 {offsets = [0, 16], sizes = [8, 8], strides = [1, 1]} : vector<8x96xf32> to vector<8x8xf32>
    %414 = vector.extract_strided_slice %373 {offsets = [0, 48], sizes = [8, 8], strides = [1, 1]} : vector<8x96xf32> to vector<8x8xf32>
    %415 = vector.extract_strided_slice %373 {offsets = [0, 80], sizes = [8, 8], strides = [1, 1]} : vector<8x96xf32> to vector<8x8xf32>
    %cst_170 = arith.constant dense<0.000000e+00> : vector<8x8xf32>
    %416 = tpu.matmul %413, %414, %cst_170 {dimension_numbers = #tpu.dot_dimension_numbers<[1], [1], [0], [0], [0, 0, 1, 0], [], []>} : vector<8x8xf32>, vector<8x8xf32>, vector<8x8xf32> -> vector<8x8xf32>
    %cst_171 = arith.constant 0.353553385 : f32
    %417 = vector.broadcast %cst_171 : f32 to vector<8x8xf32>
    %418 = arith.mulf %416, %417 : vector<8x8xf32>
    %419 = vector.broadcast %374 : vector<1x8xf32> to vector<8x8xf32>
    %420 = arith.addf %418, %419 : vector<8x8xf32>
    %cst_172 = arith.constant dense<0xFF800000> : vector<8xf32>
    %421 = vector.multi_reduction <maximumf>, %420, %cst_172 [1] : vector<8x8xf32> to vector<8xf32>
    %422 = vector.shape_cast %421 : vector<8xf32> to vector<8x1xf32>
    %423 = vector.broadcast %422 : vector<8x1xf32> to vector<8x8xf32>
    %424 = arith.subf %420, %423 : vector<8x8xf32>
    %425 = math.exp %424 : vector<8x8xf32>
    %cst_173 = arith.constant dense<0.000000e+00> : vector<8xf32>
    %426 = vector.multi_reduction <add>, %425, %cst_173 [1] : vector<8x8xf32> to vector<8xf32>
    %427 = vector.shape_cast %426 : vector<8xf32> to vector<8x1xf32>
    %428 = tpu.reciprocal %427 {approx = true} : vector<8x1xf32> -> vector<8x1xf32>
    %429 = vector.broadcast %428 : vector<8x1xf32> to vector<8x8xf32>
    %430 = arith.mulf %425, %429 : vector<8x8xf32>
    %cst_174 = arith.constant dense<0.000000e+00> : vector<8x8xf32>
    %431 = tpu.matmul %430, %415, %cst_174 {dimension_numbers = #tpu.dot_dimension_numbers<[1], [0], [0], [1], [0, 0, 1, 1], [], []>} : vector<8x8xf32>, vector<8x8xf32>, vector<8x8xf32> -> vector<8x8xf32>
    %432 = vector.extract_strided_slice %373 {offsets = [0, 24], sizes = [8, 8], strides = [1, 1]} : vector<8x96xf32> to vector<8x8xf32>
    %433 = vector.extract_strided_slice %373 {offsets = [0, 56], sizes = [8, 8], strides = [1, 1]} : vector<8x96xf32> to vector<8x8xf32>
    %434 = vector.extract_strided_slice %373 {offsets = [0, 88], sizes = [8, 8], strides = [1, 1]} : vector<8x96xf32> to vector<8x8xf32>
    %cst_175 = arith.constant dense<0.000000e+00> : vector<8x8xf32>
    %435 = tpu.matmul %432, %433, %cst_175 {dimension_numbers = #tpu.dot_dimension_numbers<[1], [1], [0], [0], [0, 0, 1, 0], [], []>} : vector<8x8xf32>, vector<8x8xf32>, vector<8x8xf32> -> vector<8x8xf32>
    %cst_176 = arith.constant 0.353553385 : f32
    %436 = vector.broadcast %cst_176 : f32 to vector<8x8xf32>
    %437 = arith.mulf %435, %436 : vector<8x8xf32>
    %438 = vector.broadcast %374 : vector<1x8xf32> to vector<8x8xf32>
    %439 = arith.addf %437, %438 : vector<8x8xf32>
    %cst_177 = arith.constant dense<0xFF800000> : vector<8xf32>
    %440 = vector.multi_reduction <maximumf>, %439, %cst_177 [1] : vector<8x8xf32> to vector<8xf32>
    %441 = vector.shape_cast %440 : vector<8xf32> to vector<8x1xf32>
    %442 = vector.broadcast %441 : vector<8x1xf32> to vector<8x8xf32>
    %443 = arith.subf %439, %442 : vector<8x8xf32>
    %444 = math.exp %443 : vector<8x8xf32>
    %cst_178 = arith.constant dense<0.000000e+00> : vector<8xf32>
    %445 = vector.multi_reduction <add>, %444, %cst_178 [1] : vector<8x8xf32> to vector<8xf32>
    %446 = vector.shape_cast %445 : vector<8xf32> to vector<8x1xf32>
    %447 = tpu.reciprocal %446 {approx = true} : vector<8x1xf32> -> vector<8x1xf32>
    %448 = vector.broadcast %447 : vector<8x1xf32> to vector<8x8xf32>
    %449 = arith.mulf %444, %448 : vector<8x8xf32>
    %cst_179 = arith.constant dense<0.000000e+00> : vector<8x8xf32>
    %450 = tpu.matmul %449, %434, %cst_179 {dimension_numbers = #tpu.dot_dimension_numbers<[1], [0], [0], [1], [0, 0, 1, 1], [], []>} : vector<8x8xf32>, vector<8x8xf32>, vector<8x8xf32> -> vector<8x8xf32>
    %451 = tpu.concatenate %393, %412, %431, %450 in 1 : vector<8x8xf32>, vector<8x8xf32>, vector<8x8xf32>, vector<8x8xf32> -> vector<8x32xf32>
    %452 = tpu.concatenate %372, %451 in 0 : vector<8x32xf32>, vector<8x32xf32> -> vector<16x32xf32>
    %cst_180 = arith.constant dense<0.000000e+00> : vector<16x32xf32>
    %453 = tpu.matmul %452, %272, %cst_180 {dimension_numbers = #tpu.dot_dimension_numbers<[1], [0], [0], [1], [0, 0, 1, 1], [], []>} : vector<16x32xf32>, vector<32x32xf32>, vector<16x32xf32> -> vector<16x32xf32>
    %454 = vector.broadcast %274 : vector<1x32xf32> to vector<16x32xf32>
    %455 = arith.addf %453, %454 : vector<16x32xf32>
    %456 = arith.addf %455, %266 : vector<16x32xf32>
    %cst_181 = arith.constant dense<0.000000e+00> : vector<16xf32>
    %457 = vector.multi_reduction <add>, %456, %cst_181 [1] : vector<16x32xf32> to vector<16xf32>
    %458 = vector.shape_cast %457 : vector<16xf32> to vector<16x1xf32>
    %cst_182 = arith.constant 3.200000e+01 : f32
    %459 = vector.broadcast %cst_182 : f32 to vector<16x1xf32>
    %460 = arith.divf %458, %459 : vector<16x1xf32>
    %461 = vector.broadcast %460 : vector<16x1xf32> to vector<16x32xf32>
    %462 = arith.subf %456, %461 : vector<16x32xf32>
    %463 = arith.mulf %462, %462 : vector<16x32xf32>
    %cst_183 = arith.constant dense<0.000000e+00> : vector<16xf32>
    %464 = vector.multi_reduction <add>, %463, %cst_183 [1] : vector<16x32xf32> to vector<16xf32>
    %465 = vector.shape_cast %464 : vector<16xf32> to vector<16x1xf32>
    %cst_184 = arith.constant 3.200000e+01 : f32
    %466 = vector.broadcast %cst_184 : f32 to vector<16x1xf32>
    %467 = arith.divf %465, %466 : vector<16x1xf32>
    %468 = vector.broadcast %460 : vector<16x1xf32> to vector<16x32xf32>
    %469 = arith.subf %456, %468 : vector<16x32xf32>
    %cst_185 = arith.constant 9.99999974E-6 : f32
    %470 = vector.broadcast %cst_185 : f32 to vector<16x1xf32>
    %471 = arith.addf %467, %470 : vector<16x1xf32>
    %472 = math.rsqrt %471 : vector<16x1xf32>
    %473 = vector.broadcast %472 : vector<16x1xf32> to vector<16x32xf32>
    %474 = arith.mulf %469, %473 : vector<16x32xf32>
    %475 = vector.broadcast %284 : vector<1x32xf32> to vector<16x32xf32>
    %476 = arith.mulf %474, %475 : vector<16x32xf32>
    %477 = vector.broadcast %286 : vector<1x32xf32> to vector<16x32xf32>
    %478 = arith.addf %476, %477 : vector<16x32xf32>
    %cst_186 = arith.constant dense<0.000000e+00> : vector<16x64xf32>
    %479 = tpu.matmul %478, %276, %cst_186 {dimension_numbers = #tpu.dot_dimension_numbers<[1], [0], [0], [1], [0, 0, 1, 1], [], []>} : vector<16x32xf32>, vector<32x64xf32>, vector<16x64xf32> -> vector<16x64xf32>
    %480 = vector.broadcast %278 : vector<1x64xf32> to vector<16x64xf32>
    %481 = arith.addf %479, %480 : vector<16x64xf32>
    %482 = arith.mulf %481, %481 : vector<16x64xf32>
    %483 = arith.mulf %481, %482 : vector<16x64xf32>
    %cst_187 = arith.constant 4.471500e-02 : f32
    %484 = vector.broadcast %cst_187 : f32 to vector<16x64xf32>
    %485 = arith.mulf %484, %483 : vector<16x64xf32>
    %486 = arith.addf %481, %485 : vector<16x64xf32>
    %cst_188 = arith.constant 0.797884583 : f32
    %487 = vector.broadcast %cst_188 : f32 to vector<16x64xf32>
    %488 = arith.mulf %487, %486 : vector<16x64xf32>
    %489 = math.tanh %488 : vector<16x64xf32>
    %cst_189 = arith.constant 1.000000e+00 : f32
    %490 = vector.broadcast %cst_189 : f32 to vector<16x64xf32>
    %491 = arith.addf %490, %489 : vector<16x64xf32>
    %cst_190 = arith.constant 5.000000e-01 : f32
    %492 = vector.broadcast %cst_190 : f32 to vector<16x64xf32>
    %493 = arith.mulf %492, %491 : vector<16x64xf32>
    %494 = arith.mulf %481, %493 : vector<16x64xf32>
    %cst_191 = arith.constant dense<0.000000e+00> : vector<16x32xf32>
    %495 = tpu.matmul %494, %280, %cst_191 {dimension_numbers = #tpu.dot_dimension_numbers<[1], [0], [0], [1], [0, 0, 1, 1], [], []>} : vector<16x64xf32>, vector<64x32xf32>, vector<16x32xf32> -> vector<16x32xf32>
    %496 = vector.broadcast %282 : vector<1x32xf32> to vector<16x32xf32>
    %497 = arith.addf %495, %496 : vector<16x32xf32>
    %498 = arith.addf %497, %478 : vector<16x32xf32>
    %cst_192 = arith.constant dense<0.000000e+00> : vector<16xf32>
    %499 = vector.multi_reduction <add>, %498, %cst_192 [1] : vector<16x32xf32> to vector<16xf32>
    %500 = vector.shape_cast %499 : vector<16xf32> to vector<16x1xf32>
    %cst_193 = arith.constant 3.200000e+01 : f32
    %501 = vector.broadcast %cst_193 : f32 to vector<16x1xf32>
    %502 = arith.divf %500, %501 : vector<16x1xf32>
    %503 = vector.broadcast %502 : vector<16x1xf32> to vector<16x32xf32>
    %504 = arith.subf %498, %503 : vector<16x32xf32>
    %505 = arith.mulf %504, %504 : vector<16x32xf32>
    %cst_194 = arith.constant dense<0.000000e+00> : vector<16xf32>
    %506 = vector.multi_reduction <add>, %505, %cst_194 [1] : vector<16x32xf32> to vector<16xf32>
    %507 = vector.shape_cast %506 : vector<16xf32> to vector<16x1xf32>
    %cst_195 = arith.constant 3.200000e+01 : f32
    %508 = vector.broadcast %cst_195 : f32 to vector<16x1xf32>
    %509 = arith.divf %507, %508 : vector<16x1xf32>
    %510 = vector.broadcast %502 : vector<16x1xf32> to vector<16x32xf32>
    %511 = arith.subf %498, %510 : vector<16x32xf32>
    %cst_196 = arith.constant 9.99999974E-6 : f32
    %512 = vector.broadcast %cst_196 : f32 to vector<16x1xf32>
    %513 = arith.addf %509, %512 : vector<16x1xf32>
    %514 = math.rsqrt %513 : vector<16x1xf32>
    %515 = vector.broadcast %514 : vector<16x1xf32> to vector<16x32xf32>
    %516 = arith.mulf %511, %515 : vector<16x32xf32>
    %517 = vector.broadcast %288 : vector<1x32xf32> to vector<16x32xf32>
    %518 = arith.mulf %516, %517 : vector<16x32xf32>
    %519 = vector.broadcast %290 : vector<1x32xf32> to vector<16x32xf32>
    %520 = arith.addf %518, %519 : vector<16x32xf32>
    %c2 = arith.constant 2 : index
    %c0_197 = arith.constant 0 : index
    %c0_198 = arith.constant 0 : index
    %521 = vector.load %arg3[%c2, %c0_197, %c0_198] : memref<3x32x96xf32, #tpu.memory_space<vmem>>, vector<1x32x96xf32>
    %522 = vector.shape_cast %521 : vector<1x32x96xf32> to vector<32x96xf32>
    %c2_199 = arith.constant 2 : index
    %c0_200 = arith.constant 0 : index
    %c0_201 = arith.constant 0 : index
    %523 = vector.load %arg4[%c2_199, %c0_200, %c0_201] : memref<3x1x96xf32, #tpu.memory_space<vmem>>, vector<1x1x96xf32>
    %524 = vector.shape_cast %523 : vector<1x1x96xf32> to vector<1x96xf32>
    %c2_202 = arith.constant 2 : index
    %c0_203 = arith.constant 0 : index
    %c0_204 = arith.constant 0 : index
    %525 = vector.load %arg5[%c2_202, %c0_203, %c0_204] : memref<3x32x32xf32, #tpu.memory_space<vmem>>, vector<1x32x32xf32>
    %526 = vector.shape_cast %525 : vector<1x32x32xf32> to vector<32x32xf32>
    %c2_205 = arith.constant 2 : index
    %c0_206 = arith.constant 0 : index
    %c0_207 = arith.constant 0 : index
    %527 = vector.load %arg6[%c2_205, %c0_206, %c0_207] : memref<3x1x32xf32, #tpu.memory_space<vmem>>, vector<1x1x32xf32>
    %528 = vector.shape_cast %527 : vector<1x1x32xf32> to vector<1x32xf32>
    %c2_208 = arith.constant 2 : index
    %c0_209 = arith.constant 0 : index
    %c0_210 = arith.constant 0 : index
    %529 = vector.load %arg7[%c2_208, %c0_209, %c0_210] : memref<3x32x64xf32, #tpu.memory_space<vmem>>, vector<1x32x64xf32>
    %530 = vector.shape_cast %529 : vector<1x32x64xf32> to vector<32x64xf32>
    %c2_211 = arith.constant 2 : index
    %c0_212 = arith.constant 0 : index
    %c0_213 = arith.constant 0 : index
    %531 = vector.load %arg8[%c2_211, %c0_212, %c0_213] : memref<3x1x64xf32, #tpu.memory_space<vmem>>, vector<1x1x64xf32>
    %532 = vector.shape_cast %531 : vector<1x1x64xf32> to vector<1x64xf32>
    %c2_214 = arith.constant 2 : index
    %c0_215 = arith.constant 0 : index
    %c0_216 = arith.constant 0 : index
    %533 = vector.load %arg9[%c2_214, %c0_215, %c0_216] : memref<3x64x32xf32, #tpu.memory_space<vmem>>, vector<1x64x32xf32>
    %534 = vector.shape_cast %533 : vector<1x64x32xf32> to vector<64x32xf32>
    %c2_217 = arith.constant 2 : index
    %c0_218 = arith.constant 0 : index
    %c0_219 = arith.constant 0 : index
    %535 = vector.load %arg10[%c2_217, %c0_218, %c0_219] : memref<3x1x32xf32, #tpu.memory_space<vmem>>, vector<1x1x32xf32>
    %536 = vector.shape_cast %535 : vector<1x1x32xf32> to vector<1x32xf32>
    %c2_220 = arith.constant 2 : index
    %c0_221 = arith.constant 0 : index
    %c0_222 = arith.constant 0 : index
    %537 = vector.load %arg11[%c2_220, %c0_221, %c0_222] : memref<3x1x32xf32, #tpu.memory_space<vmem>>, vector<1x1x32xf32>
    %538 = vector.shape_cast %537 : vector<1x1x32xf32> to vector<1x32xf32>
    %c2_223 = arith.constant 2 : index
    %c0_224 = arith.constant 0 : index
    %c0_225 = arith.constant 0 : index
    %539 = vector.load %arg12[%c2_223, %c0_224, %c0_225] : memref<3x1x32xf32, #tpu.memory_space<vmem>>, vector<1x1x32xf32>
    %540 = vector.shape_cast %539 : vector<1x1x32xf32> to vector<1x32xf32>
    %c2_226 = arith.constant 2 : index
    %c0_227 = arith.constant 0 : index
    %c0_228 = arith.constant 0 : index
    %541 = vector.load %arg13[%c2_226, %c0_227, %c0_228] : memref<3x1x32xf32, #tpu.memory_space<vmem>>, vector<1x1x32xf32>
    %542 = vector.shape_cast %541 : vector<1x1x32xf32> to vector<1x32xf32>
    %c2_229 = arith.constant 2 : index
    %c0_230 = arith.constant 0 : index
    %c0_231 = arith.constant 0 : index
    %543 = vector.load %arg14[%c2_229, %c0_230, %c0_231] : memref<3x1x32xf32, #tpu.memory_space<vmem>>, vector<1x1x32xf32>
    %544 = vector.shape_cast %543 : vector<1x1x32xf32> to vector<1x32xf32>
    %cst_232 = arith.constant dense<0.000000e+00> : vector<16x96xf32>
    %545 = tpu.matmul %520, %522, %cst_232 {dimension_numbers = #tpu.dot_dimension_numbers<[1], [0], [0], [1], [0, 0, 1, 1], [], []>} : vector<16x32xf32>, vector<32x96xf32>, vector<16x96xf32> -> vector<16x96xf32>
    %546 = vector.broadcast %524 : vector<1x96xf32> to vector<16x96xf32>
    %547 = arith.addf %545, %546 : vector<16x96xf32>
    %548 = vector.extract_strided_slice %547 {offsets = [0, 0], sizes = [8, 96], strides = [1, 1]} : vector<16x96xf32> to vector<8x96xf32>
    %549 = vector.extract_strided_slice %12 {offsets = [0, 0], sizes = [1, 8], strides = [1, 1]} : vector<2x8xf32> to vector<1x8xf32>
    %550 = vector.extract_strided_slice %548 {offsets = [0, 0], sizes = [8, 8], strides = [1, 1]} : vector<8x96xf32> to vector<8x8xf32>
    %551 = vector.extract_strided_slice %548 {offsets = [0, 32], sizes = [8, 8], strides = [1, 1]} : vector<8x96xf32> to vector<8x8xf32>
    %552 = vector.extract_strided_slice %548 {offsets = [0, 64], sizes = [8, 8], strides = [1, 1]} : vector<8x96xf32> to vector<8x8xf32>
    %cst_233 = arith.constant dense<0.000000e+00> : vector<8x8xf32>
    %553 = tpu.matmul %550, %551, %cst_233 {dimension_numbers = #tpu.dot_dimension_numbers<[1], [1], [0], [0], [0, 0, 1, 0], [], []>} : vector<8x8xf32>, vector<8x8xf32>, vector<8x8xf32> -> vector<8x8xf32>
    %cst_234 = arith.constant 0.353553385 : f32
    %554 = vector.broadcast %cst_234 : f32 to vector<8x8xf32>
    %555 = arith.mulf %553, %554 : vector<8x8xf32>
    %556 = vector.broadcast %549 : vector<1x8xf32> to vector<8x8xf32>
    %557 = arith.addf %555, %556 : vector<8x8xf32>
    %cst_235 = arith.constant dense<0xFF800000> : vector<8xf32>
    %558 = vector.multi_reduction <maximumf>, %557, %cst_235 [1] : vector<8x8xf32> to vector<8xf32>
    %559 = vector.shape_cast %558 : vector<8xf32> to vector<8x1xf32>
    %560 = vector.broadcast %559 : vector<8x1xf32> to vector<8x8xf32>
    %561 = arith.subf %557, %560 : vector<8x8xf32>
    %562 = math.exp %561 : vector<8x8xf32>
    %cst_236 = arith.constant dense<0.000000e+00> : vector<8xf32>
    %563 = vector.multi_reduction <add>, %562, %cst_236 [1] : vector<8x8xf32> to vector<8xf32>
    %564 = vector.shape_cast %563 : vector<8xf32> to vector<8x1xf32>
    %565 = tpu.reciprocal %564 {approx = true} : vector<8x1xf32> -> vector<8x1xf32>
    %566 = vector.broadcast %565 : vector<8x1xf32> to vector<8x8xf32>
    %567 = arith.mulf %562, %566 : vector<8x8xf32>
    %cst_237 = arith.constant dense<0.000000e+00> : vector<8x8xf32>
    %568 = tpu.matmul %567, %552, %cst_237 {dimension_numbers = #tpu.dot_dimension_numbers<[1], [0], [0], [1], [0, 0, 1, 1], [], []>} : vector<8x8xf32>, vector<8x8xf32>, vector<8x8xf32> -> vector<8x8xf32>
    %569 = vector.extract_strided_slice %548 {offsets = [0, 8], sizes = [8, 8], strides = [1, 1]} : vector<8x96xf32> to vector<8x8xf32>
    %570 = vector.extract_strided_slice %548 {offsets = [0, 40], sizes = [8, 8], strides = [1, 1]} : vector<8x96xf32> to vector<8x8xf32>
    %571 = vector.extract_strided_slice %548 {offsets = [0, 72], sizes = [8, 8], strides = [1, 1]} : vector<8x96xf32> to vector<8x8xf32>
    %cst_238 = arith.constant dense<0.000000e+00> : vector<8x8xf32>
    %572 = tpu.matmul %569, %570, %cst_238 {dimension_numbers = #tpu.dot_dimension_numbers<[1], [1], [0], [0], [0, 0, 1, 0], [], []>} : vector<8x8xf32>, vector<8x8xf32>, vector<8x8xf32> -> vector<8x8xf32>
    %cst_239 = arith.constant 0.353553385 : f32
    %573 = vector.broadcast %cst_239 : f32 to vector<8x8xf32>
    %574 = arith.mulf %572, %573 : vector<8x8xf32>
    %575 = vector.broadcast %549 : vector<1x8xf32> to vector<8x8xf32>
    %576 = arith.addf %574, %575 : vector<8x8xf32>
    %cst_240 = arith.constant dense<0xFF800000> : vector<8xf32>
    %577 = vector.multi_reduction <maximumf>, %576, %cst_240 [1] : vector<8x8xf32> to vector<8xf32>
    %578 = vector.shape_cast %577 : vector<8xf32> to vector<8x1xf32>
    %579 = vector.broadcast %578 : vector<8x1xf32> to vector<8x8xf32>
    %580 = arith.subf %576, %579 : vector<8x8xf32>
    %581 = math.exp %580 : vector<8x8xf32>
    %cst_241 = arith.constant dense<0.000000e+00> : vector<8xf32>
    %582 = vector.multi_reduction <add>, %581, %cst_241 [1] : vector<8x8xf32> to vector<8xf32>
    %583 = vector.shape_cast %582 : vector<8xf32> to vector<8x1xf32>
    %584 = tpu.reciprocal %583 {approx = true} : vector<8x1xf32> -> vector<8x1xf32>
    %585 = vector.broadcast %584 : vector<8x1xf32> to vector<8x8xf32>
    %586 = arith.mulf %581, %585 : vector<8x8xf32>
    %cst_242 = arith.constant dense<0.000000e+00> : vector<8x8xf32>
    %587 = tpu.matmul %586, %571, %cst_242 {dimension_numbers = #tpu.dot_dimension_numbers<[1], [0], [0], [1], [0, 0, 1, 1], [], []>} : vector<8x8xf32>, vector<8x8xf32>, vector<8x8xf32> -> vector<8x8xf32>
    %588 = vector.extract_strided_slice %548 {offsets = [0, 16], sizes = [8, 8], strides = [1, 1]} : vector<8x96xf32> to vector<8x8xf32>
    %589 = vector.extract_strided_slice %548 {offsets = [0, 48], sizes = [8, 8], strides = [1, 1]} : vector<8x96xf32> to vector<8x8xf32>
    %590 = vector.extract_strided_slice %548 {offsets = [0, 80], sizes = [8, 8], strides = [1, 1]} : vector<8x96xf32> to vector<8x8xf32>
    %cst_243 = arith.constant dense<0.000000e+00> : vector<8x8xf32>
    %591 = tpu.matmul %588, %589, %cst_243 {dimension_numbers = #tpu.dot_dimension_numbers<[1], [1], [0], [0], [0, 0, 1, 0], [], []>} : vector<8x8xf32>, vector<8x8xf32>, vector<8x8xf32> -> vector<8x8xf32>
    %cst_244 = arith.constant 0.353553385 : f32
    %592 = vector.broadcast %cst_244 : f32 to vector<8x8xf32>
    %593 = arith.mulf %591, %592 : vector<8x8xf32>
    %594 = vector.broadcast %549 : vector<1x8xf32> to vector<8x8xf32>
    %595 = arith.addf %593, %594 : vector<8x8xf32>
    %cst_245 = arith.constant dense<0xFF800000> : vector<8xf32>
    %596 = vector.multi_reduction <maximumf>, %595, %cst_245 [1] : vector<8x8xf32> to vector<8xf32>
    %597 = vector.shape_cast %596 : vector<8xf32> to vector<8x1xf32>
    %598 = vector.broadcast %597 : vector<8x1xf32> to vector<8x8xf32>
    %599 = arith.subf %595, %598 : vector<8x8xf32>
    %600 = math.exp %599 : vector<8x8xf32>
    %cst_246 = arith.constant dense<0.000000e+00> : vector<8xf32>
    %601 = vector.multi_reduction <add>, %600, %cst_246 [1] : vector<8x8xf32> to vector<8xf32>
    %602 = vector.shape_cast %601 : vector<8xf32> to vector<8x1xf32>
    %603 = tpu.reciprocal %602 {approx = true} : vector<8x1xf32> -> vector<8x1xf32>
    %604 = vector.broadcast %603 : vector<8x1xf32> to vector<8x8xf32>
    %605 = arith.mulf %600, %604 : vector<8x8xf32>
    %cst_247 = arith.constant dense<0.000000e+00> : vector<8x8xf32>
    %606 = tpu.matmul %605, %590, %cst_247 {dimension_numbers = #tpu.dot_dimension_numbers<[1], [0], [0], [1], [0, 0, 1, 1], [], []>} : vector<8x8xf32>, vector<8x8xf32>, vector<8x8xf32> -> vector<8x8xf32>
    %607 = vector.extract_strided_slice %548 {offsets = [0, 24], sizes = [8, 8], strides = [1, 1]} : vector<8x96xf32> to vector<8x8xf32>
    %608 = vector.extract_strided_slice %548 {offsets = [0, 56], sizes = [8, 8], strides = [1, 1]} : vector<8x96xf32> to vector<8x8xf32>
    %609 = vector.extract_strided_slice %548 {offsets = [0, 88], sizes = [8, 8], strides = [1, 1]} : vector<8x96xf32> to vector<8x8xf32>
    %cst_248 = arith.constant dense<0.000000e+00> : vector<8x8xf32>
    %610 = tpu.matmul %607, %608, %cst_248 {dimension_numbers = #tpu.dot_dimension_numbers<[1], [1], [0], [0], [0, 0, 1, 0], [], []>} : vector<8x8xf32>, vector<8x8xf32>, vector<8x8xf32> -> vector<8x8xf32>
    %cst_249 = arith.constant 0.353553385 : f32
    %611 = vector.broadcast %cst_249 : f32 to vector<8x8xf32>
    %612 = arith.mulf %610, %611 : vector<8x8xf32>
    %613 = vector.broadcast %549 : vector<1x8xf32> to vector<8x8xf32>
    %614 = arith.addf %612, %613 : vector<8x8xf32>
    %cst_250 = arith.constant dense<0xFF800000> : vector<8xf32>
    %615 = vector.multi_reduction <maximumf>, %614, %cst_250 [1] : vector<8x8xf32> to vector<8xf32>
    %616 = vector.shape_cast %615 : vector<8xf32> to vector<8x1xf32>
    %617 = vector.broadcast %616 : vector<8x1xf32> to vector<8x8xf32>
    %618 = arith.subf %614, %617 : vector<8x8xf32>
    %619 = math.exp %618 : vector<8x8xf32>
    %cst_251 = arith.constant dense<0.000000e+00> : vector<8xf32>
    %620 = vector.multi_reduction <add>, %619, %cst_251 [1] : vector<8x8xf32> to vector<8xf32>
    %621 = vector.shape_cast %620 : vector<8xf32> to vector<8x1xf32>
    %622 = tpu.reciprocal %621 {approx = true} : vector<8x1xf32> -> vector<8x1xf32>
    %623 = vector.broadcast %622 : vector<8x1xf32> to vector<8x8xf32>
    %624 = arith.mulf %619, %623 : vector<8x8xf32>
    %cst_252 = arith.constant dense<0.000000e+00> : vector<8x8xf32>
    %625 = tpu.matmul %624, %609, %cst_252 {dimension_numbers = #tpu.dot_dimension_numbers<[1], [0], [0], [1], [0, 0, 1, 1], [], []>} : vector<8x8xf32>, vector<8x8xf32>, vector<8x8xf32> -> vector<8x8xf32>
    %626 = tpu.concatenate %568, %587, %606, %625 in 1 : vector<8x8xf32>, vector<8x8xf32>, vector<8x8xf32>, vector<8x8xf32> -> vector<8x32xf32>
    %627 = vector.extract_strided_slice %547 {offsets = [8, 0], sizes = [8, 96], strides = [1, 1]} : vector<16x96xf32> to vector<8x96xf32>
    %628 = vector.extract_strided_slice %12 {offsets = [1, 0], sizes = [1, 8], strides = [1, 1]} : vector<2x8xf32> to vector<1x8xf32>
    %629 = vector.extract_strided_slice %627 {offsets = [0, 0], sizes = [8, 8], strides = [1, 1]} : vector<8x96xf32> to vector<8x8xf32>
    %630 = vector.extract_strided_slice %627 {offsets = [0, 32], sizes = [8, 8], strides = [1, 1]} : vector<8x96xf32> to vector<8x8xf32>
    %631 = vector.extract_strided_slice %627 {offsets = [0, 64], sizes = [8, 8], strides = [1, 1]} : vector<8x96xf32> to vector<8x8xf32>
    %cst_253 = arith.constant dense<0.000000e+00> : vector<8x8xf32>
    %632 = tpu.matmul %629, %630, %cst_253 {dimension_numbers = #tpu.dot_dimension_numbers<[1], [1], [0], [0], [0, 0, 1, 0], [], []>} : vector<8x8xf32>, vector<8x8xf32>, vector<8x8xf32> -> vector<8x8xf32>
    %cst_254 = arith.constant 0.353553385 : f32
    %633 = vector.broadcast %cst_254 : f32 to vector<8x8xf32>
    %634 = arith.mulf %632, %633 : vector<8x8xf32>
    %635 = vector.broadcast %628 : vector<1x8xf32> to vector<8x8xf32>
    %636 = arith.addf %634, %635 : vector<8x8xf32>
    %cst_255 = arith.constant dense<0xFF800000> : vector<8xf32>
    %637 = vector.multi_reduction <maximumf>, %636, %cst_255 [1] : vector<8x8xf32> to vector<8xf32>
    %638 = vector.shape_cast %637 : vector<8xf32> to vector<8x1xf32>
    %639 = vector.broadcast %638 : vector<8x1xf32> to vector<8x8xf32>
    %640 = arith.subf %636, %639 : vector<8x8xf32>
    %641 = math.exp %640 : vector<8x8xf32>
    %cst_256 = arith.constant dense<0.000000e+00> : vector<8xf32>
    %642 = vector.multi_reduction <add>, %641, %cst_256 [1] : vector<8x8xf32> to vector<8xf32>
    %643 = vector.shape_cast %642 : vector<8xf32> to vector<8x1xf32>
    %644 = tpu.reciprocal %643 {approx = true} : vector<8x1xf32> -> vector<8x1xf32>
    %645 = vector.broadcast %644 : vector<8x1xf32> to vector<8x8xf32>
    %646 = arith.mulf %641, %645 : vector<8x8xf32>
    %cst_257 = arith.constant dense<0.000000e+00> : vector<8x8xf32>
    %647 = tpu.matmul %646, %631, %cst_257 {dimension_numbers = #tpu.dot_dimension_numbers<[1], [0], [0], [1], [0, 0, 1, 1], [], []>} : vector<8x8xf32>, vector<8x8xf32>, vector<8x8xf32> -> vector<8x8xf32>
    %648 = vector.extract_strided_slice %627 {offsets = [0, 8], sizes = [8, 8], strides = [1, 1]} : vector<8x96xf32> to vector<8x8xf32>
    %649 = vector.extract_strided_slice %627 {offsets = [0, 40], sizes = [8, 8], strides = [1, 1]} : vector<8x96xf32> to vector<8x8xf32>
    %650 = vector.extract_strided_slice %627 {offsets = [0, 72], sizes = [8, 8], strides = [1, 1]} : vector<8x96xf32> to vector<8x8xf32>
    %cst_258 = arith.constant dense<0.000000e+00> : vector<8x8xf32>
    %651 = tpu.matmul %648, %649, %cst_258 {dimension_numbers = #tpu.dot_dimension_numbers<[1], [1], [0], [0], [0, 0, 1, 0], [], []>} : vector<8x8xf32>, vector<8x8xf32>, vector<8x8xf32> -> vector<8x8xf32>
    %cst_259 = arith.constant 0.353553385 : f32
    %652 = vector.broadcast %cst_259 : f32 to vector<8x8xf32>
    %653 = arith.mulf %651, %652 : vector<8x8xf32>
    %654 = vector.broadcast %628 : vector<1x8xf32> to vector<8x8xf32>
    %655 = arith.addf %653, %654 : vector<8x8xf32>
    %cst_260 = arith.constant dense<0xFF800000> : vector<8xf32>
    %656 = vector.multi_reduction <maximumf>, %655, %cst_260 [1] : vector<8x8xf32> to vector<8xf32>
    %657 = vector.shape_cast %656 : vector<8xf32> to vector<8x1xf32>
    %658 = vector.broadcast %657 : vector<8x1xf32> to vector<8x8xf32>
    %659 = arith.subf %655, %658 : vector<8x8xf32>
    %660 = math.exp %659 : vector<8x8xf32>
    %cst_261 = arith.constant dense<0.000000e+00> : vector<8xf32>
    %661 = vector.multi_reduction <add>, %660, %cst_261 [1] : vector<8x8xf32> to vector<8xf32>
    %662 = vector.shape_cast %661 : vector<8xf32> to vector<8x1xf32>
    %663 = tpu.reciprocal %662 {approx = true} : vector<8x1xf32> -> vector<8x1xf32>
    %664 = vector.broadcast %663 : vector<8x1xf32> to vector<8x8xf32>
    %665 = arith.mulf %660, %664 : vector<8x8xf32>
    %cst_262 = arith.constant dense<0.000000e+00> : vector<8x8xf32>
    %666 = tpu.matmul %665, %650, %cst_262 {dimension_numbers = #tpu.dot_dimension_numbers<[1], [0], [0], [1], [0, 0, 1, 1], [], []>} : vector<8x8xf32>, vector<8x8xf32>, vector<8x8xf32> -> vector<8x8xf32>
    %667 = vector.extract_strided_slice %627 {offsets = [0, 16], sizes = [8, 8], strides = [1, 1]} : vector<8x96xf32> to vector<8x8xf32>
    %668 = vector.extract_strided_slice %627 {offsets = [0, 48], sizes = [8, 8], strides = [1, 1]} : vector<8x96xf32> to vector<8x8xf32>
    %669 = vector.extract_strided_slice %627 {offsets = [0, 80], sizes = [8, 8], strides = [1, 1]} : vector<8x96xf32> to vector<8x8xf32>
    %cst_263 = arith.constant dense<0.000000e+00> : vector<8x8xf32>
    %670 = tpu.matmul %667, %668, %cst_263 {dimension_numbers = #tpu.dot_dimension_numbers<[1], [1], [0], [0], [0, 0, 1, 0], [], []>} : vector<8x8xf32>, vector<8x8xf32>, vector<8x8xf32> -> vector<8x8xf32>
    %cst_264 = arith.constant 0.353553385 : f32
    %671 = vector.broadcast %cst_264 : f32 to vector<8x8xf32>
    %672 = arith.mulf %670, %671 : vector<8x8xf32>
    %673 = vector.broadcast %628 : vector<1x8xf32> to vector<8x8xf32>
    %674 = arith.addf %672, %673 : vector<8x8xf32>
    %cst_265 = arith.constant dense<0xFF800000> : vector<8xf32>
    %675 = vector.multi_reduction <maximumf>, %674, %cst_265 [1] : vector<8x8xf32> to vector<8xf32>
    %676 = vector.shape_cast %675 : vector<8xf32> to vector<8x1xf32>
    %677 = vector.broadcast %676 : vector<8x1xf32> to vector<8x8xf32>
    %678 = arith.subf %674, %677 : vector<8x8xf32>
    %679 = math.exp %678 : vector<8x8xf32>
    %cst_266 = arith.constant dense<0.000000e+00> : vector<8xf32>
    %680 = vector.multi_reduction <add>, %679, %cst_266 [1] : vector<8x8xf32> to vector<8xf32>
    %681 = vector.shape_cast %680 : vector<8xf32> to vector<8x1xf32>
    %682 = tpu.reciprocal %681 {approx = true} : vector<8x1xf32> -> vector<8x1xf32>
    %683 = vector.broadcast %682 : vector<8x1xf32> to vector<8x8xf32>
    %684 = arith.mulf %679, %683 : vector<8x8xf32>
    %cst_267 = arith.constant dense<0.000000e+00> : vector<8x8xf32>
    %685 = tpu.matmul %684, %669, %cst_267 {dimension_numbers = #tpu.dot_dimension_numbers<[1], [0], [0], [1], [0, 0, 1, 1], [], []>} : vector<8x8xf32>, vector<8x8xf32>, vector<8x8xf32> -> vector<8x8xf32>
    %686 = vector.extract_strided_slice %627 {offsets = [0, 24], sizes = [8, 8], strides = [1, 1]} : vector<8x96xf32> to vector<8x8xf32>
    %687 = vector.extract_strided_slice %627 {offsets = [0, 56], sizes = [8, 8], strides = [1, 1]} : vector<8x96xf32> to vector<8x8xf32>
    %688 = vector.extract_strided_slice %627 {offsets = [0, 88], sizes = [8, 8], strides = [1, 1]} : vector<8x96xf32> to vector<8x8xf32>
    %cst_268 = arith.constant dense<0.000000e+00> : vector<8x8xf32>
    %689 = tpu.matmul %686, %687, %cst_268 {dimension_numbers = #tpu.dot_dimension_numbers<[1], [1], [0], [0], [0, 0, 1, 0], [], []>} : vector<8x8xf32>, vector<8x8xf32>, vector<8x8xf32> -> vector<8x8xf32>
    %cst_269 = arith.constant 0.353553385 : f32
    %690 = vector.broadcast %cst_269 : f32 to vector<8x8xf32>
    %691 = arith.mulf %689, %690 : vector<8x8xf32>
    %692 = vector.broadcast %628 : vector<1x8xf32> to vector<8x8xf32>
    %693 = arith.addf %691, %692 : vector<8x8xf32>
    %cst_270 = arith.constant dense<0xFF800000> : vector<8xf32>
    %694 = vector.multi_reduction <maximumf>, %693, %cst_270 [1] : vector<8x8xf32> to vector<8xf32>
    %695 = vector.shape_cast %694 : vector<8xf32> to vector<8x1xf32>
    %696 = vector.broadcast %695 : vector<8x1xf32> to vector<8x8xf32>
    %697 = arith.subf %693, %696 : vector<8x8xf32>
    %698 = math.exp %697 : vector<8x8xf32>
    %cst_271 = arith.constant dense<0.000000e+00> : vector<8xf32>
    %699 = vector.multi_reduction <add>, %698, %cst_271 [1] : vector<8x8xf32> to vector<8xf32>
    %700 = vector.shape_cast %699 : vector<8xf32> to vector<8x1xf32>
    %701 = tpu.reciprocal %700 {approx = true} : vector<8x1xf32> -> vector<8x1xf32>
    %702 = vector.broadcast %701 : vector<8x1xf32> to vector<8x8xf32>
    %703 = arith.mulf %698, %702 : vector<8x8xf32>
    %cst_272 = arith.constant dense<0.000000e+00> : vector<8x8xf32>
    %704 = tpu.matmul %703, %688, %cst_272 {dimension_numbers = #tpu.dot_dimension_numbers<[1], [0], [0], [1], [0, 0, 1, 1], [], []>} : vector<8x8xf32>, vector<8x8xf32>, vector<8x8xf32> -> vector<8x8xf32>
    %705 = tpu.concatenate %647, %666, %685, %704 in 1 : vector<8x8xf32>, vector<8x8xf32>, vector<8x8xf32>, vector<8x8xf32> -> vector<8x32xf32>
    %706 = tpu.concatenate %626, %705 in 0 : vector<8x32xf32>, vector<8x32xf32> -> vector<16x32xf32>
    %cst_273 = arith.constant dense<0.000000e+00> : vector<16x32xf32>
    %707 = tpu.matmul %706, %526, %cst_273 {dimension_numbers = #tpu.dot_dimension_numbers<[1], [0], [0], [1], [0, 0, 1, 1], [], []>} : vector<16x32xf32>, vector<32x32xf32>, vector<16x32xf32> -> vector<16x32xf32>
    %708 = vector.broadcast %528 : vector<1x32xf32> to vector<16x32xf32>
    %709 = arith.addf %707, %708 : vector<16x32xf32>
    %710 = arith.addf %709, %520 : vector<16x32xf32>
    %cst_274 = arith.constant dense<0.000000e+00> : vector<16xf32>
    %711 = vector.multi_reduction <add>, %710, %cst_274 [1] : vector<16x32xf32> to vector<16xf32>
    %712 = vector.shape_cast %711 : vector<16xf32> to vector<16x1xf32>
    %cst_275 = arith.constant 3.200000e+01 : f32
    %713 = vector.broadcast %cst_275 : f32 to vector<16x1xf32>
    %714 = arith.divf %712, %713 : vector<16x1xf32>
    %715 = vector.broadcast %714 : vector<16x1xf32> to vector<16x32xf32>
    %716 = arith.subf %710, %715 : vector<16x32xf32>
    %717 = arith.mulf %716, %716 : vector<16x32xf32>
    %cst_276 = arith.constant dense<0.000000e+00> : vector<16xf32>
    %718 = vector.multi_reduction <add>, %717, %cst_276 [1] : vector<16x32xf32> to vector<16xf32>
    %719 = vector.shape_cast %718 : vector<16xf32> to vector<16x1xf32>
    %cst_277 = arith.constant 3.200000e+01 : f32
    %720 = vector.broadcast %cst_277 : f32 to vector<16x1xf32>
    %721 = arith.divf %719, %720 : vector<16x1xf32>
    %722 = vector.broadcast %714 : vector<16x1xf32> to vector<16x32xf32>
    %723 = arith.subf %710, %722 : vector<16x32xf32>
    %cst_278 = arith.constant 9.99999974E-6 : f32
    %724 = vector.broadcast %cst_278 : f32 to vector<16x1xf32>
    %725 = arith.addf %721, %724 : vector<16x1xf32>
    %726 = math.rsqrt %725 : vector<16x1xf32>
    %727 = vector.broadcast %726 : vector<16x1xf32> to vector<16x32xf32>
    %728 = arith.mulf %723, %727 : vector<16x32xf32>
    %729 = vector.broadcast %538 : vector<1x32xf32> to vector<16x32xf32>
    %730 = arith.mulf %728, %729 : vector<16x32xf32>
    %731 = vector.broadcast %540 : vector<1x32xf32> to vector<16x32xf32>
    %732 = arith.addf %730, %731 : vector<16x32xf32>
    %cst_279 = arith.constant dense<0.000000e+00> : vector<16x64xf32>
    %733 = tpu.matmul %732, %530, %cst_279 {dimension_numbers = #tpu.dot_dimension_numbers<[1], [0], [0], [1], [0, 0, 1, 1], [], []>} : vector<16x32xf32>, vector<32x64xf32>, vector<16x64xf32> -> vector<16x64xf32>
    %734 = vector.broadcast %532 : vector<1x64xf32> to vector<16x64xf32>
    %735 = arith.addf %733, %734 : vector<16x64xf32>
    %736 = arith.mulf %735, %735 : vector<16x64xf32>
    %737 = arith.mulf %735, %736 : vector<16x64xf32>
    %cst_280 = arith.constant 4.471500e-02 : f32
    %738 = vector.broadcast %cst_280 : f32 to vector<16x64xf32>
    %739 = arith.mulf %738, %737 : vector<16x64xf32>
    %740 = arith.addf %735, %739 : vector<16x64xf32>
    %cst_281 = arith.constant 0.797884583 : f32
    %741 = vector.broadcast %cst_281 : f32 to vector<16x64xf32>
    %742 = arith.mulf %741, %740 : vector<16x64xf32>
    %743 = math.tanh %742 : vector<16x64xf32>
    %cst_282 = arith.constant 1.000000e+00 : f32
    %744 = vector.broadcast %cst_282 : f32 to vector<16x64xf32>
    %745 = arith.addf %744, %743 : vector<16x64xf32>
    %cst_283 = arith.constant 5.000000e-01 : f32
    %746 = vector.broadcast %cst_283 : f32 to vector<16x64xf32>
    %747 = arith.mulf %746, %745 : vector<16x64xf32>
    %748 = arith.mulf %735, %747 : vector<16x64xf32>
    %cst_284 = arith.constant dense<0.000000e+00> : vector<16x32xf32>
    %749 = tpu.matmul %748, %534, %cst_284 {dimension_numbers = #tpu.dot_dimension_numbers<[1], [0], [0], [1], [0, 0, 1, 1], [], []>} : vector<16x64xf32>, vector<64x32xf32>, vector<16x32xf32> -> vector<16x32xf32>
    %750 = vector.broadcast %536 : vector<1x32xf32> to vector<16x32xf32>
    %751 = arith.addf %749, %750 : vector<16x32xf32>
    %752 = arith.addf %751, %732 : vector<16x32xf32>
    %cst_285 = arith.constant dense<0.000000e+00> : vector<16xf32>
    %753 = vector.multi_reduction <add>, %752, %cst_285 [1] : vector<16x32xf32> to vector<16xf32>
    %754 = vector.shape_cast %753 : vector<16xf32> to vector<16x1xf32>
    %cst_286 = arith.constant 3.200000e+01 : f32
    %755 = vector.broadcast %cst_286 : f32 to vector<16x1xf32>
    %756 = arith.divf %754, %755 : vector<16x1xf32>
    %757 = vector.broadcast %756 : vector<16x1xf32> to vector<16x32xf32>
    %758 = arith.subf %752, %757 : vector<16x32xf32>
    %759 = arith.mulf %758, %758 : vector<16x32xf32>
    %cst_287 = arith.constant dense<0.000000e+00> : vector<16xf32>
    %760 = vector.multi_reduction <add>, %759, %cst_287 [1] : vector<16x32xf32> to vector<16xf32>
    %761 = vector.shape_cast %760 : vector<16xf32> to vector<16x1xf32>
    %cst_288 = arith.constant 3.200000e+01 : f32
    %762 = vector.broadcast %cst_288 : f32 to vector<16x1xf32>
    %763 = arith.divf %761, %762 : vector<16x1xf32>
    %764 = vector.broadcast %756 : vector<16x1xf32> to vector<16x32xf32>
    %765 = arith.subf %752, %764 : vector<16x32xf32>
    %cst_289 = arith.constant 9.99999974E-6 : f32
    %766 = vector.broadcast %cst_289 : f32 to vector<16x1xf32>
    %767 = arith.addf %763, %766 : vector<16x1xf32>
    %768 = math.rsqrt %767 : vector<16x1xf32>
    %769 = vector.broadcast %768 : vector<16x1xf32> to vector<16x32xf32>
    %770 = arith.mulf %765, %769 : vector<16x32xf32>
    %771 = vector.broadcast %542 : vector<1x32xf32> to vector<16x32xf32>
    %772 = arith.mulf %770, %771 : vector<16x32xf32>
    %773 = vector.broadcast %544 : vector<1x32xf32> to vector<16x32xf32>
    %774 = arith.addf %772, %773 : vector<16x32xf32>
    %775 = vector.extract_strided_slice %2 {offsets = [0, 0], sizes = [1, 8], strides = [1, 1]} : vector<2x8xf32> to vector<1x8xf32>
    %776 = vector.extract_strided_slice %774 {offsets = [0, 0], sizes = [8, 32], strides = [1, 1]} : vector<16x32xf32> to vector<8x32xf32>
    %cst_290 = arith.constant dense<0.000000e+00> : vector<1x32xf32>
    %777 = tpu.matmul %775, %776, %cst_290 {dimension_numbers = #tpu.dot_dimension_numbers<[1], [0], [0], [1], [0, 0, 1, 1], [], []>} : vector<1x8xf32>, vector<8x32xf32>, vector<1x32xf32> -> vector<1x32xf32>
    %cst_291 = arith.constant dense<0.000000e+00> : vector<1xf32>
    %778 = vector.multi_reduction <add>, %775, %cst_291 [1] : vector<1x8xf32> to vector<1xf32>
    %779 = vector.shape_cast %778 : vector<1xf32> to vector<1x1xf32>
    %cst_292 = arith.constant 1.000000e+00 : f32
    %780 = vector.broadcast %cst_292 : f32 to vector<1x1xf32>
    %781 = arith.maximumf %779, %780 : vector<1x1xf32>
    %782 = tpu.reciprocal %781 {approx = true} : vector<1x1xf32> -> vector<1x1xf32>
    %783 = vector.broadcast %782 : vector<1x1xf32> to vector<1x32xf32>
    %784 = arith.mulf %777, %783 : vector<1x32xf32>
    %785 = vector.extract_strided_slice %2 {offsets = [1, 0], sizes = [1, 8], strides = [1, 1]} : vector<2x8xf32> to vector<1x8xf32>
    %786 = vector.extract_strided_slice %774 {offsets = [8, 0], sizes = [8, 32], strides = [1, 1]} : vector<16x32xf32> to vector<8x32xf32>
    %cst_293 = arith.constant dense<0.000000e+00> : vector<1x32xf32>
    %787 = tpu.matmul %785, %786, %cst_293 {dimension_numbers = #tpu.dot_dimension_numbers<[1], [0], [0], [1], [0, 0, 1, 1], [], []>} : vector<1x8xf32>, vector<8x32xf32>, vector<1x32xf32> -> vector<1x32xf32>
    %cst_294 = arith.constant dense<0.000000e+00> : vector<1xf32>
    %788 = vector.multi_reduction <add>, %785, %cst_294 [1] : vector<1x8xf32> to vector<1xf32>
    %789 = vector.shape_cast %788 : vector<1xf32> to vector<1x1xf32>
    %cst_295 = arith.constant 1.000000e+00 : f32
    %790 = vector.broadcast %cst_295 : f32 to vector<1x1xf32>
    %791 = arith.maximumf %789, %790 : vector<1x1xf32>
    %792 = tpu.reciprocal %791 {approx = true} : vector<1x1xf32> -> vector<1x1xf32>
    %793 = vector.broadcast %792 : vector<1x1xf32> to vector<1x32xf32>
    %794 = arith.mulf %787, %793 : vector<1x32xf32>
    %795 = tpu.concatenate %784, %794 in 0 : vector<1x32xf32>, vector<1x32xf32> -> vector<2x32xf32>
    %c0_296 = arith.constant 0 : index
    %c0_297 = arith.constant 0 : index
    %796 = vector.load %arg15[%c0_296, %c0_297] : memref<2x32xf32, #tpu.memory_space<vmem>>, vector<2x32xf32>
    tpu.vector_store %arg15[%c0_296, %c0_297], %795 {strides = array<i32>} : memref<2x32xf32, #tpu.memory_space<vmem>>, vector<2x32xf32>,
    return
  }
}

</mosaic_0001>

<bundles_post_ra>
// kernel: tpu_custom_call.1
= control target key start
LH: loop header
LB: loop body
LE: loop exit
PB: predicated region body
PF: predicated region fallthrough
CT: control target
= control target key end

     0   :  { %20 = vsyncpa [#allocation3], 0  ;;  %s8066_s0 = inlined_call_operand.hbm [shape: f32[16,32], index: 0, kind: input, shape index: {}]   ;;  %s8067_s1 = inlined_call_operand.hbm [shape: f32[2,8], index: 1, kind: input, shape index: {}]   ;;  %s8068_s2 = inlined_call_operand.hbm [shape: f32[2,8], index: 2, kind: input, shape index: {}]   ;;  %s8069_s3 = inlined_call_operand.vmem [shape: f32[3,32,96], index: 3, kind: input, shape index: {}]   ;;  %s8070_s4 = inlined_call_operand.vmem [shape: f32[3,1,96], index: 4, kind: input, shape index: {}]   ;;  %s8071_s5 = inlined_call_operand.vmem [shape: f32[3,32,32], index: 5, kind: input, shape index: {}]   ;;  %s8072_s6 = inlined_call_operand.vmem [shape: f32[3,1,32], index: 6, kind: input, shape index: {}]   ;;  %s8073_s7 = inlined_call_operand.vmem [shape: f32[3,32,64], index: 7, kind: input, shape index: {}]   ;;  %s8074_s8 = inlined_call_operand.vmem [shape: f32[3,1,64], index: 8, kind: input, shape index: {}]   ;;  %s8075_s9 = inlined_call_operand.vmem [shape: f32[3,64,32], index: 9, kind: input, shape index: {}]   ;;  %s8076_s10 = inlined_call_operand.vmem [shape: f32[3,1,32], index: 10, kind: input, shape index: {}]   ;;  %s8077_s11 = inlined_call_operand.vmem [shape: f32[3,1,32], index: 11, kind: input, shape index: {}]   ;;  %s8078_s12 = inlined_call_operand.vmem [shape: f32[3,1,32], index: 12, kind: input, shape index: {}]   ;;  %s8079_s13 = inlined_call_operand.vmem [shape: f32[3,1,32], index: 13, kind: input, shape index: {}]   ;;  %s8080_s14 = inlined_call_operand.vmem [shape: f32[3,1,32], index: 14, kind: input, shape index: {}]   ;;  %s8081_s15 = inlined_call_operand.hbm [shape: f32[2,32], index: 15, kind: output, shape index: {}]  }
   0x1   :  { %21 = vsyncpa [#allocation6], 0 }
   0x2   :  { %22 = vsyncpa [#allocation4], 0  ;;  %s7006_s18 = smov [#allocation5]   ;;  %s7007_s20 = smov [#allocation2]  }
   0x3   :  { %s41_s19 = sshll.u32 %s7006_s18, 4  ;;  %s28_s21 = sshll.u32 %s7007_s20, 4  ;;  %s42_s19 = int_to_ptr.vmem [resolvable:$true] %s41_s19  ;;  %s7108_s21 = int_to_ptr.vmem [resolvable:$true] %s28_s21 }
   0x4   :  { %s6912_s24 = scalar_lea.hbm %s8067_s1, 32 }
   0x5   :  { %p6913_p0 = scmp.ne.s32.totalorder %s8067_s1, %s6912_s24  ;;  %p6916_p1 = scmp.lt.u32.totalorder %s6912_s24, %s8067_s1 }
   0x7   :  { %p6918_p2 = pnand %p6916_p1, %p6913_p0 }
   0x9   :  { %6921 = shalt.err (!%p6918_p2)
}
   0xa   :  { %s6922_s29 = scalar_lea.vmem %s42_s19, 32  ;;  %p6927_p4 = scmp.lt.s32.totalorder %s42_s19, %s42_s19 }
   0xb   :  { %p6923_p3 = scmp.ne.s32.totalorder %s42_s19, %s6922_s29  ;;  %p6928_p5 = scmp.lt.s32.totalorder %s6922_s29, %s6922_s29 }
   0xd   :  { %p6929_p6 = por %p6928_p5, %p6927_p4 }
   0xf   :  { %p6930_p7 = pnand %p6929_p6, %p6923_p3 }
  0x11   :  { %6933 = shalt.err (!%p6930_p7)
}
  0x12   :  { %44 = dma.hbm_to_vmem [thread:$0]  %s8067_s1, 32, %s42_s19, [#allocation6]  }
  0x13   :  { %s6934_s20 = scalar_lea.hbm %s8066_s0, 256 }
  0x14   :  { %p6935_p8 = scmp.ne.s32.totalorder %s8066_s0, %s6934_s20  ;;  %p6938_p9 = scmp.lt.u32.totalorder %s6934_s20, %s8066_s0 }
  0x16   :  { %p6940_p10 = pnand %p6938_p9, %p6935_p8 }
  0x18   :  { %6943 = shalt.err (!%p6940_p10)
}
  0x19   :  { %s6944_s26 = scalar_lea.vmem %s7108_s21, 256  ;;  %p6949_p12 = scmp.lt.s32.totalorder %s7108_s21, %s7108_s21 }
  0x1a   :  { %p6945_p11 = scmp.ne.s32.totalorder %s7108_s21, %s6944_s26  ;;  %p6950_p13 = scmp.lt.s32.totalorder %s6944_s26, %s6944_s26 }
  0x1c   :  { %p6951_p0 = por %p6950_p13, %p6949_p12 }
  0x1e   :  { %p6952_p1 = pnand %p6951_p0, %p6945_p11 }
  0x20   :  { %6955 = shalt.err (!%p6952_p1)
}
  0x21   :  { %s7008_s1 = smov 128   ;;  %s7009_s19 = smov 8  }
  0x22   :  { %34 = dma.hbm_to_vmem [thread:$0]  %s8066_s0, 256, %s7108_s21, [#allocation3], %s7008_s1, %s7008_s1, %s7009_s19  }
  0x23   :  { %s7010_s29 = smov [#allocation7]   ;;  %s6956_s18 = scalar_lea.hbm %s8068_s2, 32 }
  0x24   :  { %s51_s30 = sshll.u32 %s7010_s29, 4  ;;  %p6957_p2 = scmp.ne.s32.totalorder %s8068_s2, %s6956_s18  ;;  %s52_s30 = int_to_ptr.vmem [resolvable:$true] %s51_s30 }
  0x25   :  { %p6960_p3 = scmp.lt.u32.totalorder %s6956_s18, %s8068_s2 }
  0x27   :  { %p6962_p4 = pnand %p6960_p3, %p6957_p2 }
  0x29   :  { %6965 = shalt.err (!%p6962_p4)
}
  0x2a   :  { %s6966_s25 = scalar_lea.vmem %s52_s30, 32  ;;  %p6971_p6 = scmp.lt.s32.totalorder %s52_s30, %s52_s30 }
  0x2b   :  { %p6967_p5 = scmp.ne.s32.totalorder %s52_s30, %s6966_s25  ;;  %p6972_p7 = scmp.lt.s32.totalorder %s6966_s25, %s6966_s25 }
  0x2d   :  { %p6973_p8 = por %p6972_p7, %p6971_p6 }
  0x2f   :  { %p6974_p9 = pnand %p6973_p8, %p6967_p5 }
  0x31   :  { %6977 = shalt.err (!%p6974_p9)
}
  0x32   :  { %54 = dma.hbm_to_vmem [thread:$0]  %s8068_s2, 32, %s52_s30, [#allocation6]  }
  0x33   :  { %7000 = dma.done.wait [#allocation3], 256  }
  0x34   :  { %7001 = vsyncadd [#allocation3], 4294967040 }
  0x35   :  { %7002 = dma.done.wait [#allocation6], 64  }
  0x36   :  { %7003 = vsyncadd [#allocation6], 4294967232  ;;  %vm130_vm0 = vcmask 261120   ;;  %v96_v0 = vld [vmem:[%s8069_s3] sm:$0xff]  ;;  %v97_v1 = vld [vmem:[%s8069_s3 + $0x8] sm:$0xff]  ;;  %v7011_v8 = vmov 0.0   ;;  %v291_v20 = vlaneseq }
  0x37   :  { %v98_v2 = vld [vmem:[%s8069_s3 + $0x10] sm:$0xff]  ;;  %v6634_v3 = vpack.c.bf16 %v97_v1, %v96_v0  ;;  %v99_v4 = vld [vmem:[%s8069_s3 + $0x18] sm:$0xff]  ;;  %v7164_v5 = vld [vmem:[#allocation2] sm:$0xff]  ;;  %6239 = vmatprep.subr.mxu1 %v7011_v8  ;;  %vm7012_vm1 = vmmov 0   ;;  %s8090_s20 = smov 64   ;;  %s7014_s22 = smov 96  }
  0x38   :  { %v6638_v6 = vpack.c.bf16 %v99_v4, %v98_v2  ;;  %6236 = vmatprep.mubr.msk.f32.mxu0 %vm130_vm0, %v7164_v5  ;;  %v7168_v7 = vld [vmem:[#allocation2 + $0x8] sm:$0xff]  ;;  %6241 = vmatprep.mubr.msk.f32.mxu1 %vm7012_vm1, %v7011_v8  ;;  %v5866_v9 = vld [vmem:[%s8070_s4] ss:$0 sm:$0xff]  ;;  %s7015_s23 = smov 88   ;;  %s7016_s24 = smov 120   ;;  %vm215_vm2 = vcmask 64512  }
  0x39   :  { %6635 = vmatprep.subr.bf16.mxu0 %v6634_v3  ;;  %s8094_s25 = smov 80   ;;  %s7018_s0 = smov 112   ;;  %v90_v21 = vld [vmem:[#allocation5] sm:$0x3]  ;;  %v7215_v22 = vshrl.u32 %v291_v20, 7  ;;  %vm897_vm4 = vcmask 130048  }
  0x3a   :  { %6637 = vmatpush3.bf16.msra.mxu0 %v6634_v3  ;;  %s8096_s21 = smov 104   ;;  %vm92_vm3 = vcmp.gt.f32.partialorder %v90_v21, 0.5  ;;  %v7020_v24 = vmov -1e+09   ;;  %s8092_s26 = smov 72   ;;  %vm899_vm5 = vcmask 195584  }
  0x3b   :  { %6639 = vmatprep.subr.bf16.mxu0 %v6638_v6  ;;  %v293_v23 = vsub.s32 0, %v7215_v22  ;;  %v7219_v25 = vsel %vm92_vm3, 0.0, %v7020_v24  ;;  %v981_v62 = vsub.s32 1, %v7215_v22  ;;  %s8082_s1 = smov 48   ;;  %s8086_s27 = smov 56   ;;  %vm1830_vm6 = vcmask 523264  }
  0x3c   :  { %s8084_s28 = smov 40   ;;  %s7025_s30 = smov 16   ;;  %vm5833_vm8 = vcmask 58369   ;;  %vm5753_vm9 = vcmask 57344   ;;  %vm5846_vm10 = vcmask 1040384   ;;  %vm5848_vm11 = vcmask 254976  }
  0x3d   :  { %v7224_v26 = vrot.slane %v7219_v25, %v293_v23  ;;  %s8088_s29 = smov 24   ;;  %s8101_s16 = smov 24  }
  0x3e   :  { %6641 = vmatpush3.bf16.msra.mxu0 %v6638_v6  ;;  %s8102_s18 = smov 104  }
  0x3f   :  { %6259 = vmatprep.subr.mxu0 %v7011_v8 }
  0x41   :  { %6237 = vmatmul.mubr.msk.f32.vlgmr.msra.gmra.mrb[0].mxu0 %vm130_vm0, %v7168_v7 }
  0x42   :  { %6261 = vmatprep.mubr.msk.f32.mxu0 %vm7012_vm1, %v7011_v8 }
 0x114   :  { %v6238_v10 = vpop.f32.mrb[0].mxu0 }
 0x115   :  { %v7181_v11 = vadd.f32 %v6238_v10, %v5866_v9  ;;  %v203_v12 = vpop.f32.mrb[1].mxu0 }
 0x116   :  { %v7183_v13 = vadd.f32 %v5866_v9, %v203_v12  ;;  %v7292_v9 = vrot.slane %v7219_v25, %v981_v62 }
 0x118   :  { %307 = vrot.lane.b32.xlu1 %v7183_v13, %s8090_s20  ;;  %213 = vrot.lane.b32.xlu0 %v7183_v13, %s7014_s22 }
 0x11c   :  { %385 = vrot.lane.b32.xlu1 %v7183_v13, %s7015_s23 }
 0x120   :  { %383 = vrot.lane.b32.xlu1 %v7183_v13, %s7016_s24 }
 0x124   :  { %552 = vrot.lane.b32.xlu1 %v7183_v13, %s8094_s25 }
 0x128   :  { %550 = vrot.lane.b32.xlu1 %v7183_v13, %s7018_s0 }
 0x12c   :  { %717 = vrot.lane.b32.xlu1 %v7183_v13, %s8096_s21 }
 0x18a   :  { %v308_v14 = vpop.permute.xlu1 %307  ;;  %v214_v15 = vpop.permute.xlu0 %213 }
 0x18b   :  { %6240 = vmatpush3.xpose.msk.msra.mxu1 %vm215_vm2, %v214_v15 }
 0x18c   :  { %6244 = vmatprep.subr.mxu1 %v7011_v8 }
 0x18e   :  { %v7201_v16 = vpop.permute.xlu1 %385  ;;  %6242 = vmatmul.mubr.msk.f32.vlgmr.msra.gmra.mrb[0].mxu1 %vm215_vm2, %v7183_v13 }
 0x18f   :  { %6245 = vmatpush3.msra.mxu1 %v308_v14  ;;  %6246 = vmatprep.mubr.msk.f32.mxu1 %vm7012_vm1, %v7011_v8 }
 0x190   :  { %6249 = vmatprep.subr.mxu1 %v7011_v8 }
 0x192   :  { %v7208_v17 = vpop.permute.xlu1 %383 }
 0x196   :  { %v553_v18 = vpop.permute.xlu1 %552 }
 0x197   :  { %6260 = vmatpush3.xpose.msk.msra.mxu0 %vm215_vm2, %v553_v18 }
 0x198   :  { %6269 = vmatprep.subr.mxu0 %v7011_v8 }
 0x19a   :  { %v551_v19 = vpop.permute.xlu1 %550 }
 0x19b   :  { %6262 = vmatmul.mubr.msk.f32.vlgmr.msra.gmra.mrb[2].mxu0 %vm215_vm2, %v551_v19 }
 0x19c   :  { %6271 = vmatprep.mubr.msk.f32.mxu0 %vm7012_vm1, %v7011_v8 }
 0x19e   :  { %v718_v41 = vpop.permute.xlu1 %717 }
 0x261   :  { %v286_v27 = vpop.f32.mrb[0].mxu1 }
 0x262   :  { %v290_v28 = vmul.f32 0.35355338, %v286_v27  ;;  %v6243_v29 = vpop.f32.mrb[1].mxu1 }
 0x264   :  { %v295_v30 = vadd.f32 %v7224_v26, %v290_v28 }
 0x266   :  { %v296_v31 = vsel %vm215_vm2, %v295_v30, -inf }
 0x267   :  { %297 = vmax.xlane.f32.xlu0 %v296_v31 }
 0x26e   :  { %v624_v32 = vpop.f32.mrb[2].mxu0 }
 0x26f   :  { %v6263_v33 = vpop.f32.mrb[3].mxu0  ;;  %v628_v34 = vmul.f32 0.35355338, %v624_v32 }
 0x271   :  { %v7235_v35 = vadd.f32 %v628_v34, %v7224_v26 }
 0x273   :  { %v630_v36 = vsel %vm215_vm2, %v7235_v35, -inf }
 0x27d   :  { %719 = vrot.lane.b32.xlu0 %v7183_v13, %s8092_s26 }
 0x281   :  { %1238 = vrot.lane.b32.xlu0 %v7181_v11, %s7018_s0 }
 0x285   :  { %1405 = vrot.lane.b32.xlu0 %v7181_v11, %s8096_s21 }
 0x2a4   :  { %631 = vmax.xlane.f32.xlu0 %v630_v36 }
 0x2f4   :  { %v298_v37 = vpop.xlane.xlu0 %297 }
 0x2f5   :  { %v299_v38 = vsub.f32 %v295_v30, %v298_v37 }
 0x2f7   :  { %v300_v39 = vmul.f32 1.442695, %v299_v38 }
 0x2f8   :  { %v720_v40 = vpop.permute.xlu0 %719 }
 0x2f9   :  { %6776 = vpow2.f32 %v300_v39  ;;  %6270 = vmatpush3.xpose.msk.msra.mxu0 %vm215_vm2, %v720_v40 }
 0x2fa   :  { %6279 = vmatprep.subr.mxu0 %v7011_v8 }
 0x2fc   :  { %6272 = vmatmul.mubr.msk.f32.vlgmr.msra.gmra.mrb[4].mxu0 %vm215_vm2, %v718_v41  ;;  %v1239_v51 = vpop.permute.xlu0 %1238 }
 0x2fd   :  { %6281 = vmatprep.mubr.msk.f32.mxu0 %vm7012_vm1, %v7011_v8 }
 0x300   :  { %v1406_v53 = vpop.permute.xlu0 %1405 }
 0x303   :  { %v6777_v42 = vpop.eup %6776 }
 0x304   :  { %v302_v43 = vsel %vm215_vm2, %v6777_v42, 0.0 }
 0x305   :  { %303 = vadd.xlane.f32.xlu1 %v302_v43 }
 0x316   :  { %902 = vrot.lane.b32.xlu1 %v7181_v11, %s7014_s22 }
 0x31a   :  { %1073 = vrot.lane.b32.xlu1 %v7181_v11, %s7015_s23 }
 0x31e   :  { %1071 = vrot.lane.b32.xlu1 %v7181_v11, %s7016_s24 }
 0x322   :  { %1240 = vrot.lane.b32.xlu1 %v7181_v11, %s8094_s25 }
 0x326   :  { %1407 = vrot.lane.b32.xlu1 %v7181_v11, %s8092_s26 }
 0x331   :  { %v632_v59 = vpop.xlane.xlu0 %631 }
 0x332   :  { %v633_v0 = vsub.f32 %v7235_v35, %v632_v59 }
 0x334   :  { %v634_v12 = vmul.f32 1.442695, %v633_v0 }
 0x392   :  { %v304_v44 = vpop.xlane.xlu1 %303 }
 0x393   :  { %6778 = vrcp.f32 %v304_v44 }
 0x394   :  { %6780 = vpow2.f32 %v634_v12 }
 0x396   :  { %v903_v45 = vpop.permute.xlu1 %902 }
 0x397   :  { %6280 = vmatpush3.xpose.msk.msra.mxu0 %vm215_vm2, %v903_v45 }
 0x398   :  { %6289 = vmatprep.subr.mxu0 %v7011_v8 }
 0x39a   :  { %v1074_v46 = vpop.permute.xlu1 %1073  ;;  %6282 = vmatmul.mubr.msk.f32.vlgmr.msra.gmra.mrb[6].mxu0 %vm215_vm2, %v7181_v11 }
 0x39b   :  { %6290 = vmatpush3.xpose.msk.msra.mxu0 %vm215_vm2, %v1074_v46  ;;  %6291 = vmatprep.mubr.msk.f32.mxu0 %vm7012_vm1, %v7011_v8 }
 0x39c   :  { %6299 = vmatprep.subr.mxu0 %v7011_v8 }
 0x39d   :  { %v6779_v47 = vpop.eup %6778 }
 0x39e   :  { %v1072_v48 = vpop.permute.xlu1 %1071  ;;  %v306_v49 = vmul.f32 %v6779_v47, %v6777_v42  ;;  %v7303_v38 = vpop.eup %6780 }
 0x39f   :  { %6292 = vmatmul.mubr.msk.f32.vlgmr.msra.gmra.mrb[8].mxu0 %vm215_vm2, %v1072_v48  ;;  %v636_v41 = vsel %vm215_vm2, %v7303_v38, 0.0 }
 0x3a0   :  { %6247 = vmatmul.mubr.msk.f32.vlgmr.msra.gmra.mrb[2].mxu1 %vm215_vm2, %v306_v49  ;;  %6301 = vmatprep.mubr.msk.f32.mxu0 %vm7012_vm1, %v7011_v8 }
 0x3a1   :  { %6250 = vmatpush3.xpose.msk.msra.mxu1 %vm215_vm2, %v7201_v16  ;;  %6251 = vmatprep.mubr.msk.f32.mxu1 %vm7012_vm1, %v7011_v8 }
 0x3a2   :  { %v1241_v50 = vpop.permute.xlu1 %1240  ;;  %6254 = vmatprep.subr.mxu1 %v7011_v8 }
 0x3a3   :  { %6300 = vmatpush3.xpose.msk.msra.mxu0 %vm215_vm2, %v1241_v50 }
 0x3a4   :  { %6252 = vmatmul.mubr.msk.f32.vlgmr.msra.gmra.mrb[4].mxu1 %vm215_vm2, %v7208_v17  ;;  %6309 = vmatprep.subr.mxu0 %v7011_v8 }
 0x3a5   :  { %6256 = vmatprep.mubr.msk.f32.mxu1 %vm7012_vm1, %v7011_v8 }
 0x3a6   :  { %v1408_v52 = vpop.permute.xlu1 %1407  ;;  %6302 = vmatmul.mubr.msk.f32.vlgmr.msra.gmra.mrb[10].mxu0 %vm215_vm2, %v1239_v51 }
 0x3a7   :  { %6310 = vmatpush3.xpose.msk.msra.mxu0 %vm215_vm2, %v1408_v52  ;;  %6311 = vmatprep.mubr.msk.f32.mxu0 %vm7012_vm1, %v7011_v8 }
 0x3aa   :  { %6312 = vmatmul.mubr.msk.f32.vlgmr.msra.gmra.mrb[12].mxu0 %vm215_vm2, %v1406_v53 }
 0x3cf   :  { %v791_v54 = vpop.f32.mrb[4].mxu0 }
 0x3d0   :  { %v795_v55 = vmul.f32 0.35355338, %v791_v54  ;;  %v6273_v56 = vpop.f32.mrb[5].mxu0 }
 0x3d2   :  { %v796_v57 = vadd.f32 %v795_v55, %v7224_v26 }
 0x3d4   :  { %v797_v58 = vsel %vm215_vm2, %v796_v57, -inf }
 0x3d5   :  { %798 = vmax.xlane.f32.xlu0 %v797_v58 }
 0x462   :  { %v799_v63 = vpop.xlane.xlu0 %798 }
 0x463   :  { %v800_v2 = vsub.f32 %v796_v57, %v799_v63 }
 0x465   :  { %v801_v15 = vmul.f32 1.442695, %v800_v2 }
 0x467   :  { %6782 = vpow2.f32 %v801_v15 }
 0x46d   :  { %v974_v60 = vpop.f32.mrb[6].mxu0 }
 0x46e   :  { %v6283_v61 = vpop.f32.mrb[7].mxu0  ;;  %v978_v18 = vmul.f32 0.35355338, %v974_v60 }
 0x470   :  { %v983_v30 = vadd.f32 %v7292_v9, %v978_v18 }
 0x471   :  { %v7306_v40 = vpop.eup %6782 }
 0x472   :  { %v1145_v1 = vpop.f32.mrb[8].mxu0  ;;  %v984_v34 = vsel %vm215_vm2, %v983_v30, -inf  ;;  %v803_v42 = vsel %vm215_vm2, %v7306_v40, 0.0 }
 0x473   :  { %v1149_v3 = vmul.f32 0.35355338, %v1145_v1  ;;  %v7287_v4 = vpop.f32.mrb[2].mxu1  ;;  %v6293_v6 = vpop.f32.mrb[9].mxu0 }
 0x474   :  { %v6248_v10 = vpop.f32.mrb[3].mxu1 }
 0x475   :  { %v1150_v14 = vadd.f32 %v1149_v3, %v7292_v9 }
 0x477   :  { %v457_v16 = vpop.f32.mrb[4].mxu1  ;;  %v1151_v17 = vsel %vm215_vm2, %v1150_v14, -inf }
 0x478   :  { %v461_v19 = vmul.f32 0.35355338, %v457_v16  ;;  %1152 = vmax.xlane.f32.xlu0 %v1151_v17  ;;  %v6253_v20 = vpop.f32.mrb[5].mxu1 }
 0x479   :  { %v1312_v21 = vpop.f32.mrb[10].mxu0 }
 0x47a   :  { %v6303_v27 = vpop.f32.mrb[11].mxu0  ;;  %v462_v28 = vadd.f32 %v461_v19, %v7224_v26  ;;  %v1316_v25 = vmul.f32 0.35355338, %v1312_v21 }
 0x47c   :  { %v463_v29 = vsel %vm215_vm2, %v462_v28, -inf  ;;  %v1317_v36 = vadd.f32 %v1316_v25, %v7292_v9 }
 0x47d   :  { %v1479_v31 = vpop.f32.mrb[12].mxu0  ;;  %464 = vmax.xlane.f32.xlu1 %v463_v29 }
 0x47e   :  { %v1483_v32 = vmul.f32 0.35355338, %v1479_v31  ;;  %v6313_v33 = vpop.f32.mrb[13].mxu0  ;;  %v1318_v39 = vsel %vm215_vm2, %v1317_v36, -inf }
 0x480   :  { %v1484_v35 = vadd.f32 %v1483_v32, %v7292_v9 }
 0x481   :  { %985 = vmax.xlane.f32.xlu1 %v984_v34 }
 0x482   :  { %v1485_v37 = vsel %vm215_vm2, %v1484_v35, -inf }
 0x483   :  { %1486 = vmax.xlane.f32.xlu0 %v1485_v37 }
 0x485   :  { %1319 = vmax.xlane.f32.xlu1 %v1318_v39 }
 0x487   :  { %637 = vadd.xlane.f32.xlu0 %v636_v41 }
 0x489   :  { %804 = vadd.xlane.f32.xlu1 %v803_v42 }
 0x505   :  { %v1153_v43 = vpop.xlane.xlu0 %1152 }
 0x506   :  { %v1154_v44 = vsub.f32 %v1150_v14, %v1153_v43 }
 0x508   :  { %v1155_v45 = vmul.f32 1.442695, %v1154_v44  ;;  %v101_v44 = vld [vmem:[%s8071_s5] sm:$0xff] }
 0x50a   :  { %6784 = vpow2.f32 %v1155_v45  ;;  %v465_v46 = vpop.xlane.xlu1 %464  ;;  %v102_v45 = vld [vmem:[%s8071_s5 + $0x8] sm:$0xff] }
 0x50b   :  { %v466_v1 = vsub.f32 %v462_v28, %v465_v46 }
 0x50d   :  { %v467_v2 = vmul.f32 1.442695, %v466_v1 }
 0x50e   :  { %v986_v47 = vpop.xlane.xlu1 %985 }
 0x50f   :  { %v987_v48 = vsub.f32 %v983_v30, %v986_v47  ;;  %v6642_v47 = vpack.c.bf16 %v102_v45, %v101_v44 }
 0x510   :  { %v1487_v49 = vpop.xlane.xlu0 %1486 }
 0x511   :  { %v988_v50 = vmul.f32 1.442695, %v987_v48  ;;  %v1488_v51 = vsub.f32 %v1484_v35, %v1487_v49  ;;  %6643 = vmatprep.subr.bf16.mxu0 %v6642_v47  ;;  %v103_v49 = vld [vmem:[%s8071_s5 + $0x10] sm:$0xff] }
 0x512   :  { %v1320_v52 = vpop.xlane.xlu1 %1319  ;;  %6645 = vmatpush3.bf16.msra.mxu0 %v6642_v47 }
 0x513   :  { %6786 = vpow2.f32 %v988_v50  ;;  %v1489_v53 = vmul.f32 1.442695, %v1488_v51  ;;  %v1321_v54 = vsub.f32 %v1317_v36, %v1320_v52  ;;  %v104_v50 = vld [vmem:[%s8071_s5 + $0x18] sm:$0xff] }
 0x514   :  { %v7312_v55 = vpop.eup %6784  ;;  %v638_v10 = vpop.xlane.xlu0 %637  ;;  %v6646_v52 = vpack.c.bf16 %v104_v50, %v103_v49  ;;  %v5896_v49 = vld [vmem:[%s8077_s11] ss:$0 sm:$0xff] }
 0x515   :  { %6788 = vpow2.f32 %v1489_v53  ;;  %v1322_v56 = vmul.f32 1.442695, %v1321_v54  ;;  %v1157_v57 = vsel %vm215_vm2, %v7312_v55, 0.0 }
 0x516   :  { %1158 = vadd.xlane.f32.xlu1 %v1157_v57  ;;  %v805_v16 = vpop.xlane.xlu1 %804  ;;  %6647 = vmatprep.subr.bf16.mxu0 %v6646_v52 }
 0x517   :  { %6790 = vpow2.f32 %v1322_v56  ;;  %6649 = vmatpush3.bf16.msra.mxu0 %v6646_v52 }
 0x518   :  { %6792 = vpow2.f32 %v467_v2 }
 0x51d   :  { %v7316_v58 = vpop.eup %6786 }
 0x51e   :  { %v990_v59 = vsel %vm215_vm2, %v7316_v58, 0.0 }
 0x51f   :  { %v7320_v60 = vpop.eup %6788  ;;  %991 = vadd.xlane.f32.xlu0 %v990_v59 }
 0x520   :  { %v1491_v61 = vsel %vm215_vm2, %v7320_v60, 0.0 }
 0x521   :  { %v7324_v63 = vpop.eup %6790  ;;  %1492 = vadd.xlane.f32.xlu1 %v1491_v61 }
 0x522   :  { %v1324_v0 = vsel %vm215_vm2, %v7324_v63, 0.0  ;;  %v6793_v3 = vpop.eup %6792 }
 0x523   :  { %1325 = vadd.xlane.f32.xlu0 %v1324_v0  ;;  %v469_v6 = vsel %vm215_vm2, %v6793_v3, 0.0 }
 0x532   :  { %641 = vrot.lane.b32.xlu1 %v7183_v13, %s8082_s1 }
 0x539   :  { %474 = vrot.lane.b32.xlu0 %v7183_v13, %s8086_s27 }
 0x53d   :  { %995 = vrot.lane.b32.xlu0 %v7181_v11, %s8090_s20 }
 0x541   :  { %1329 = vrot.lane.b32.xlu0 %v7181_v11, %s8082_s1  ;;  %s8098_s1 = smov 56  }
 0x556   :  { %470 = vadd.xlane.f32.xlu1 %v469_v6 }
 0x567   :  { %808 = vrot.lane.b32.xlu1 %v7183_v13, %s8084_s28 }
 0x56b   :  { %1162 = vrot.lane.b32.xlu1 %v7181_v11, %s8086_s27  ;;  %s8099_s27 = smov 40  }
 0x56f   :  { %1496 = vrot.lane.b32.xlu1 %v7181_v11, %s8084_s28  ;;  %s8100_s28 = smov 48  }
 0x5a3   :  { %v1159_v17 = vpop.xlane.xlu1 %1158 }
 0x5ac   :  { %v992_v12 = vpop.xlane.xlu0 %991 }
 0x5ae   :  { %v1493_v18 = vpop.xlane.xlu1 %1492 }
 0x5b0   :  { %v1326_v14 = vpop.xlane.xlu0 %1325 }
 0x5b2   :  { %v642_v19 = vpop.permute.xlu1 %641 }
 0x5b4   :  { %v475_v15 = vpop.permute.xlu0 %474 }
 0x5b5   :  { %6255 = vmatpush3.msra.mxu1 %v475_v15 }
 0x5b6   :  { %6264 = vmatprep.subr.mxu1 %v7011_v8 }
 0x5b8   :  { %v996_v31 = vpop.permute.xlu0 %995 }
 0x5bc   :  { %v1330_v37 = vpop.permute.xlu0 %1329 }
 0x5e3   :  { %v471_v20 = vpop.xlane.xlu1 %470 }
 0x5e4   :  { %6794 = vrcp.f32 %v471_v20 }
 0x5e5   :  { %6796 = vrcp.f32 %v638_v10 }
 0x5e6   :  { %6798 = vrcp.f32 %v805_v16 }
 0x5e7   :  { %6800 = vrcp.f32 %v992_v12  ;;  %v809_v25 = vpop.permute.xlu1 %808 }
 0x5e8   :  { %6802 = vrcp.f32 %v1159_v17 }
 0x5e9   :  { %6804 = vrcp.f32 %v1326_v14 }
 0x5ea   :  { %6806 = vrcp.f32 %v1493_v18 }
 0x5eb   :  { %v1163_v34 = vpop.permute.xlu1 %1162 }
 0x5ee   :  { %v6795_v13 = vpop.eup %6794 }
 0x5ef   :  { %v473_v21 = vmul.f32 %v6795_v13, %v6793_v3  ;;  %v6797_v27 = vpop.eup %6796 }
 0x5f0   :  { %v640_v11 = vmul.f32 %v6797_v27, %v7303_v38  ;;  %v6799_v28 = vpop.eup %6798 }
 0x5f1   :  { %6257 = vmatmul.mubr.msk.f32.vlgmr.msra.gmra.mrb[6].mxu1 %vm215_vm2, %v473_v21  ;;  %v807_v29 = vmul.f32 %v6799_v28, %v7306_v40  ;;  %v6801_v30 = vpop.eup %6800  ;;  %v1497_v40 = vpop.permute.xlu1 %1496 }
 0x5f2   :  { %6265 = vmatpush3.msra.mxu1 %v642_v19  ;;  %6266 = vmatprep.mubr.msk.f32.mxu1 %vm7012_vm1, %v7011_v8  ;;  %v994_v32 = vmul.f32 %v6801_v30, %v7316_v58  ;;  %v6803_v33 = vpop.eup %6802 }
 0x5f3   :  { %6274 = vmatprep.subr.mxu1 %v7011_v8  ;;  %v1161_v35 = vmul.f32 %v6803_v33, %v7312_v55  ;;  %v6805_v36 = vpop.eup %6804 }
 0x5f4   :  { %v1328_v38 = vmul.f32 %v6805_v36, %v7324_v63  ;;  %v6807_v39 = vpop.eup %6806 }
 0x5f5   :  { %6267 = vmatmul.mubr.msk.f32.vlgmr.msra.gmra.mrb[8].mxu1 %vm215_vm2, %v640_v11  ;;  %v1495_v41 = vmul.f32 %v6807_v39, %v7320_v60 }
 0x5f6   :  { %6275 = vmatpush3.msra.mxu1 %v809_v25  ;;  %6276 = vmatprep.mubr.msk.f32.mxu1 %vm7012_vm1, %v7011_v8 }
 0x5f7   :  { %6284 = vmatprep.subr.mxu1 %v7011_v8 }
 0x5f9   :  { %6277 = vmatmul.mubr.msk.f32.vlgmr.msra.gmra.mrb[10].mxu1 %vm215_vm2, %v807_v29 }
 0x5fa   :  { %6285 = vmatpush3.msra.mxu1 %v996_v31  ;;  %6286 = vmatprep.mubr.msk.f32.mxu1 %vm7012_vm1, %v7011_v8 }
 0x5fb   :  { %6294 = vmatprep.subr.mxu1 %v7011_v8 }
 0x5fd   :  { %6287 = vmatmul.mubr.msk.f32.vlgmr.msra.gmra.mrb[12].mxu1 %vm215_vm2, %v994_v32 }
 0x5fe   :  { %6295 = vmatpush3.msra.mxu1 %v1163_v34  ;;  %6296 = vmatprep.mubr.msk.f32.mxu1 %vm7012_vm1, %v7011_v8 }
 0x5ff   :  { %6304 = vmatprep.subr.mxu1 %v7011_v8 }
 0x601   :  { %6297 = vmatmul.mubr.msk.f32.vlgmr.msra.gmra.mrb[14].mxu1 %vm215_vm2, %v1161_v35 }
 0x602   :  { %6305 = vmatpush3.msra.mxu1 %v1330_v37  ;;  %6306 = vmatprep.mubr.msk.f32.mxu1 %vm7012_vm1, %v7011_v8  ;;  %v107_v37 = vld [vmem:[%s8073_s7 + $0x8] sm:$0xff] }
 0x603   :  { %6314 = vmatprep.subr.mxu1 %v7011_v8 }
 0x605   :  { %6307 = vmatmul.mubr.msk.f32.vlgmr.msra.gmra.mrb[16].mxu1 %vm215_vm2, %v1328_v38  ;;  %v108_v38 = vld [vmem:[%s8073_s7 + $0x10] sm:$0xff] }
 0x606   :  { %6315 = vmatpush3.msra.mxu1 %v1497_v40  ;;  %6316 = vmatprep.mubr.msk.f32.mxu1 %vm7012_vm1, %v7011_v8  ;;  %v109_v40 = vld [vmem:[%s8073_s7 + $0x18] sm:$0xff] }
 0x609   :  { %6317 = vmatmul.mubr.msk.f32.vlgmr.msra.gmra.mrb[18].mxu1 %vm215_vm2, %v1495_v41  ;;  %v6654_v41 = vpack.c.bf16 %v109_v40, %v108_v38 }
 0x6c4   :  { %v546_v42 = vpop.f32.mrb[6].mxu1 }
 0x6c5   :  { %885 = vrot.lane.b32.xlu0 %v546_v42, %s7009_s19  ;;  %v6258_v43 = vpop.f32.mrb[7].mxu1 }
 0x6c8   :  { %v713_v46 = vpop.f32.mrb[8].mxu1 }
 0x6c9   :  { %889 = vrot.lane.b32.xlu1 %v713_v46, %s7025_s30  ;;  %v6268_v48 = vpop.f32.mrb[9].mxu1 }
 0x6cc   :  { %v880_v51 = vpop.f32.mrb[10].mxu1 }
 0x6cd   :  { %893 = vrot.lane.b32.xlu1 %v880_v51, %s8088_s29  ;;  %v6278_v53 = vpop.f32.mrb[11].mxu1  ;;  %v5897_v51 = vld [vmem:[%s8078_s12] ss:$0 sm:$0xff] }
 0x6d0   :  { %v1067_v54 = vpop.f32.mrb[12].mxu1 }
 0x6d1   :  { %v6288_v55 = vpop.f32.mrb[13].mxu1 }
 0x6d4   :  { %v1234_v56 = vpop.f32.mrb[14].mxu1 }
 0x6d5   :  { %1573 = vrot.lane.b32.xlu0 %v1234_v56, %s7009_s19  ;;  %v6298_v57 = vpop.f32.mrb[15].mxu1 }
 0x6d8   :  { %v1401_v58 = vpop.f32.mrb[16].mxu1 }
 0x6d9   :  { %1577 = vrot.lane.b32.xlu0 %v1401_v58, %s7025_s30  ;;  %v6308_v59 = vpop.f32.mrb[17].mxu1  ;;  %v111_v58 = vld [vmem:[%s8075_s9] sm:$0xff] }
 0x6da   :  { %v112_v59 = vld [vmem:[%s8075_s9 + $0x8] sm:$0xff] }
 0x6dc   :  { %v1568_v60 = vpop.f32.mrb[18].mxu1 }
 0x6dd   :  { %1581 = vrot.lane.b32.xlu1 %v1568_v60, %s8088_s29  ;;  %v6318_v61 = vpop.f32.mrb[19].mxu1  ;;  %v6658_v60 = vpack.c.bf16 %v112_v59, %v111_v58  ;;  %v5909_v59 = vld [vmem:[%s8069_s3 + $0x38] sm:$0xff] }
 0x6de   :  { %v113_v61 = vld [vmem:[%s8075_s9 + $0x10] sm:$0xff] }
 0x6df   :  { %6659 = vmatprep.subr.bf16.mxu0 %v6658_v60 }
 0x737   :  { %v886_v63 = vpop.permute.xlu0 %885 }
 0x738   :  { %v896_v1 = vsel %vm215_vm2, %v7287_v4, %v886_v63  ;;  %v5893_v4 = vld [vmem:[%s8072_s6] ss:$0 sm:$0xff]  ;;  %v114_v63 = vld [vmem:[%s8075_s9 + $0x18] sm:$0xff] }
 0x73b   :  { %v890_v0 = vpop.permute.xlu1 %889 }
 0x73c   :  { %v898_v2 = vsel %vm897_vm4, %v896_v1, %v890_v0  ;;  %v6662_v0 = vpack.c.bf16 %v114_v63, %v113_v61  ;;  %v115_v1 = vld [vmem:[%s8075_s9 + $0x20] sm:$0xff] }
 0x73f   :  { %v894_v3 = vpop.permute.xlu1 %893 }
 0x740   :  { %v900_v6 = vsel %vm899_vm5, %v898_v2, %v894_v3  ;;  %v116_v2 = vld [vmem:[%s8075_s9 + $0x28] sm:$0xff] }
 0x741   :  { %6327 = vmatprep.mubr.msk.f32.mxu0 %vm130_vm0, %v900_v6  ;;  %v6666_v3 = vpack.c.bf16 %v116_v2, %v115_v1  ;;  %v117_v6 = vld [vmem:[%s8075_s9 + $0x30] sm:$0xff] }
 0x747   :  { %v1574_v10 = vpop.permute.xlu0 %1573 }
 0x748   :  { %v1584_v14 = vsel %vm215_vm2, %v1067_v54, %v1574_v10  ;;  %v118_v10 = vld [vmem:[%s8075_s9 + $0x38] sm:$0xff] }
 0x74b   :  { %v1578_v12 = vpop.permute.xlu0 %1577 }
 0x74c   :  { %v1585_v15 = vsel %vm897_vm4, %v1584_v14, %v1578_v12  ;;  %v6670_v12 = vpack.c.bf16 %v118_v10, %v117_v6  ;;  %v5898_v14 = vld [vmem:[%s8074_s8] ss:$0 sm:$0xff] }
 0x74d   :  { %v5904_v10 = vld [vmem:[%s8079_s13] ss:$0 sm:$0xff] }
 0x74f   :  { %v1582_v16 = vpop.permute.xlu1 %1581 }
 0x750   :  { %v1586_v17 = vsel %vm899_vm5, %v1585_v15, %v1582_v16 }
 0x751   :  { %6328 = vmatmul.mubr.msk.f32.vlgmr.msra.gmra.mrb[14].mxu0 %vm130_vm0, %v1586_v17 }
 0x752   :  { %6661 = vmatpush3.bf16.msra.mxu0 %v6658_v60 }
 0x753   :  { %6663 = vmatprep.subr.bf16.mxu0 %v6662_v0 }
 0x756   :  { %6665 = vmatpush3.bf16.msra.mxu0 %v6662_v0 }
 0x757   :  { %6667 = vmatprep.subr.bf16.mxu0 %v6666_v3 }
 0x75a   :  { %6669 = vmatpush3.bf16.msra.mxu0 %v6666_v3 }
 0x75b   :  { %6671 = vmatprep.subr.bf16.mxu0 %v6670_v12 }
 0x75e   :  { %6673 = vmatpush3.bf16.msra.mxu0 %v6670_v12 }
 0x75f   :  { %6381 = vmatprep.subr.mxu0 %v7011_v8 }
 0x824   :  { %v6329_v18 = vpop.f32.mrb[14].mxu0 }
 0x825   :  { %v1671_v19 = vadd.f32 %v6329_v18, %v5893_v4  ;;  %v1665_v20 = vpop.f32.mrb[15].mxu0 }
 0x826   :  { %v1666_v13 = vadd.f32 %v5893_v4, %v1665_v20 }
 0x827   :  { %v1675_v21 = vadd.f32 %v1671_v19, %v7168_v7 }
 0x828   :  { %v1674_v27 = vadd.f32 %v1666_v13, %v7164_v5  ;;  %v106_v5 = vld [vmem:[%s8073_s7] sm:$0xff] }
 0x829   :  { %v1679_v11 = vsel %vm130_vm0, %v1675_v21, 0.0  ;;  %v6650_v39 = vpack.c.bf16 %v107_v37, %v106_v5  ;;  %v5901_v5 = vld [vmem:[%s8076_s10] ss:$0 sm:$0xff] }
 0x82a   :  { %1680 = vadd.xlane.f32.xlu1 %v1679_v11  ;;  %v1676_v28 = vsel %vm130_vm0, %v1674_v27, 0.0 }
 0x82b   :  { %1677 = vadd.xlane.f32.xlu0 %v1676_v28  ;;  %6651 = vmatprep.subr.bf16.mxu1 %v6650_v39 }
 0x82c   :  { %6653 = vmatpush3.bf16.msra.mxu1 %v6650_v39 }
 0x82d   :  { %6655 = vmatprep.subr.bf16.mxu1 %v6654_v41 }
 0x830   :  { %6657 = vmatpush3.bf16.msra.mxu1 %v6654_v41 }
 0x8b7   :  { %v1681_v25 = vpop.xlane.xlu1 %1680 }
 0x8b8   :  { %v1684_v29 = vmul.f32 0.03125, %v1681_v25  ;;  %v1678_v30 = vpop.xlane.xlu0 %1677 }
 0x8b9   :  { %v1683_v31 = vmul.f32 0.03125, %v1678_v30 }
 0x8ba   :  { %v1686_v32 = vsub.f32 %v1675_v21, %v1684_v29 }
 0x8bb   :  { %v1685_v33 = vsub.f32 %v1674_v27, %v1683_v31 }
 0x8bc   :  { %v1688_v36 = vmul.f32 %v1686_v32, %v1686_v32 }
 0x8bd   :  { %v1687_v34 = vmul.f32 %v1685_v33, %v1685_v33 }
 0x8be   :  { %v1692_v7 = vsel %vm130_vm0, %v1688_v36, 0.0 }
 0x8bf   :  { %v1689_v35 = vsel %vm130_vm0, %v1687_v34, 0.0 }
 0x8c0   :  { %1690 = vadd.xlane.f32.xlu0 %v1689_v35 }
 0x8c4   :  { %1693 = vadd.xlane.f32.xlu0 %v1692_v7 }
 0x94d   :  { %v1691_v42 = vpop.xlane.xlu0 %1690 }
 0x94e   :  { %v1695_v43 = vmul.f32 0.03125, %v1691_v42 }
 0x950   :  { %v1697_v44 = vadd.f32 1e-05, %v1695_v43 }
 0x951   :  { %v1694_v45 = vpop.xlane.xlu0 %1693 }
 0x952   :  { %6808 = vrsqrt.f32 %v1697_v44  ;;  %v1696_v46 = vmul.f32 0.03125, %v1694_v45 }
 0x954   :  { %v1698_v47 = vadd.f32 1e-05, %v1696_v46 }
 0x956   :  { %6810 = vrsqrt.f32 %v1698_v47 }
 0x95c   :  { %v6809_v48 = vpop.eup %6808 }
 0x95d   :  { %v1701_v50 = vmul.f32 %v6809_v48, %v1685_v33 }
 0x95f   :  { %v1709_v52 = vmul.f32 %v5896_v49, %v1701_v50 }
 0x960   :  { %v6811_v53 = vpop.eup %6810 }
 0x961   :  { %v1702_v54 = vmul.f32 %v6811_v53, %v1686_v32  ;;  %v1717_v55 = vadd.f32 %v5897_v51, %v1709_v52 }
 0x963   :  { %v1710_v56 = vmul.f32 %v5896_v49, %v1702_v54  ;;  %6338 = vmatprep.mubr.msk.f32.mxu1 %vm130_vm0, %v1717_v55 }
 0x965   :  { %v1718_v57 = vadd.f32 %v5897_v51, %v1710_v56  ;;  %v5907_v56 = vld [vmem:[%s8069_s3 + $0x28] sm:$0xff] }
 0x967   :  { %6339 = vmatmul.mubr.msk.f32.vlgmr.msra.gmra.mrb[20].mxu1 %vm130_vm0, %v1718_v57 }
 0xa3a   :  { %v6340_v15 = vpop.f32.mrb[20].mxu1 }
 0xa3b   :  { %v1803_v16 = vadd.f32 %v6340_v15, %v5898_v14  ;;  %v1797_v17 = vpop.f32.mrb[21].mxu1 }
 0xa3c   :  { %v1798_v4 = vadd.f32 %v5898_v14, %v1797_v17 }
 0xa3d   :  { %v1807_v18 = vmul.f32 %v1803_v16, %v1803_v16 }
 0xa3e   :  { %v1806_v19 = vmul.f32 %v1798_v4, %v1798_v4 }
 0xa3f   :  { %v1809_v20 = vmul.f32 %v1807_v18, %v1803_v16 }
 0xa40   :  { %v1808_v13 = vmul.f32 %v1806_v19, %v1798_v4 }
 0xa41   :  { %v1811_v21 = vmul.f32 0.044715, %v1809_v20  ;;  %v5934_v20 = vld [vmem:[%s8070_s4 + $0x1] ss:$0 sm:$0xff] }
 0xa42   :  { %v1810_v27 = vmul.f32 0.044715, %v1808_v13 }
 0xa43   :  { %v1813_v11 = vadd.f32 %v1811_v21, %v1803_v16 }
 0xa44   :  { %v1812_v28 = vadd.f32 %v1810_v27, %v1798_v4 }
 0xa45   :  { %v1815_v25 = vmul.f32 0.7978846, %v1813_v11 }
 0xa46   :  { %v1814_v29 = vmul.f32 0.7978846, %v1812_v28 }
 0xa47   :  { %6812 = vtanh.f32 %v1815_v25 }
 0xa48   :  { %6814 = vtanh.f32 %v1814_v29 }
 0xa51   :  { %v6813_v30 = vpop.eup %6812 }
 0xa52   :  { %v6815_v31 = vpop.eup %6814  ;;  %v1819_v32 = vadd.f32 1.0, %v6813_v30 }
 0xa53   :  { %v1818_v33 = vadd.f32 1.0, %v6815_v31 }
 0xa54   :  { %v1821_v34 = vmul.f32 0.5, %v1819_v32 }
 0xa55   :  { %v1820_v35 = vmul.f32 0.5, %v1818_v33 }
 0xa56   :  { %v1823_v7 = vmul.f32 %v1821_v34, %v1803_v16  ;;  %v5905_v16 = vld [vmem:[%s8080_s14] ss:$0 sm:$0xff] }
 0xa57   :  { %v1822_v36 = vmul.f32 %v1820_v35, %v1798_v4 }
 0xa59   :  { %6357 = vmatprep.mubr.msk.f32.mxu0 %vm1830_vm6, %v1822_v36 }
 0xa5a   :  { %6358 = vmatmul.mubr.msk.f32.vlgmr.msra.gmra.mrb[16].mxu0 %vm1830_vm6, %v1823_v7 }
 0xa5b   :  { %6383 = vmatprep.mubr.msk.f32.mxu0 %vm7012_vm1, %v7011_v8 }
 0xb2d   :  { %v6359_v37 = vpop.f32.mrb[16].mxu0 }
 0xb2e   :  { %v1909_v38 = vadd.f32 %v6359_v37, %v5901_v5  ;;  %v1903_v39 = vpop.f32.mrb[17].mxu0 }
 0xb2f   :  { %v1904_v40 = vadd.f32 %v5901_v5, %v1903_v39 }
 0xb30   :  { %v1913_v41 = vadd.f32 %v1909_v38, %v1718_v57  ;;  %v5908_v57 = vld [vmem:[%s8069_s3 + $0x30] sm:$0xff] }
 0xb31   :  { %v1912_v42 = vadd.f32 %v1904_v40, %v1717_v55  ;;  %v5906_v55 = vld [vmem:[%s8069_s3 + $0x20] sm:$0xff]  ;;  %v6678_v60 = vpack.c.bf16 %v5909_v59, %v5908_v57 }
 0xb32   :  { %v1917_v43 = vsel %vm130_vm0, %v1913_v41, 0.0  ;;  %v6674_v58 = vpack.c.bf16 %v5907_v56, %v5906_v55 }
 0xb33   :  { %1918 = vadd.xlane.f32.xlu0 %v1917_v43  ;;  %v1914_v44 = vsel %vm130_vm0, %v1912_v42, 0.0 }
 0xb34   :  { %1915 = vadd.xlane.f32.xlu1 %v1914_v44  ;;  %6675 = vmatprep.subr.bf16.mxu1 %v6674_v58 }
 0xb35   :  { %6677 = vmatpush3.bf16.msra.mxu1 %v6674_v58 }
 0xb36   :  { %6679 = vmatprep.subr.bf16.mxu1 %v6678_v60 }
 0xb39   :  { %6681 = vmatpush3.bf16.msra.mxu1 %v6678_v60 }
 0xb3a   :  { %6371 = vmatprep.subr.mxu1 %v7011_v8 }
 0xbc0   :  { %v1919_v45 = vpop.xlane.xlu0 %1918 }
 0xbc1   :  { %v1921_v46 = vmul.f32 0.03125, %v1919_v45  ;;  %v1916_v47 = vpop.xlane.xlu1 %1915 }
 0xbc2   :  { %v1920_v48 = vmul.f32 0.03125, %v1916_v47 }
 0xbc3   :  { %v1923_v49 = vsub.f32 %v1913_v41, %v1921_v46 }
 0xbc4   :  { %v1922_v50 = vsub.f32 %v1912_v42, %v1920_v48 }
 0xbc5   :  { %v1925_v51 = vmul.f32 %v1923_v49, %v1923_v49 }
 0xbc6   :  { %v1924_v52 = vmul.f32 %v1922_v50, %v1922_v50 }
 0xbc7   :  { %v1929_v53 = vsel %vm130_vm0, %v1925_v51, 0.0 }
 0xbc8   :  { %1930 = vadd.xlane.f32.xlu0 %v1929_v53  ;;  %v1926_v54 = vsel %vm130_vm0, %v1924_v52, 0.0 }
 0xbc9   :  { %1927 = vadd.xlane.f32.xlu1 %v1926_v54 }
 0xc55   :  { %v1931_v61 = vpop.xlane.xlu0 %1930 }
 0xc56   :  { %v1933_v63 = vmul.f32 0.03125, %v1931_v61  ;;  %v1928_v0 = vpop.xlane.xlu1 %1927 }
 0xc57   :  { %v1932_v1 = vmul.f32 0.03125, %v1928_v0 }
 0xc58   :  { %v1935_v2 = vadd.f32 1e-05, %v1933_v63 }
 0xc59   :  { %v1934_v3 = vadd.f32 1e-05, %v1932_v1 }
 0xc5a   :  { %6816 = vrsqrt.f32 %v1935_v2 }
 0xc5b   :  { %6818 = vrsqrt.f32 %v1934_v3 }
 0xc64   :  { %v6817_v6 = vpop.eup %6816 }
 0xc65   :  { %v6819_v12 = vpop.eup %6818  ;;  %v1939_v14 = vmul.f32 %v6817_v6, %v1923_v49 }
 0xc66   :  { %v1938_v15 = vmul.f32 %v6819_v12, %v1922_v50 }
 0xc67   :  { %v1947_v17 = vmul.f32 %v5904_v10, %v1939_v14 }
 0xc68   :  { %v1946_v4 = vmul.f32 %v5904_v10, %v1938_v15 }
 0xc69   :  { %v7490_v19 = vadd.f32 %v5905_v16, %v1947_v17 }
 0xc6a   :  { %v7488_v18 = vadd.f32 %v5905_v16, %v1946_v4 }
 0xc6c   :  { %6368 = vmatprep.mubr.msk.f32.mxu1 %vm130_vm0, %v7488_v18 }
 0xc6d   :  { %6369 = vmatmul.mubr.msk.f32.vlgmr.msra.gmra.mrb[22].mxu1 %vm130_vm0, %v7490_v19 }
 0xc6e   :  { %6373 = vmatprep.mubr.msk.f32.mxu1 %vm7012_vm1, %v7011_v8 }
 0xd40   :  { %v6370_v13 = vpop.f32.mrb[22].mxu1 }
 0xd41   :  { %v2074_v21 = vpop.f32.mrb[23].mxu1  ;;  %v7515_v11 = vadd.f32 %v6370_v13, %v5934_v20 }
 0xd42   :  { %v7501_v27 = vadd.f32 %v5934_v20, %v2074_v21 }
 0xd44   :  { %2251 = vrot.lane.b32.xlu0 %v7501_v27, %s7015_s23  ;;  %2084 = vrot.lane.b32.xlu1 %v7501_v27, %s7014_s22 }
 0xd48   :  { %2416 = vrot.lane.b32.xlu0 %v7501_v27, %s7018_s0  ;;  %2249 = vrot.lane.b32.xlu1 %v7501_v27, %s7016_s24 }
 0xd4c   :  { %2583 = vrot.lane.b32.xlu0 %v7501_v27, %s8096_s21  ;;  %2418 = vrot.lane.b32.xlu1 %v7501_v27, %s8094_s25 }
 0xd50   :  { %2933 = vrot.lane.b32.xlu0 %v7515_v11, %s7015_s23  ;;  %2585 = vrot.lane.b32.xlu1 %v7501_v27, %s8092_s26 }
 0xd54   :  { %3100 = vrot.lane.b32.xlu0 %v7515_v11, %s8094_s25  ;;  %2766 = vrot.lane.b32.xlu1 %v7515_v11, %s7014_s22  ;;  %s8105_s25 = smov 64  }
 0xd58   :  { %3267 = vrot.lane.b32.xlu0 %v7515_v11, %s8092_s26  ;;  %2931 = vrot.lane.b32.xlu1 %v7515_v11, %s7016_s24 }
 0xd5c   :  { %2173 = vrot.lane.b32.xlu0 %v7501_v27, %s8090_s20  ;;  %3098 = vrot.lane.b32.xlu1 %v7515_v11, %s7018_s0 }
 0xd60   :  { %3265 = vrot.lane.b32.xlu1 %v7515_v11, %s8096_s21 }
 0xd64   :  { %2340 = vrot.lane.b32.xlu1 %v7501_v27, %s8098_s1 }
 0xdb6   :  { %v2252_v28 = vpop.permute.xlu0 %2251  ;;  %v2085_v25 = vpop.permute.xlu1 %2084 }
 0xdb7   :  { %6372 = vmatpush3.xpose.msk.msra.mxu1 %vm215_vm2, %v2085_v25  ;;  %6382 = vmatpush3.xpose.msk.msra.mxu0 %vm215_vm2, %v2252_v28 }
 0xdb8   :  { %6391 = vmatprep.subr.mxu0 %v7011_v8  ;;  %6376 = vmatprep.subr.mxu1 %v7011_v8 }
 0xdba   :  { %v2417_v29 = vpop.permute.xlu0 %2416  ;;  %6374 = vmatmul.mubr.msk.f32.vlgmr.msra.gmra.mrb[24].mxu1 %vm215_vm2, %v7501_v27  ;;  %v2250_v30 = vpop.permute.xlu1 %2249 }
 0xdbb   :  { %6384 = vmatmul.mubr.msk.f32.vlgmr.msra.gmra.mrb[18].mxu0 %vm215_vm2, %v2250_v30  ;;  %6378 = vmatprep.mubr.msk.f32.mxu1 %vm7012_vm1, %v7011_v8 }
 0xdbc   :  { %6393 = vmatprep.mubr.msk.f32.mxu0 %vm7012_vm1, %v7011_v8 }
 0xdbe   :  { %v2584_v31 = vpop.permute.xlu0 %2583  ;;  %v2419_v32 = vpop.permute.xlu1 %2418 }
 0xdbf   :  { %6392 = vmatpush3.xpose.msk.msra.mxu0 %vm215_vm2, %v2419_v32 }
 0xdc0   :  { %6401 = vmatprep.subr.mxu0 %v7011_v8 }
 0xdc2   :  { %v2934_v33 = vpop.permute.xlu0 %2933  ;;  %6394 = vmatmul.mubr.msk.f32.vlgmr.msra.gmra.mrb[20].mxu0 %vm215_vm2, %v2417_v29  ;;  %v2586_v34 = vpop.permute.xlu1 %2585 }
 0xdc3   :  { %6402 = vmatpush3.xpose.msk.msra.mxu0 %vm215_vm2, %v2586_v34  ;;  %6403 = vmatprep.mubr.msk.f32.mxu0 %vm7012_vm1, %v7011_v8 }
 0xdc4   :  { %6411 = vmatprep.subr.mxu0 %v7011_v8 }
 0xdc6   :  { %v3101_v35 = vpop.permute.xlu0 %3100  ;;  %6404 = vmatmul.mubr.msk.f32.vlgmr.msra.gmra.mrb[22].mxu0 %vm215_vm2, %v2584_v31  ;;  %v2767_v36 = vpop.permute.xlu1 %2766 }
 0xdc7   :  { %6412 = vmatpush3.xpose.msk.msra.mxu0 %vm215_vm2, %v2767_v36  ;;  %6413 = vmatprep.mubr.msk.f32.mxu0 %vm7012_vm1, %v7011_v8 }
 0xdc8   :  { %6421 = vmatprep.subr.mxu0 %v7011_v8 }
 0xdca   :  { %v3268_v7 = vpop.permute.xlu0 %3267  ;;  %6414 = vmatmul.mubr.msk.f32.vlgmr.msra.gmra.mrb[24].mxu0 %vm215_vm2, %v7515_v11  ;;  %v2932_v5 = vpop.permute.xlu1 %2931 }
 0xdcb   :  { %6422 = vmatpush3.xpose.msk.msra.mxu0 %vm215_vm2, %v2934_v33  ;;  %6423 = vmatprep.mubr.msk.f32.mxu0 %vm7012_vm1, %v7011_v8 }
 0xdcc   :  { %6431 = vmatprep.subr.mxu0 %v7011_v8 }
 0xdce   :  { %v2174_v37 = vpop.permute.xlu0 %2173  ;;  %6424 = vmatmul.mubr.msk.f32.vlgmr.msra.gmra.mrb[26].mxu0 %vm215_vm2, %v2932_v5  ;;  %v3099_v38 = vpop.permute.xlu1 %3098 }
 0xdcf   :  { %6377 = vmatpush3.msra.mxu1 %v2174_v37  ;;  %6432 = vmatpush3.xpose.msk.msra.mxu0 %vm215_vm2, %v3101_v35 }
 0xdd0   :  { %6433 = vmatprep.mubr.msk.f32.mxu0 %vm7012_vm1, %v7011_v8  ;;  %6441 = vmatprep.subr.mxu0 %v7011_v8 }
 0xdd1   :  { %6386 = vmatprep.subr.mxu1 %v7011_v8 }
 0xdd2   :  { %6434 = vmatmul.mubr.msk.f32.vlgmr.msra.gmra.mrb[28].mxu0 %vm215_vm2, %v3099_v38  ;;  %v3266_v39 = vpop.permute.xlu1 %3265 }
 0xdd3   :  { %6442 = vmatpush3.xpose.msk.msra.mxu0 %vm215_vm2, %v3268_v7  ;;  %6443 = vmatprep.mubr.msk.f32.mxu0 %vm7012_vm1, %v7011_v8 }
 0xdd6   :  { %6444 = vmatmul.mubr.msk.f32.vlgmr.msra.gmra.mrb[30].mxu0 %vm215_vm2, %v3266_v39  ;;  %v7597_v25 = vpop.permute.xlu1 %2340 }
 0xe8d   :  { %v2156_v40 = vpop.f32.mrb[24].mxu1 }
 0xe8e   :  { %v2160_v41 = vmul.f32 0.35355338, %v2156_v40  ;;  %v6375_v42 = vpop.f32.mrb[25].mxu1  ;;  %v2323_v43 = vpop.f32.mrb[18].mxu0 }
 0xe8f   :  { %v2327_v44 = vmul.f32 0.35355338, %v2323_v43  ;;  %v6385_v45 = vpop.f32.mrb[19].mxu0 }
 0xe90   :  { %v2161_v46 = vadd.f32 %v2160_v41, %v7224_v26 }
 0xe91   :  { %v2328_v47 = vadd.f32 %v2327_v44, %v7224_v26 }
 0xe92   :  { %v2162_v48 = vsel %vm215_vm2, %v2161_v46, -inf }
 0xe93   :  { %2163 = vmax.xlane.f32.xlu0 %v2162_v48  ;;  %v2329_v49 = vsel %vm215_vm2, %v2328_v47, -inf }
 0xe94   :  { %2330 = vmax.xlane.f32.xlu1 %v2329_v49 }
 0xe95   :  { %v2490_v50 = vpop.f32.mrb[20].mxu0 }
 0xe96   :  { %v2494_v51 = vmul.f32 0.35355338, %v2490_v50  ;;  %v6395_v52 = vpop.f32.mrb[21].mxu0 }
 0xe98   :  { %v2495_v53 = vadd.f32 %v2494_v51, %v7224_v26 }
 0xe99   :  { %v2657_v54 = vpop.f32.mrb[22].mxu0 }
 0xe9a   :  { %v2661_v55 = vmul.f32 0.35355338, %v2657_v54  ;;  %v6405_v56 = vpop.f32.mrb[23].mxu0  ;;  %v2496_v57 = vsel %vm215_vm2, %v2495_v53, -inf }
 0xe9b   :  { %2497 = vmax.xlane.f32.xlu0 %v2496_v57 }
 0xe9c   :  { %v2662_v58 = vadd.f32 %v2661_v55, %v7224_v26 }
 0xe9d   :  { %v2838_v59 = vpop.f32.mrb[24].mxu0 }
 0xe9e   :  { %v2842_v60 = vmul.f32 0.35355338, %v2838_v59  ;;  %v6415_v61 = vpop.f32.mrb[25].mxu0  ;;  %v2663_v63 = vsel %vm215_vm2, %v2662_v58, -inf }
 0xe9f   :  { %2664 = vmax.xlane.f32.xlu0 %v2663_v63 }
 0xea0   :  { %v2843_v0 = vadd.f32 %v2842_v60, %v7292_v9 }
 0xea1   :  { %v3005_v1 = vpop.f32.mrb[26].mxu0 }
 0xea2   :  { %v3009_v2 = vmul.f32 0.35355338, %v3005_v1  ;;  %v6425_v3 = vpop.f32.mrb[27].mxu0  ;;  %v2844_v6 = vsel %vm215_vm2, %v2843_v0, -inf }
 0xea3   :  { %2845 = vmax.xlane.f32.xlu1 %v2844_v6 }
 0xea4   :  { %v3010_v10 = vadd.f32 %v3009_v2, %v7292_v9 }
 0xea5   :  { %v3172_v12 = vpop.f32.mrb[28].mxu0 }
 0xea6   :  { %v3176_v14 = vmul.f32 0.35355338, %v3172_v12  ;;  %v6435_v15 = vpop.f32.mrb[29].mxu0  ;;  %v3011_v26 = vsel %vm215_vm2, %v3010_v10, -inf }
 0xea7   :  { %3012 = vmax.xlane.f32.xlu0 %v3011_v26 }
 0xea8   :  { %v3177_v16 = vadd.f32 %v3176_v14, %v7292_v9 }
 0xea9   :  { %v3339_v17 = vpop.f32.mrb[30].mxu0 }
 0xeaa   :  { %v3343_v4 = vmul.f32 0.35355338, %v3339_v17  ;;  %v6445_v20 = vpop.f32.mrb[31].mxu0  ;;  %v3178_v13 = vsel %vm215_vm2, %v3177_v16, -inf }
 0xeab   :  { %3179 = vmax.xlane.f32.xlu1 %v3178_v13 }
 0xeac   :  { %v3344_v21 = vadd.f32 %v3343_v4, %v7292_v9 }
 0xeae   :  { %v3345_v28 = vsel %vm215_vm2, %v3344_v21, -inf }
 0xeaf   :  { %3346 = vmax.xlane.f32.xlu0 %v3345_v28 }
 0xebc   :  { %2674 = vrot.lane.b32.xlu1 %v7501_v27, %s8099_s27 }
 0xec5   :  { %2507 = vrot.lane.b32.xlu0 %v7501_v27, %s8100_s28 }
 0xf20   :  { %v2164_v29 = vpop.xlane.xlu0 %2163 }
 0xf21   :  { %v2165_v30 = vsub.f32 %v2161_v46, %v2164_v29  ;;  %v2331_v31 = vpop.xlane.xlu1 %2330 }
 0xf22   :  { %v2332_v32 = vsub.f32 %v2328_v47, %v2331_v31 }
 0xf23   :  { %v2166_v33 = vmul.f32 1.442695, %v2165_v30 }
 0xf24   :  { %v2333_v34 = vmul.f32 1.442695, %v2332_v32 }
 0xf25   :  { %6820 = vpow2.f32 %v2166_v33 }
 0xf26   :  { %6822 = vpow2.f32 %v2333_v34 }
 0xf28   :  { %v2498_v9 = vpop.xlane.xlu0 %2497 }
 0xf29   :  { %v2499_v35 = vsub.f32 %v2495_v53, %v2498_v9 }
 0xf2b   :  { %v2500_v36 = vmul.f32 1.442695, %v2499_v35 }
 0xf2c   :  { %v2665_v7 = vpop.xlane.xlu0 %2664 }
 0xf2d   :  { %6824 = vpow2.f32 %v2500_v36  ;;  %v2666_v5 = vsub.f32 %v2662_v58, %v2665_v7 }
 0xf2f   :  { %v6821_v37 = vpop.eup %6820  ;;  %v2667_v38 = vmul.f32 1.442695, %v2666_v5 }
 0xf30   :  { %v6823_v39 = vpop.eup %6822  ;;  %v2168_v27 = vsel %vm215_vm2, %v6821_v37, 0.0  ;;  %v2846_v45 = vpop.xlane.xlu1 %2845 }
 0xf31   :  { %6826 = vpow2.f32 %v2667_v38  ;;  %2169 = vadd.xlane.f32.xlu1 %v2168_v27  ;;  %v2335_v40 = vsel %vm215_vm2, %v6823_v39, 0.0  ;;  %v2847_v46 = vsub.f32 %v2843_v0, %v2846_v45 }
 0xf32   :  { %2336 = vadd.xlane.f32.xlu0 %v2335_v40 }
 0xf33   :  { %v2848_v50 = vmul.f32 1.442695, %v2847_v46  ;;  %v5911_v46 = vld [vmem:[%s8071_s5 + $0x20] sm:$0xff] }
 0xf34   :  { %v3013_v47 = vpop.xlane.xlu0 %3012 }
 0xf35   :  { %v3014_v49 = vsub.f32 %v3010_v10, %v3013_v47  ;;  %6828 = vpow2.f32 %v2848_v50  ;;  %v5912_v47 = vld [vmem:[%s8071_s5 + $0x28] sm:$0xff]  ;;  %v5914_v50 = vld [vmem:[%s8071_s5 + $0x38] sm:$0xff] }
 0xf37   :  { %v6825_v41 = vpop.eup %6824  ;;  %v3015_v53 = vmul.f32 1.442695, %v3014_v49  ;;  %v5913_v49 = vld [vmem:[%s8071_s5 + $0x30] sm:$0xff] }
 0xf38   :  { %v2502_v42 = vsel %vm215_vm2, %v6825_v41, 0.0  ;;  %v3180_v48 = vpop.xlane.xlu1 %3179 }
 0xf39   :  { %2503 = vadd.xlane.f32.xlu1 %v2502_v42  ;;  %v3181_v51 = vsub.f32 %v3177_v16, %v3180_v48  ;;  %6830 = vpow2.f32 %v3015_v53  ;;  %v6682_v48 = vpack.c.bf16 %v5912_v47, %v5911_v46  ;;  %v5965_v47 = vld [vmem:[%s8078_s12 + $0x1] ss:$0 sm:$0xff] }
 0xf3b   :  { %v7602_v43 = vpop.eup %6826  ;;  %v3182_v54 = vmul.f32 1.442695, %v3181_v51  ;;  %6683 = vmatprep.subr.bf16.mxu0 %v6682_v48  ;;  %v6686_v51 = vpack.c.bf16 %v5914_v50, %v5913_v49 }
 0xf3c   :  { %v2669_v44 = vsel %vm215_vm2, %v7602_v43, 0.0  ;;  %v3347_v52 = vpop.xlane.xlu0 %3346  ;;  %v2675_v2 = vpop.permute.xlu1 %2674  ;;  %6685 = vmatpush3.bf16.msra.mxu0 %v6682_v48 }
 0xf3d   :  { %2670 = vadd.xlane.f32.xlu0 %v2669_v44  ;;  %v3348_v55 = vsub.f32 %v3344_v21, %v3347_v52  ;;  %6832 = vpow2.f32 %v3182_v54  ;;  %6687 = vmatprep.subr.bf16.mxu0 %v6686_v51 }
 0xf3f   :  { %v3349_v56 = vmul.f32 1.442695, %v3348_v55  ;;  %v6829_v57 = vpop.eup %6828 }
 0xf40   :  { %v2850_v59 = vsel %vm215_vm2, %v6829_v57, 0.0  ;;  %v2508_v3 = vpop.permute.xlu0 %2507  ;;  %6689 = vmatpush3.bf16.msra.mxu0 %v6686_v51 }
 0xf41   :  { %6834 = vpow2.f32 %v3349_v56 }
 0xf43   :  { %v7610_v58 = vpop.eup %6830 }
 0xf44   :  { %v3017_v61 = vsel %vm215_vm2, %v7610_v58, 0.0 }
 0xf47   :  { %v7613_v60 = vpop.eup %6832 }
 0xf48   :  { %v3184_v63 = vsel %vm215_vm2, %v7613_v60, 0.0 }
 0xf4a   :  { %3022 = vrot.lane.b32.xlu1 %v7515_v11, %s8098_s1 }
 0xf4b   :  { %v7619_v0 = vpop.eup %6834 }
 0xf4c   :  { %v3351_v1 = vsel %vm215_vm2, %v7619_v0, 0.0 }
 0xf53   :  { %2855 = vrot.lane.b32.xlu0 %v7515_v11, %s8090_s20  ;;  %s8104_s20 = smov 72  }
 0xf6e   :  { %2851 = vadd.xlane.f32.xlu1 %v2850_v59 }
 0xf72   :  { %3018 = vadd.xlane.f32.xlu0 %v3017_v61  ;;  %3185 = vadd.xlane.f32.xlu1 %v3184_v63 }
 0xf76   :  { %3352 = vadd.xlane.f32.xlu1 %v3351_v1 }
 0xf87   :  { %3356 = vrot.lane.b32.xlu1 %v7515_v11, %s8099_s27 }
 0xf88   :  { %3189 = vrot.lane.b32.xlu0 %v7515_v11, %s8100_s28 }
 0xfbe   :  { %v2170_v6 = vpop.xlane.xlu1 %2169 }
 0xfbf   :  { %6836 = vrcp.f32 %v2170_v6  ;;  %v2337_v10 = vpop.xlane.xlu0 %2336 }
 0xfc0   :  { %6838 = vrcp.f32 %v2337_v10 }
 0xfc6   :  { %v2504_v12 = vpop.xlane.xlu1 %2503 }
 0xfc7   :  { %6840 = vrcp.f32 %v2504_v12 }
 0xfc9   :  { %v6837_v14 = vpop.eup %6836 }
 0xfca   :  { %v2172_v15 = vmul.f32 %v6837_v14, %v6821_v37  ;;  %v2671_v26 = vpop.xlane.xlu0 %2670  ;;  %v6839_v16 = vpop.eup %6838 }
 0xfcb   :  { %6842 = vrcp.f32 %v2671_v26  ;;  %v2339_v11 = vmul.f32 %v6839_v16, %v6823_v39  ;;  %v3023_v28 = vpop.permute.xlu1 %3022  ;;  %v5961_v26 = vld [vmem:[%s8072_s6 + $0x1] ss:$0 sm:$0xff] }
 0xfcc   :  { %6379 = vmatmul.mubr.msk.f32.vlgmr.msra.gmra.mrb[26].mxu1 %vm215_vm2, %v2172_v15 }
 0xfcd   :  { %6387 = vmatpush3.msra.mxu1 %v7597_v25  ;;  %6388 = vmatprep.mubr.msk.f32.mxu1 %vm7012_vm1, %v7011_v8 }
 0xfce   :  { %6396 = vmatprep.subr.mxu1 %v7011_v8  ;;  %v2856_v21 = vpop.permute.xlu0 %2855 }
 0xfd0   :  { %6389 = vmatmul.mubr.msk.f32.vlgmr.msra.gmra.mrb[28].mxu1 %vm215_vm2, %v2339_v11 }
 0xfd1   :  { %v6841_v17 = vpop.eup %6840  ;;  %6397 = vmatpush3.msra.mxu1 %v2508_v3  ;;  %6398 = vmatprep.mubr.msk.f32.mxu1 %vm7012_vm1, %v7011_v8 }
 0xfd2   :  { %v2506_v4 = vmul.f32 %v6841_v17, %v6825_v41  ;;  %6406 = vmatprep.subr.mxu1 %v7011_v8 }
 0xfd4   :  { %6399 = vmatmul.mubr.msk.f32.vlgmr.msra.gmra.mrb[30].mxu1 %vm215_vm2, %v2506_v4 }
 0xfd5   :  { %v6843_v20 = vpop.eup %6842  ;;  %6407 = vmatpush3.msra.mxu1 %v2675_v2  ;;  %6408 = vmatprep.mubr.msk.f32.mxu1 %vm7012_vm1, %v7011_v8 }
 0xfd6   :  { %v2673_v13 = vmul.f32 %v6843_v20, %v7602_v43  ;;  %6416 = vmatprep.subr.mxu1 %v7011_v8 }
 0xfd8   :  { %6409 = vmatmul.mubr.msk.f32.vlgmr.msra.gmra.mrb[32].mxu1 %vm215_vm2, %v2673_v13 }
 0xfd9   :  { %6417 = vmatpush3.msra.mxu1 %v2856_v21  ;;  %6418 = vmatprep.mubr.msk.f32.mxu1 %vm7012_vm1, %v7011_v8 }
 0xfda   :  { %6426 = vmatprep.subr.mxu1 %v7011_v8 }
 0xffb   :  { %v2852_v25 = vpop.xlane.xlu1 %2851 }
 0xffc   :  { %6844 = vrcp.f32 %v2852_v25 }
 0xfff   :  { %v3019_v29 = vpop.xlane.xlu0 %3018  ;;  %v3186_v30 = vpop.xlane.xlu1 %3185 }
0x1000   :  { %6846 = vrcp.f32 %v3019_v29 }
0x1001   :  { %6848 = vrcp.f32 %v3186_v30 }
0x1003   :  { %v3353_v31 = vpop.xlane.xlu1 %3352  ;;  %v3190_v36 = vpop.permute.xlu0 %3189 }
0x1004   :  { %6850 = vrcp.f32 %v3353_v31 }
0x1006   :  { %v6845_v32 = vpop.eup %6844 }
0x1007   :  { %v2854_v33 = vmul.f32 %v6845_v32, %v6829_v57  ;;  %v3357_v37 = vpop.permute.xlu1 %3356 }
0x1009   :  { %6419 = vmatmul.mubr.msk.f32.vlgmr.msra.gmra.mrb[34].mxu1 %vm215_vm2, %v2854_v33 }
0x100a   :  { %v6847_v34 = vpop.eup %6846  ;;  %6427 = vmatpush3.msra.mxu1 %v3023_v28  ;;  %6428 = vmatprep.mubr.msk.f32.mxu1 %vm7012_vm1, %v7011_v8 }
0x100b   :  { %v3021_v9 = vmul.f32 %v6847_v34, %v7610_v58  ;;  %6436 = vmatprep.subr.mxu1 %v7011_v8  ;;  %v6849_v35 = vpop.eup %6848 }
0x100c   :  { %v3188_v7 = vmul.f32 %v6849_v35, %v7613_v60 }
0x100d   :  { %6429 = vmatmul.mubr.msk.f32.vlgmr.msra.gmra.mrb[36].mxu1 %vm215_vm2, %v3021_v9 }
0x100e   :  { %6437 = vmatpush3.msra.mxu1 %v3190_v36  ;;  %6438 = vmatprep.mubr.msk.f32.mxu1 %vm7012_vm1, %v7011_v8  ;;  %v6851_v5 = vpop.eup %6850  ;;  %v5917_v36 = vld [vmem:[%s8073_s7 + $0x28] sm:$0xff] }
0x100f   :  { %6446 = vmatprep.subr.mxu1 %v7011_v8  ;;  %v3355_v38 = vmul.f32 %v6851_v5, %v7619_v0  ;;  %v5918_v5 = vld [vmem:[%s8073_s7 + $0x30] sm:$0xff] }
0x1011   :  { %6439 = vmatmul.mubr.msk.f32.vlgmr.msra.gmra.mrb[38].mxu1 %vm215_vm2, %v3188_v7 }
0x1012   :  { %6447 = vmatpush3.msra.mxu1 %v3357_v37  ;;  %6448 = vmatprep.mubr.msk.f32.mxu1 %vm7012_vm1, %v7011_v8  ;;  %v5919_v37 = vld [vmem:[%s8073_s7 + $0x38] sm:$0xff] }
0x1015   :  { %6449 = vmatmul.mubr.msk.f32.vlgmr.msra.gmra.mrb[40].mxu1 %vm215_vm2, %v3355_v38  ;;  %v6694_v38 = vpack.c.bf16 %v5919_v37, %v5918_v5 }
0x109f   :  { %v2245_v39 = vpop.f32.mrb[26].mxu1 }
0x10a0   :  { %v6380_v27 = vpop.f32.mrb[27].mxu1 }
0x10a3   :  { %v2412_v40 = vpop.f32.mrb[28].mxu1 }
0x10a4   :  { %2751 = vrot.lane.b32.xlu0 %v2412_v40, %s7009_s19  ;;  %v6390_v41 = vpop.f32.mrb[29].mxu1 }
0x10a7   :  { %v2579_v42 = vpop.f32.mrb[30].mxu1 }
0x10a8   :  { %2755 = vrot.lane.b32.xlu1 %v2579_v42, %s7025_s30  ;;  %v6400_v43 = vpop.f32.mrb[31].mxu1 }
0x10ab   :  { %v2746_v44 = vpop.f32.mrb[32].mxu1 }
0x10ac   :  { %2759 = vrot.lane.b32.xlu1 %v2746_v44, %s8101_s16  ;;  %v6410_v45 = vpop.f32.mrb[33].mxu1 }
0x10ad   :  { %v5964_v45 = vld [vmem:[%s8077_s11 + $0x1] ss:$0 sm:$0xff] }
0x10dc   :  { %v2927_v52 = vpop.f32.mrb[34].mxu1 }
0x10dd   :  { %v6420_v53 = vpop.f32.mrb[35].mxu1 }
0x10e0   :  { %v3094_v54 = vpop.f32.mrb[36].mxu1 }
0x10e1   :  { %3433 = vrot.lane.b32.xlu0 %v3094_v54, %s7009_s19  ;;  %v6430_v55 = vpop.f32.mrb[37].mxu1  ;;  %v5921_v54 = vld [vmem:[%s8075_s9 + $0x40] sm:$0xff] }
0x10e2   :  { %v5922_v55 = vld [vmem:[%s8075_s9 + $0x48] sm:$0xff] }
0x10e4   :  { %v3261_v56 = vpop.f32.mrb[38].mxu1 }
0x10e5   :  { %3437 = vrot.lane.b32.xlu0 %v3261_v56, %s7025_s30  ;;  %v6440_v57 = vpop.f32.mrb[39].mxu1  ;;  %v6698_v56 = vpack.c.bf16 %v5922_v55, %v5921_v54 }
0x10e6   :  { %v5923_v57 = vld [vmem:[%s8075_s9 + $0x50] sm:$0xff] }
0x10e7   :  { %6699 = vmatprep.subr.bf16.mxu0 %v6698_v56 }
0x10e8   :  { %v3428_v58 = vpop.f32.mrb[40].mxu1 }
0x10e9   :  { %3441 = vrot.lane.b32.xlu1 %v3428_v58, %s8101_s16  ;;  %v6450_v59 = vpop.f32.mrb[41].mxu1  ;;  %v5924_v58 = vld [vmem:[%s8075_s9 + $0x58] sm:$0xff] }
0x10ea   :  { %v6702_v59 = vpack.c.bf16 %v5924_v58, %v5923_v57 }
0x1116   :  { %v2752_v60 = vpop.permute.xlu0 %2751 }
0x1117   :  { %v2762_v63 = vsel %vm215_vm2, %v2245_v39, %v2752_v60  ;;  %v5925_v60 = vld [vmem:[%s8075_s9 + $0x60] sm:$0xff] }
0x111a   :  { %v2756_v61 = vpop.permute.xlu1 %2755 }
0x111b   :  { %v2763_v0 = vsel %vm897_vm4, %v2762_v63, %v2756_v61  ;;  %v5926_v61 = vld [vmem:[%s8075_s9 + $0x68] sm:$0xff] }
0x111c   :  { %v6706_v63 = vpack.c.bf16 %v5926_v61, %v5925_v60 }
0x111e   :  { %v2760_v1 = vpop.permute.xlu1 %2759 }
0x111f   :  { %v2764_v2 = vsel %vm899_vm5, %v2763_v0, %v2760_v1  ;;  %v5927_v0 = vld [vmem:[%s8075_s9 + $0x70] sm:$0xff]  ;;  %v5928_v1 = vld [vmem:[%s8075_s9 + $0x78] sm:$0xff] }
0x1120   :  { %6459 = vmatprep.mubr.msk.f32.mxu0 %vm130_vm0, %v2764_v2  ;;  %v6710_v2 = vpack.c.bf16 %v5928_v1, %v5927_v0 }
0x1153   :  { %v3434_v3 = vpop.permute.xlu0 %3433 }
0x1154   :  { %v3444_v10 = vsel %vm215_vm2, %v2927_v52, %v3434_v3  ;;  %v5966_v3 = vld [vmem:[%s8074_s8 + $0x1] ss:$0 sm:$0xff] }
0x1157   :  { %v3438_v6 = vpop.permute.xlu0 %3437 }
0x1158   :  { %v3445_v12 = vsel %vm897_vm4, %v3444_v10, %v3438_v6 }
0x115b   :  { %v3442_v14 = vpop.permute.xlu1 %3441 }
0x115c   :  { %v3446_v15 = vsel %vm899_vm5, %v3445_v12, %v3442_v14 }
0x115d   :  { %6460 = vmatmul.mubr.msk.f32.vlgmr.msra.gmra.mrb[32].mxu0 %vm130_vm0, %v3446_v15 }
0x115e   :  { %6701 = vmatpush3.bf16.msra.mxu0 %v6698_v56 }
0x115f   :  { %6703 = vmatprep.subr.bf16.mxu0 %v6702_v59 }
0x1162   :  { %6705 = vmatpush3.bf16.msra.mxu0 %v6702_v59 }
0x1163   :  { %6707 = vmatprep.subr.bf16.mxu0 %v6706_v63 }
0x1166   :  { %6709 = vmatpush3.bf16.msra.mxu0 %v6706_v63  ;;  %v5972_v63 = vld [vmem:[%s8079_s13 + $0x1] ss:$0 sm:$0xff] }
0x1167   :  { %6711 = vmatprep.subr.bf16.mxu0 %v6710_v2 }
0x116a   :  { %6713 = vmatpush3.bf16.msra.mxu0 %v6710_v2 }
0x116b   :  { %6513 = vmatprep.subr.mxu0 %v7011_v8 }
0x1230   :  { %v6461_v16 = vpop.f32.mrb[32].mxu0 }
0x1231   :  { %v3531_v11 = vadd.f32 %v6461_v16, %v5961_v26  ;;  %v3525_v17 = vpop.f32.mrb[33].mxu0 }
0x1232   :  { %v3526_v4 = vadd.f32 %v5961_v26, %v3525_v17 }
0x1233   :  { %v3535_v20 = vadd.f32 %v3531_v11, %v7490_v19 }
0x1234   :  { %v3534_v13 = vadd.f32 %v3526_v4, %v7488_v18  ;;  %v5916_v18 = vld [vmem:[%s8073_s7 + $0x20] sm:$0xff] }
0x1235   :  { %v3539_v21 = vsel %vm130_vm0, %v3535_v20, 0.0  ;;  %v6690_v7 = vpack.c.bf16 %v5917_v36, %v5916_v18 }
0x1236   :  { %3540 = vadd.xlane.f32.xlu1 %v3539_v21  ;;  %v3536_v28 = vsel %vm130_vm0, %v3534_v13, 0.0 }
0x1237   :  { %3537 = vadd.xlane.f32.xlu0 %v3536_v28  ;;  %6691 = vmatprep.subr.bf16.mxu1 %v6690_v7 }
0x1238   :  { %6693 = vmatpush3.bf16.msra.mxu1 %v6690_v7 }
0x1239   :  { %6695 = vmatprep.subr.bf16.mxu1 %v6694_v38 }
0x123c   :  { %6697 = vmatpush3.bf16.msra.mxu1 %v6694_v38 }
0x12c3   :  { %v3541_v25 = vpop.xlane.xlu1 %3540 }
0x12c4   :  { %v3543_v29 = vmul.f32 0.03125, %v3541_v25  ;;  %v3538_v30 = vpop.xlane.xlu0 %3537 }
0x12c5   :  { %v3542_v31 = vmul.f32 0.03125, %v3538_v30 }
0x12c6   :  { %v3545_v32 = vsub.f32 %v3535_v20, %v3543_v29 }
0x12c7   :  { %v3544_v33 = vsub.f32 %v3534_v13, %v3542_v31 }
0x12c8   :  { %v3547_v35 = vmul.f32 %v3545_v32, %v3545_v32 }
0x12c9   :  { %v3546_v34 = vmul.f32 %v3544_v33, %v3544_v33 }
0x12ca   :  { %v3551_v19 = vsel %vm130_vm0, %v3547_v35, 0.0  ;;  %v5969_v35 = vld [vmem:[%s8076_s10 + $0x1] ss:$0 sm:$0xff] }
0x12cb   :  { %v3548_v9 = vsel %vm130_vm0, %v3546_v34, 0.0 }
0x12cc   :  { %3549 = vadd.xlane.f32.xlu0 %v3548_v9 }
0x12d0   :  { %3552 = vadd.xlane.f32.xlu0 %v3551_v19 }
0x1359   :  { %v3550_v39 = vpop.xlane.xlu0 %3549 }
0x135a   :  { %v3554_v27 = vmul.f32 0.03125, %v3550_v39 }
0x135c   :  { %v3556_v40 = vadd.f32 1e-05, %v3554_v27 }
0x135d   :  { %v3553_v41 = vpop.xlane.xlu0 %3552 }
0x135e   :  { %6852 = vrsqrt.f32 %v3556_v40  ;;  %v3555_v42 = vmul.f32 0.03125, %v3553_v41 }
0x1360   :  { %v3557_v43 = vadd.f32 1e-05, %v3555_v42 }
0x1362   :  { %6854 = vrsqrt.f32 %v3557_v43 }
0x1368   :  { %v6853_v44 = vpop.eup %6852 }
0x1369   :  { %v3560_v46 = vmul.f32 %v6853_v44, %v3544_v33 }
0x136b   :  { %v3568_v48 = vmul.f32 %v5964_v45, %v3560_v46 }
0x136c   :  { %v6855_v49 = vpop.eup %6854 }
0x136d   :  { %v3561_v50 = vmul.f32 %v6855_v49, %v3545_v32  ;;  %v3576_v51 = vadd.f32 %v5965_v47, %v3568_v48  ;;  %v5974_v49 = vld [vmem:[%s8069_s3 + $0x40] sm:$0xff] }
0x136f   :  { %v3569_v52 = vmul.f32 %v5964_v45, %v3561_v50  ;;  %6470 = vmatprep.mubr.msk.f32.mxu1 %vm130_vm0, %v3576_v51  ;;  %v5975_v50 = vld [vmem:[%s8069_s3 + $0x48] sm:$0xff] }
0x1371   :  { %v3577_v53 = vadd.f32 %v5965_v47, %v3569_v52  ;;  %v5976_v52 = vld [vmem:[%s8069_s3 + $0x50] sm:$0xff] }
0x1373   :  { %6471 = vmatmul.mubr.msk.f32.vlgmr.msra.gmra.mrb[42].mxu1 %vm130_vm0, %v3577_v53 }
0x1446   :  { %v6472_v6 = vpop.f32.mrb[42].mxu1 }
0x1447   :  { %v3662_v10 = vadd.f32 %v6472_v6, %v5966_v3  ;;  %v3656_v12 = vpop.f32.mrb[43].mxu1 }
0x1448   :  { %v3657_v14 = vadd.f32 %v5966_v3, %v3656_v12  ;;  %v5973_v3 = vld [vmem:[%s8080_s14 + $0x1] ss:$0 sm:$0xff] }
0x1449   :  { %v3666_v15 = vmul.f32 %v3662_v10, %v3662_v10 }
0x144a   :  { %v3665_v26 = vmul.f32 %v3657_v14, %v3657_v14 }
0x144b   :  { %v3668_v16 = vmul.f32 %v3666_v15, %v3662_v10  ;;  %v6002_v15 = vld [vmem:[%s8070_s4 + $0x2] ss:$0 sm:$0xff]  ;;  %s8103_s4 = smov 80  }
0x144c   :  { %v3667_v11 = vmul.f32 %v3665_v26, %v3657_v14 }
0x144d   :  { %v3670_v17 = vmul.f32 0.044715, %v3668_v16 }
0x144e   :  { %v3669_v4 = vmul.f32 0.044715, %v3667_v11 }
0x144f   :  { %v3672_v20 = vadd.f32 %v3670_v17, %v3662_v10 }
0x1450   :  { %v3671_v13 = vadd.f32 %v3669_v4, %v3657_v14 }
0x1451   :  { %v3674_v21 = vmul.f32 0.7978846, %v3672_v20 }
0x1452   :  { %v3673_v28 = vmul.f32 0.7978846, %v3671_v13 }
0x1453   :  { %6856 = vtanh.f32 %v3674_v21 }
0x1454   :  { %6858 = vtanh.f32 %v3673_v28 }
0x145d   :  { %v6857_v25 = vpop.eup %6856 }
0x145e   :  { %v6859_v29 = vpop.eup %6858  ;;  %v3678_v30 = vadd.f32 1.0, %v6857_v25 }
0x145f   :  { %v3677_v31 = vadd.f32 1.0, %v6859_v29 }
0x1460   :  { %v3680_v32 = vmul.f32 0.5, %v3678_v30 }
0x1461   :  { %v3679_v33 = vmul.f32 0.5, %v3677_v31 }
0x1462   :  { %v3682_v9 = vmul.f32 %v3680_v32, %v3662_v10 }
0x1463   :  { %v3681_v34 = vmul.f32 %v3679_v33, %v3657_v14 }
0x1465   :  { %6489 = vmatprep.mubr.msk.f32.mxu0 %vm1830_vm6, %v3681_v34 }
0x1466   :  { %6490 = vmatmul.mubr.msk.f32.vlgmr.msra.gmra.mrb[34].mxu0 %vm1830_vm6, %v3682_v9 }
0x1467   :  { %6515 = vmatprep.mubr.msk.f32.mxu0 %vm7012_vm1, %v7011_v8 }
0x1539   :  { %v6491_v19 = vpop.f32.mrb[34].mxu0 }
0x153a   :  { %v3767_v18 = vadd.f32 %v6491_v19, %v5969_v35  ;;  %v3761_v36 = vpop.f32.mrb[35].mxu0 }
0x153b   :  { %v3762_v7 = vadd.f32 %v5969_v35, %v3761_v36 }
0x153c   :  { %v3771_v5 = vadd.f32 %v3767_v18, %v3577_v53  ;;  %v5977_v53 = vld [vmem:[%s8069_s3 + $0x58] sm:$0xff]  ;;  %v7862_v18 = vld [vmem:[#allocation7] sm:$0x3] }
0x153d   :  { %v3770_v37 = vadd.f32 %v3762_v7, %v3576_v51  ;;  %v6714_v51 = vpack.c.bf16 %v5975_v50, %v5974_v49  ;;  %v6718_v54 = vpack.c.bf16 %v5977_v53, %v5976_v52  ;;  %vm94_vm7 = vcmp.gt.f32.partialorder %v7862_v18, 0.5 }
0x153e   :  { %v3775_v38 = vsel %vm130_vm0, %v3771_v5, 0.0  ;;  %v95_v36 = vsel %vm94_vm7, 0.0, %v7020_v24 }
0x153f   :  { %3776 = vadd.xlane.f32.xlu0 %v3775_v38  ;;  %v3772_v39 = vsel %vm130_vm0, %v3770_v37, 0.0  ;;  %6715 = vmatprep.subr.bf16.mxu1 %v6714_v51  ;;  %v4022_v7 = vrot.slane %v95_v36, %v293_v23  ;;  %v4708_v52 = vrot.slane %v95_v36, %v981_v62 }
0x1540   :  { %3773 = vadd.xlane.f32.xlu1 %v3772_v39  ;;  %6717 = vmatpush3.bf16.msra.mxu1 %v6714_v51 }
0x1541   :  { %6719 = vmatprep.subr.bf16.mxu1 %v6718_v54 }
0x1544   :  { %6721 = vmatpush3.bf16.msra.mxu1 %v6718_v54 }
0x1545   :  { %6503 = vmatprep.subr.mxu1 %v7011_v8 }
0x15cc   :  { %v3777_v27 = vpop.xlane.xlu0 %3776 }
0x15cd   :  { %v3779_v40 = vmul.f32 0.03125, %v3777_v27  ;;  %v3774_v41 = vpop.xlane.xlu1 %3773 }
0x15ce   :  { %v3778_v42 = vmul.f32 0.03125, %v3774_v41 }
0x15cf   :  { %v3781_v43 = vsub.f32 %v3771_v5, %v3779_v40 }
0x15d0   :  { %v3780_v44 = vsub.f32 %v3770_v37, %v3778_v42 }
0x15d1   :  { %v3783_v45 = vmul.f32 %v3781_v43, %v3781_v43 }
0x15d2   :  { %v3782_v46 = vmul.f32 %v3780_v44, %v3780_v44 }
0x15d3   :  { %v3787_v47 = vsel %vm130_vm0, %v3783_v45, 0.0 }
0x15d4   :  { %3788 = vadd.xlane.f32.xlu0 %v3787_v47  ;;  %v3784_v48 = vsel %vm130_vm0, %v3782_v46, 0.0 }
0x15d5   :  { %3785 = vadd.xlane.f32.xlu1 %v3784_v48 }
0x1661   :  { %v3789_v55 = vpop.xlane.xlu0 %3788 }
0x1662   :  { %v3791_v56 = vmul.f32 0.03125, %v3789_v55  ;;  %v3786_v57 = vpop.xlane.xlu1 %3785 }
0x1663   :  { %v3790_v58 = vmul.f32 0.03125, %v3786_v57 }
0x1664   :  { %v3793_v59 = vadd.f32 1e-05, %v3791_v56 }
0x1665   :  { %v3792_v60 = vadd.f32 1e-05, %v3790_v58 }
0x1666   :  { %6860 = vrsqrt.f32 %v3793_v59 }
0x1667   :  { %6862 = vrsqrt.f32 %v3792_v60 }
0x1670   :  { %v6861_v61 = vpop.eup %6860 }
0x1671   :  { %v6863_v0 = vpop.eup %6862  ;;  %v3797_v1 = vmul.f32 %v6861_v61, %v3781_v43 }
0x1672   :  { %v3796_v2 = vmul.f32 %v6863_v0, %v3780_v44 }
0x1673   :  { %v3805_v6 = vmul.f32 %v5972_v63, %v3797_v1 }
0x1674   :  { %v3804_v10 = vmul.f32 %v5972_v63, %v3796_v2 }
0x1675   :  { %v7775_v14 = vadd.f32 %v5973_v3, %v3805_v6 }
0x1676   :  { %v7773_v12 = vadd.f32 %v5973_v3, %v3804_v10 }
0x1678   :  { %6500 = vmatprep.mubr.msk.f32.mxu1 %vm130_vm0, %v7773_v12 }
0x1679   :  { %6501 = vmatmul.mubr.msk.f32.vlgmr.msra.gmra.mrb[44].mxu1 %vm130_vm0, %v7775_v14 }
0x167a   :  { %6505 = vmatprep.mubr.msk.f32.mxu1 %vm7012_vm1, %v7011_v8 }
0x174c   :  { %v6502_v26 = vpop.f32.mrb[44].mxu1 }
0x174d   :  { %v3932_v16 = vpop.f32.mrb[45].mxu1  ;;  %v7800_v17 = vadd.f32 %v6502_v26, %v6002_v15 }
0x174e   :  { %v7786_v11 = vadd.f32 %v6002_v15, %v3932_v16 }
0x1750   :  { %4113 = vrot.lane.b32.xlu0 %v7786_v11, %s7015_s23  ;;  %3942 = vrot.lane.b32.xlu1 %v7786_v11, %s7014_s22 }
0x1754   :  { %4278 = vrot.lane.b32.xlu0 %v7786_v11, %s7018_s0  ;;  %4111 = vrot.lane.b32.xlu1 %v7786_v11, %s7016_s24 }
0x1758   :  { %4445 = vrot.lane.b32.xlu0 %v7786_v11, %s8102_s18  ;;  %4280 = vrot.lane.b32.xlu1 %v7786_v11, %s8103_s4 }
0x175c   :  { %4799 = vrot.lane.b32.xlu0 %v7800_v17, %s7015_s23  ;;  %4447 = vrot.lane.b32.xlu1 %v7786_v11, %s8104_s20 }
0x1760   :  { %4966 = vrot.lane.b32.xlu0 %v7800_v17, %s8103_s4  ;;  %4628 = vrot.lane.b32.xlu1 %v7800_v17, %s7014_s22 }
0x1764   :  { %5133 = vrot.lane.b32.xlu0 %v7800_v17, %s8104_s20  ;;  %4797 = vrot.lane.b32.xlu1 %v7800_v17, %s7016_s24 }
0x1768   :  { %4035 = vrot.lane.b32.xlu0 %v7786_v11, %s8105_s25  ;;  %4964 = vrot.lane.b32.xlu1 %v7800_v17, %s7018_s0 }
0x176c   :  { %5131 = vrot.lane.b32.xlu1 %v7800_v17, %s8102_s18 }
0x1770   :  { %4202 = vrot.lane.b32.xlu1 %v7786_v11, %s8098_s1 }
0x17c2   :  { %v4114_v4 = vpop.permute.xlu0 %4113  ;;  %v3943_v20 = vpop.permute.xlu1 %3942 }
0x17c3   :  { %6504 = vmatpush3.xpose.msk.msra.mxu1 %vm215_vm2, %v3943_v20  ;;  %6514 = vmatpush3.xpose.msk.msra.mxu0 %vm215_vm2, %v4114_v4 }
0x17c4   :  { %6523 = vmatprep.subr.mxu0 %v7011_v8  ;;  %6508 = vmatprep.subr.mxu1 %v7011_v8 }
0x17c6   :  { %v4279_v13 = vpop.permute.xlu0 %4278  ;;  %6506 = vmatmul.mubr.msk.f32.vlgmr.msra.gmra.mrb[46].mxu1 %vm215_vm2, %v7786_v11  ;;  %v4112_v21 = vpop.permute.xlu1 %4111 }
0x17c7   :  { %6516 = vmatmul.mubr.msk.f32.vlgmr.msra.gmra.mrb[36].mxu0 %vm215_vm2, %v4112_v21  ;;  %6510 = vmatprep.mubr.msk.f32.mxu1 %vm7012_vm1, %v7011_v8 }
0x17c8   :  { %6525 = vmatprep.mubr.msk.f32.mxu0 %vm7012_vm1, %v7011_v8 }
0x17ca   :  { %v4446_v28 = vpop.permute.xlu0 %4445  ;;  %v4281_v25 = vpop.permute.xlu1 %4280 }
0x17cb   :  { %6524 = vmatpush3.xpose.msk.msra.mxu0 %vm215_vm2, %v4281_v25 }
0x17cc   :  { %6533 = vmatprep.subr.mxu0 %v7011_v8 }
0x17ce   :  { %v4800_v29 = vpop.permute.xlu0 %4799  ;;  %6526 = vmatmul.mubr.msk.f32.vlgmr.msra.gmra.mrb[38].mxu0 %vm215_vm2, %v4279_v13  ;;  %v4448_v30 = vpop.permute.xlu1 %4447 }
0x17cf   :  { %6534 = vmatpush3.xpose.msk.msra.mxu0 %vm215_vm2, %v4448_v30  ;;  %6535 = vmatprep.mubr.msk.f32.mxu0 %vm7012_vm1, %v7011_v8 }
0x17d0   :  { %6543 = vmatprep.subr.mxu0 %v7011_v8 }
0x17d2   :  { %v4967_v31 = vpop.permute.xlu0 %4966  ;;  %6536 = vmatmul.mubr.msk.f32.vlgmr.msra.gmra.mrb[40].mxu0 %vm215_vm2, %v4446_v28  ;;  %v4629_v32 = vpop.permute.xlu1 %4628 }
0x17d3   :  { %6544 = vmatpush3.xpose.msk.msra.mxu0 %vm215_vm2, %v4629_v32  ;;  %6545 = vmatprep.mubr.msk.f32.mxu0 %vm7012_vm1, %v7011_v8 }
0x17d4   :  { %6553 = vmatprep.subr.mxu0 %v7011_v8 }
0x17d6   :  { %v5134_v33 = vpop.permute.xlu0 %5133  ;;  %6546 = vmatmul.mubr.msk.f32.vlgmr.msra.gmra.mrb[42].mxu0 %vm215_vm2, %v7800_v17  ;;  %v4798_v34 = vpop.permute.xlu1 %4797 }
0x17d7   :  { %6554 = vmatpush3.xpose.msk.msra.mxu0 %vm215_vm2, %v4800_v29  ;;  %6555 = vmatprep.mubr.msk.f32.mxu0 %vm7012_vm1, %v7011_v8 }
0x17d8   :  { %6563 = vmatprep.subr.mxu0 %v7011_v8 }
0x17da   :  { %v4036_v9 = vpop.permute.xlu0 %4035  ;;  %6556 = vmatmul.mubr.msk.f32.vlgmr.msra.gmra.mrb[44].mxu0 %vm215_vm2, %v4798_v34  ;;  %v4965_v35 = vpop.permute.xlu1 %4964 }
0x17db   :  { %6509 = vmatpush3.msra.mxu1 %v4036_v9  ;;  %6564 = vmatpush3.xpose.msk.msra.mxu0 %vm215_vm2, %v4967_v31 }
0x17dc   :  { %6565 = vmatprep.mubr.msk.f32.mxu0 %vm7012_vm1, %v7011_v8  ;;  %6573 = vmatprep.subr.mxu0 %v7011_v8 }
0x17dd   :  { %6518 = vmatprep.subr.mxu1 %v7011_v8 }
0x17de   :  { %6566 = vmatmul.mubr.msk.f32.vlgmr.msra.gmra.mrb[46].mxu0 %vm215_vm2, %v4965_v35  ;;  %v5132_v19 = vpop.permute.xlu1 %5131 }
0x17df   :  { %6574 = vmatpush3.xpose.msk.msra.mxu0 %vm215_vm2, %v5134_v33  ;;  %6575 = vmatprep.mubr.msk.f32.mxu0 %vm7012_vm1, %v7011_v8 }
0x17e2   :  { %6576 = vmatmul.mubr.msk.f32.vlgmr.msra.gmra.mrb[48].mxu0 %vm215_vm2, %v5132_v19  ;;  %v7882_v4 = vpop.permute.xlu1 %4202 }
0x1899   :  { %v4014_v5 = vpop.f32.mrb[46].mxu1 }
0x189a   :  { %v4018_v37 = vmul.f32 0.35355338, %v4014_v5  ;;  %v6507_v38 = vpop.f32.mrb[47].mxu1  ;;  %v4185_v39 = vpop.f32.mrb[36].mxu0 }
0x189b   :  { %v4189_v27 = vmul.f32 0.35355338, %v4185_v39  ;;  %v6517_v40 = vpop.f32.mrb[37].mxu0 }
0x189c   :  { %v4023_v41 = vadd.f32 %v4022_v7, %v4018_v37 }
0x189d   :  { %v4190_v42 = vadd.f32 %v4189_v27, %v4022_v7 }
0x189e   :  { %v4024_v43 = vsel %vm215_vm2, %v4023_v41, -inf }
0x189f   :  { %4025 = vmax.xlane.f32.xlu0 %v4024_v43  ;;  %v4191_v44 = vsel %vm215_vm2, %v4190_v42, -inf }
0x18a0   :  { %4192 = vmax.xlane.f32.xlu1 %v4191_v44 }
0x18a1   :  { %v4352_v45 = vpop.f32.mrb[38].mxu0 }
0x18a2   :  { %v4356_v46 = vmul.f32 0.35355338, %v4352_v45  ;;  %v6527_v24 = vpop.f32.mrb[39].mxu0 }
0x18a4   :  { %v4357_v47 = vadd.f32 %v4356_v46, %v4022_v7 }
0x18a5   :  { %v4519_v48 = vpop.f32.mrb[40].mxu0 }
0x18a6   :  { %v4523_v23 = vmul.f32 0.35355338, %v4519_v48  ;;  %v6537_v49 = vpop.f32.mrb[41].mxu0  ;;  %v4358_v50 = vsel %vm215_vm2, %v4357_v47, -inf }
0x18a7   :  { %4359 = vmax.xlane.f32.xlu0 %v4358_v50 }
0x18a8   :  { %v4524_v51 = vadd.f32 %v4523_v23, %v4022_v7 }
0x18a9   :  { %v4700_v53 = vpop.f32.mrb[42].mxu0 }
0x18aa   :  { %v4704_v54 = vmul.f32 0.35355338, %v4700_v53  ;;  %v6547_v55 = vpop.f32.mrb[43].mxu0  ;;  %v4525_v56 = vsel %vm215_vm2, %v4524_v51, -inf }
0x18ab   :  { %4526 = vmax.xlane.f32.xlu0 %v4525_v56 }
0x18ac   :  { %v4709_v57 = vadd.f32 %v4708_v52, %v4704_v54 }
0x18ad   :  { %v4871_v58 = vpop.f32.mrb[44].mxu0 }
0x18ae   :  { %v4875_v59 = vmul.f32 0.35355338, %v4871_v58  ;;  %v6557_v60 = vpop.f32.mrb[45].mxu0  ;;  %v4710_v61 = vsel %vm215_vm2, %v4709_v57, -inf }
0x18af   :  { %4711 = vmax.xlane.f32.xlu1 %v4710_v61 }
0x18b0   :  { %v4876_v63 = vadd.f32 %v4875_v59, %v4708_v52 }
0x18b1   :  { %v5038_v0 = vpop.f32.mrb[46].mxu0 }
0x18b2   :  { %v5042_v1 = vmul.f32 0.35355338, %v5038_v0  ;;  %v6567_v2 = vpop.f32.mrb[47].mxu0  ;;  %v4877_v22 = vsel %vm215_vm2, %v4876_v63, -inf }
0x18b3   :  { %4878 = vmax.xlane.f32.xlu0 %v4877_v22 }
0x18b4   :  { %v5043_v62 = vadd.f32 %v5042_v1, %v4708_v52 }
0x18b5   :  { %v5205_v3 = vpop.f32.mrb[48].mxu0 }
0x18b6   :  { %v5209_v6 = vmul.f32 0.35355338, %v5205_v3  ;;  %v6577_v10 = vpop.f32.mrb[49].mxu0  ;;  %v5044_v15 = vsel %vm215_vm2, %v5043_v62, -inf }
0x18b7   :  { %5045 = vmax.xlane.f32.xlu1 %v5044_v15 }
0x18b8   :  { %v5210_v26 = vadd.f32 %v5209_v6, %v4708_v52 }
0x18ba   :  { %v5211_v16 = vsel %vm215_vm2, %v5210_v26, -inf }
0x18bb   :  { %5212 = vmax.xlane.f32.xlu0 %v5211_v16 }
0x18c8   :  { %4536 = vrot.lane.b32.xlu1 %v7786_v11, %s8099_s27 }
0x18d1   :  { %4369 = vrot.lane.b32.xlu0 %v7786_v11, %s8100_s28 }
0x192c   :  { %v4026_v20 = vpop.xlane.xlu0 %4025 }
0x192d   :  { %v4027_v13 = vsub.f32 %v4023_v41, %v4026_v20  ;;  %v4193_v21 = vpop.xlane.xlu1 %4192 }
0x192e   :  { %v4194_v28 = vsub.f32 %v4190_v42, %v4193_v21 }
0x192f   :  { %v4028_v25 = vmul.f32 1.442695, %v4027_v13 }
0x1930   :  { %v4195_v29 = vmul.f32 1.442695, %v4194_v28 }
0x1931   :  { %6864 = vpow2.f32 %v4028_v25 }
0x1932   :  { %6866 = vpow2.f32 %v4195_v29 }
0x1934   :  { %v4360_v30 = vpop.xlane.xlu0 %4359 }
0x1935   :  { %v4361_v31 = vsub.f32 %v4357_v47, %v4360_v30 }
0x1937   :  { %v4362_v32 = vmul.f32 1.442695, %v4361_v31 }
0x1938   :  { %v4527_v33 = vpop.xlane.xlu0 %4526 }
0x1939   :  { %6868 = vpow2.f32 %v4362_v32  ;;  %v4528_v34 = vsub.f32 %v4524_v51, %v4527_v33 }
0x193b   :  { %v6865_v9 = vpop.eup %6864  ;;  %v4529_v35 = vmul.f32 1.442695, %v4528_v34 }
0x193c   :  { %v6867_v19 = vpop.eup %6866  ;;  %v4030_v11 = vsel %vm215_vm2, %v6865_v9, 0.0  ;;  %v4712_v39 = vpop.xlane.xlu1 %4711 }
0x193d   :  { %6870 = vpow2.f32 %v4529_v35  ;;  %4031 = vadd.xlane.f32.xlu1 %v4030_v11  ;;  %v4197_v36 = vsel %vm215_vm2, %v6867_v19, 0.0  ;;  %v4713_v27 = vsub.f32 %v4709_v57, %v4712_v39 }
0x193e   :  { %4198 = vadd.xlane.f32.xlu0 %v4197_v36 }
0x193f   :  { %v4714_v43 = vmul.f32 1.442695, %v4713_v27  ;;  %v5981_v27 = vld [vmem:[%s8071_s5 + $0x50] sm:$0xff] }
0x1940   :  { %v4879_v40 = vpop.xlane.xlu0 %4878 }
0x1941   :  { %v4880_v42 = vsub.f32 %v4876_v63, %v4879_v40  ;;  %6872 = vpow2.f32 %v4714_v43  ;;  %v5982_v40 = vld [vmem:[%s8071_s5 + $0x58] sm:$0xff] }
0x1943   :  { %v6869_v7 = vpop.eup %6868  ;;  %v4881_v46 = vmul.f32 1.442695, %v4880_v42 }
0x1944   :  { %v4364_v5 = vsel %vm215_vm2, %v6869_v7, 0.0  ;;  %v5046_v41 = vpop.xlane.xlu1 %5045 }
0x1945   :  { %4365 = vadd.xlane.f32.xlu1 %v4364_v5  ;;  %v5047_v44 = vsub.f32 %v5043_v62, %v5046_v41  ;;  %6874 = vpow2.f32 %v4881_v46  ;;  %v6726_v41 = vpack.c.bf16 %v5982_v40, %v5981_v27 }
0x1947   :  { %v7887_v37 = vpop.eup %6870  ;;  %v5048_v24 = vmul.f32 1.442695, %v5047_v44 }
0x1948   :  { %v4531_v38 = vsel %vm215_vm2, %v7887_v37, 0.0  ;;  %v5213_v45 = vpop.xlane.xlu0 %5212  ;;  %v4537_v56 = vpop.permute.xlu1 %4536 }
0x1949   :  { %4532 = vadd.xlane.f32.xlu0 %v4531_v38  ;;  %v5214_v47 = vsub.f32 %v5210_v26, %v5213_v45  ;;  %6876 = vpow2.f32 %v5048_v24  ;;  %v5980_v38 = vld [vmem:[%s8071_s5 + $0x48] sm:$0xff] }
0x194b   :  { %v5215_v48 = vmul.f32 1.442695, %v5214_v47  ;;  %v6873_v23 = vpop.eup %6872 }
0x194c   :  { %v4716_v50 = vsel %vm215_vm2, %v6873_v23, 0.0  ;;  %v4370_v57 = vpop.permute.xlu0 %4369 }
0x194d   :  { %6878 = vpow2.f32 %v5215_v48 }
0x194f   :  { %v7895_v49 = vpop.eup %6874 }
0x1950   :  { %v4883_v52 = vsel %vm215_vm2, %v7895_v49, 0.0 }
0x1953   :  { %v7898_v51 = vpop.eup %6876 }
0x1954   :  { %v5050_v53 = vsel %vm215_vm2, %v7898_v51, 0.0 }
0x1956   :  { %4888 = vrot.lane.b32.xlu1 %v7800_v17, %s8098_s1 }
0x1957   :  { %v7904_v54 = vpop.eup %6878 }
0x1958   :  { %v5217_v55 = vsel %vm215_vm2, %v7904_v54, 0.0 }
0x195f   :  { %4721 = vrot.lane.b32.xlu0 %v7800_v17, %s8105_s25 }
0x197a   :  { %4717 = vadd.xlane.f32.xlu1 %v4716_v50 }
0x197e   :  { %4884 = vadd.xlane.f32.xlu0 %v4883_v52  ;;  %5051 = vadd.xlane.f32.xlu1 %v5050_v53 }
0x1982   :  { %5218 = vadd.xlane.f32.xlu1 %v5217_v55 }
0x1993   :  { %5222 = vrot.lane.b32.xlu1 %v7800_v17, %s8099_s27 }
0x1994   :  { %5055 = vrot.lane.b32.xlu0 %v7800_v17, %s8100_s28 }
0x19ca   :  { %v4032_v58 = vpop.xlane.xlu1 %4031 }
0x19cb   :  { %6880 = vrcp.f32 %v4032_v58  ;;  %v4199_v59 = vpop.xlane.xlu0 %4198 }
0x19cc   :  { %6882 = vrcp.f32 %v4199_v59 }
0x19d2   :  { %v4366_v60 = vpop.xlane.xlu1 %4365 }
0x19d3   :  { %6884 = vrcp.f32 %v4366_v60  ;;  %v6029_v60 = vld [vmem:[%s8072_s6 + $0x2] ss:$0 sm:$0xff] }
0x19d5   :  { %v6881_v61 = vpop.eup %6880 }
0x19d6   :  { %v4034_v63 = vmul.f32 %v6881_v61, %v6865_v9  ;;  %v4533_v0 = vpop.xlane.xlu0 %4532  ;;  %v6883_v1 = vpop.eup %6882 }
0x19d7   :  { %6886 = vrcp.f32 %v4533_v0  ;;  %v4201_v17 = vmul.f32 %v6883_v1, %v6867_v19  ;;  %v4889_v10 = vpop.permute.xlu1 %4888 }
0x19d8   :  { %6511 = vmatmul.mubr.msk.f32.vlgmr.msra.gmra.mrb[48].mxu1 %vm215_vm2, %v4034_v63 }
0x19d9   :  { %6519 = vmatpush3.msra.mxu1 %v7882_v4  ;;  %6520 = vmatprep.mubr.msk.f32.mxu1 %vm7012_vm1, %v7011_v8 }
0x19da   :  { %6528 = vmatprep.subr.mxu1 %v7011_v8  ;;  %v4722_v6 = vpop.permute.xlu0 %4721 }
0x19dc   :  { %6521 = vmatmul.mubr.msk.f32.vlgmr.msra.gmra.mrb[50].mxu1 %vm215_vm2, %v4201_v17 }
0x19dd   :  { %v6885_v2 = vpop.eup %6884  ;;  %6529 = vmatpush3.msra.mxu1 %v4370_v57  ;;  %6530 = vmatprep.mubr.msk.f32.mxu1 %vm7012_vm1, %v7011_v8 }
0x19de   :  { %v4368_v22 = vmul.f32 %v6885_v2, %v6869_v7  ;;  %6538 = vmatprep.subr.mxu1 %v7011_v8 }
0x19e0   :  { %6531 = vmatmul.mubr.msk.f32.vlgmr.msra.gmra.mrb[52].mxu1 %vm215_vm2, %v4368_v22 }
0x19e1   :  { %v6887_v62 = vpop.eup %6886  ;;  %6539 = vmatpush3.msra.mxu1 %v4537_v56  ;;  %6540 = vmatprep.mubr.msk.f32.mxu1 %vm7012_vm1, %v7011_v8 }
0x19e2   :  { %v4535_v3 = vmul.f32 %v6887_v62, %v7887_v37  ;;  %6548 = vmatprep.subr.mxu1 %v7011_v8  ;;  %v5979_v37 = vld [vmem:[%s8071_s5 + $0x40] sm:$0xff] }
0x19e3   :  { %v6722_v39 = vpack.c.bf16 %v5980_v38, %v5979_v37 }
0x19e4   :  { %6541 = vmatmul.mubr.msk.f32.vlgmr.msra.gmra.mrb[54].mxu1 %vm215_vm2, %v4535_v3 }
0x19e5   :  { %6549 = vmatpush3.msra.mxu1 %v4722_v6  ;;  %6550 = vmatprep.mubr.msk.f32.mxu1 %vm7012_vm1, %v7011_v8 }
0x19e6   :  { %6558 = vmatprep.subr.mxu1 %v7011_v8  ;;  %6723 = vmatprep.subr.bf16.mxu0 %v6722_v39 }
0x19e7   :  { %6725 = vmatpush3.bf16.msra.mxu0 %v6722_v39 }
0x19e8   :  { %6727 = vmatprep.subr.bf16.mxu0 %v6726_v41 }
0x19eb   :  { %6729 = vmatpush3.bf16.msra.mxu0 %v6726_v41  ;;  %v5989_v41 = vld [vmem:[%s8075_s9 + $0x80] sm:$0xff] }
0x1a07   :  { %v4718_v15 = vpop.xlane.xlu1 %4717 }
0x1a08   :  { %6888 = vrcp.f32 %v4718_v15 }
0x1a0b   :  { %v4885_v26 = vpop.xlane.xlu0 %4884  ;;  %v5052_v16 = vpop.xlane.xlu1 %5051 }
0x1a0c   :  { %6890 = vrcp.f32 %v4885_v26 }
0x1a0d   :  { %6892 = vrcp.f32 %v5052_v16 }
0x1a0f   :  { %v5219_v4 = vpop.xlane.xlu1 %5218  ;;  %v5056_v29 = vpop.permute.xlu0 %5055 }
0x1a10   :  { %6894 = vrcp.f32 %v5219_v4 }
0x1a12   :  { %v6889_v20 = vpop.eup %6888 }
0x1a13   :  { %v4720_v13 = vmul.f32 %v6889_v20, %v6873_v23  ;;  %v5223_v32 = vpop.permute.xlu1 %5222 }
0x1a15   :  { %6551 = vmatmul.mubr.msk.f32.vlgmr.msra.gmra.mrb[56].mxu1 %vm215_vm2, %v4720_v13 }
0x1a16   :  { %v6891_v21 = vpop.eup %6890  ;;  %6559 = vmatpush3.msra.mxu1 %v4889_v10  ;;  %6560 = vmatprep.mubr.msk.f32.mxu1 %vm7012_vm1, %v7011_v8 }
0x1a17   :  { %v4887_v28 = vmul.f32 %v6891_v21, %v7895_v49  ;;  %6568 = vmatprep.subr.mxu1 %v7011_v8  ;;  %v6893_v25 = vpop.eup %6892  ;;  %v5985_v21 = vld [vmem:[%s8073_s7 + $0x48] sm:$0xff] }
0x1a18   :  { %v5054_v30 = vmul.f32 %v6893_v25, %v7898_v51  ;;  %v5986_v25 = vld [vmem:[%s8073_s7 + $0x50] sm:$0xff] }
0x1a19   :  { %6561 = vmatmul.mubr.msk.f32.vlgmr.msra.gmra.mrb[58].mxu1 %vm215_vm2, %v4887_v28 }
0x1a1a   :  { %6569 = vmatpush3.msra.mxu1 %v5056_v29  ;;  %6570 = vmatprep.mubr.msk.f32.mxu1 %vm7012_vm1, %v7011_v8  ;;  %v6895_v31 = vpop.eup %6894  ;;  %v5987_v29 = vld [vmem:[%s8073_s7 + $0x58] sm:$0xff] }
0x1a1b   :  { %6578 = vmatprep.subr.mxu1 %v7011_v8  ;;  %v5221_v33 = vmul.f32 %v6895_v31, %v7904_v54 }
0x1a1d   :  { %6571 = vmatmul.mubr.msk.f32.vlgmr.msra.gmra.mrb[60].mxu1 %vm215_vm2, %v5054_v30  ;;  %v6734_v30 = vpack.c.bf16 %v5987_v29, %v5986_v25 }
0x1a1e   :  { %6579 = vmatpush3.msra.mxu1 %v5223_v32  ;;  %6580 = vmatprep.mubr.msk.f32.mxu1 %vm7012_vm1, %v7011_v8 }
0x1a21   :  { %6581 = vmatmul.mubr.msk.f32.vlgmr.msra.gmra.mrb[62].mxu1 %vm215_vm2, %v5221_v33 }
0x1aab   :  { %v4107_v34 = vpop.f32.mrb[48].mxu1 }
0x1aac   :  { %v6512_v9 = vpop.f32.mrb[49].mxu1 }
0x1aaf   :  { %v4274_v35 = vpop.f32.mrb[50].mxu1 }
0x1ab0   :  { %4613 = vrot.lane.b32.xlu0 %v4274_v35, %s7009_s19  ;;  %v6522_v19 = vpop.f32.mrb[51].mxu1 }
0x1ab3   :  { %v4441_v11 = vpop.f32.mrb[52].mxu1 }
0x1ab4   :  { %4617 = vrot.lane.b32.xlu1 %v4441_v11, %s7025_s30  ;;  %v6532_v36 = vpop.f32.mrb[53].mxu1  ;;  %v6032_v11 = vld [vmem:[%s8077_s11 + $0x2] ss:$0 sm:$0xff] }
0x1ab7   :  { %v4608_v7 = vpop.f32.mrb[54].mxu1 }
0x1ab8   :  { %4621 = vrot.lane.b32.xlu1 %v4608_v7, %s8101_s16  ;;  %v6542_v5 = vpop.f32.mrb[55].mxu1  ;;  %v6033_v7 = vld [vmem:[%s8078_s12 + $0x2] ss:$0 sm:$0xff] }
0x1ae8   :  { %v4793_v42 = vpop.f32.mrb[56].mxu1 }
0x1ae9   :  { %v6552_v43 = vpop.f32.mrb[57].mxu1 }
0x1aec   :  { %v4960_v44 = vpop.f32.mrb[58].mxu1 }
0x1aed   :  { %5299 = vrot.lane.b32.xlu0 %v4960_v44, %s7009_s19  ;;  %v6562_v45 = vpop.f32.mrb[59].mxu1  ;;  %v5991_v44 = vld [vmem:[%s8075_s9 + $0x90] sm:$0xff] }
0x1aee   :  { %v5992_v45 = vld [vmem:[%s8075_s9 + $0x98] sm:$0xff] }
0x1af0   :  { %v5127_v46 = vpop.f32.mrb[60].mxu1 }
0x1af1   :  { %5303 = vrot.lane.b32.xlu0 %v5127_v46, %s7025_s30  ;;  %v6572_v24 = vpop.f32.mrb[61].mxu1  ;;  %v6742_v46 = vpack.c.bf16 %v5992_v45, %v5991_v44 }
0x1af2   :  { %v5993_v24 = vld [vmem:[%s8075_s9 + $0xa0] sm:$0xff] }
0x1af4   :  { %v5294_v47 = vpop.f32.mrb[62].mxu1 }
0x1af5   :  { %5307 = vrot.lane.b32.xlu1 %v5294_v47, %s8101_s16  ;;  %v6582_v48 = vpop.f32.mrb[63].mxu1  ;;  %v5994_v47 = vld [vmem:[%s8075_s9 + $0xa8] sm:$0xff] }
0x1af6   :  { %v6746_v48 = vpack.c.bf16 %v5994_v47, %v5993_v24 }
0x1b22   :  { %v4614_v23 = vpop.permute.xlu0 %4613 }
0x1b23   :  { %v4624_v50 = vsel %vm215_vm2, %v4107_v34, %v4614_v23  ;;  %v5995_v23 = vld [vmem:[%s8075_s9 + $0xb0] sm:$0xff] }
0x1b26   :  { %v4618_v49 = vpop.permute.xlu1 %4617 }
0x1b27   :  { %v4625_v51 = vsel %vm897_vm4, %v4624_v50, %v4618_v49  ;;  %v5996_v49 = vld [vmem:[%s8075_s9 + $0xb8] sm:$0xff] }
0x1b28   :  { %v6750_v50 = vpack.c.bf16 %v5996_v49, %v5995_v23  ;;  %v5760_v49 = vrot.slane %v7862_v18, 1 }
0x1b2a   :  { %v4622_v52 = vpop.permute.xlu1 %4621 }
0x1b2b   :  { %v4626_v53 = vsel %vm899_vm5, %v4625_v51, %v4622_v52  ;;  %v6034_v51 = vld [vmem:[%s8074_s8 + $0x2] ss:$0 sm:$0xff] }
0x1b2c   :  { %6591 = vmatprep.mubr.msk.f32.mxu0 %vm130_vm0, %v4626_v53 }
0x1b5f   :  { %v5300_v54 = vpop.permute.xlu0 %5299 }
0x1b60   :  { %v5310_v56 = vsel %vm215_vm2, %v4793_v42, %v5300_v54  ;;  %v5990_v42 = vld [vmem:[%s8075_s9 + $0x88] sm:$0xff] }
0x1b61   :  { %v6738_v43 = vpack.c.bf16 %v5990_v42, %v5989_v41 }
0x1b63   :  { %v5304_v55 = vpop.permute.xlu0 %5303  ;;  %6739 = vmatprep.subr.bf16.mxu0 %v6738_v43 }
0x1b64   :  { %v5311_v57 = vsel %vm897_vm4, %v5310_v56, %v5304_v55 }
0x1b67   :  { %v5308_v58 = vpop.permute.xlu1 %5307 }
0x1b68   :  { %v5312_v59 = vsel %vm899_vm5, %v5311_v57, %v5308_v58 }
0x1b69   :  { %6592 = vmatmul.mubr.msk.f32.vlgmr.msra.gmra.mrb[50].mxu0 %vm130_vm0, %v5312_v59 }
0x1b6a   :  { %6741 = vmatpush3.bf16.msra.mxu0 %v6738_v43  ;;  %v6040_v43 = vld [vmem:[%s8079_s13 + $0x2] ss:$0 sm:$0xff]  ;;  %s7027_s13 = smov [#allocation8]  }
0x1b6b   :  { %6743 = vmatprep.subr.bf16.mxu0 %v6742_v46 }
0x1b6e   :  { %6745 = vmatpush3.bf16.msra.mxu0 %v6742_v46  ;;  %v6041_v46 = vld [vmem:[%s8080_s14 + $0x2] ss:$0 sm:$0xff]  ;;  %s5856_s14 = sshll.u32 %s7027_s13, 4  ;;  %s5857_s14 = int_to_ptr.vmem [resolvable:$true] %s5856_s14 }
0x1b6f   :  { %6747 = vmatprep.subr.bf16.mxu0 %v6746_v48  ;;  %s6978_s18 = scalar_lea.vmem %s5857_s14, 32  ;;  %p6983_p11 = scmp.lt.s32.totalorder %s5857_s14, %s5857_s14 }
0x1b70   :  { %p6979_p10 = scmp.ne.s32.totalorder %s5857_s14, %s6978_s18  ;;  %p6984_p12 = scmp.lt.s32.totalorder %s6978_s18, %s6978_s18 }
0x1b72   :  { %6749 = vmatpush3.bf16.msra.mxu0 %v6746_v48  ;;  %p6985_p13 = por %p6984_p12, %p6983_p11 }
0x1b73   :  { %6751 = vmatprep.subr.bf16.mxu0 %v6750_v50 }
0x1b74   :  { %p6986_p0 = pnand %p6985_p13, %p6979_p10 }
0x1b76   :  { %6753 = vmatpush3.bf16.msra.mxu0 %v6750_v50 }
0x1c3c   :  { %v6593_v61 = vpop.f32.mrb[50].mxu0 }
0x1c3d   :  { %v5397_v63 = vadd.f32 %v6593_v61, %v6029_v60  ;;  %v5391_v0 = vpop.f32.mrb[51].mxu0 }
0x1c3e   :  { %v5392_v1 = vadd.f32 %v6029_v60, %v5391_v0 }
0x1c3f   :  { %v5401_v17 = vadd.f32 %v5397_v63, %v7775_v14 }
0x1c40   :  { %v5400_v2 = vadd.f32 %v5392_v1, %v7773_v12  ;;  %v5984_v12 = vld [vmem:[%s8073_s7 + $0x40] sm:$0xff] }
0x1c41   :  { %v5405_v22 = vsel %vm130_vm0, %v5401_v17, 0.0  ;;  %v6730_v28 = vpack.c.bf16 %v5985_v21, %v5984_v12 }
0x1c42   :  { %5406 = vadd.xlane.f32.xlu1 %v5405_v22  ;;  %v5402_v62 = vsel %vm130_vm0, %v5400_v2, 0.0 }
0x1c43   :  { %5403 = vadd.xlane.f32.xlu0 %v5402_v62  ;;  %6731 = vmatprep.subr.bf16.mxu1 %v6730_v28 }
0x1c44   :  { %6733 = vmatpush3.bf16.msra.mxu1 %v6730_v28 }
0x1c45   :  { %6735 = vmatprep.subr.bf16.mxu1 %v6734_v30 }
0x1c48   :  { %6737 = vmatpush3.bf16.msra.mxu1 %v6734_v30 }
0x1c49   :  { %6624 = vmatprep.subr.mxu1 %v7011_v8 }
0x1ccf   :  { %v5407_v3 = vpop.xlane.xlu1 %5406 }
0x1cd0   :  { %v5409_v6 = vmul.f32 0.03125, %v5407_v3  ;;  %v5404_v10 = vpop.xlane.xlu0 %5403 }
0x1cd1   :  { %v5408_v15 = vmul.f32 0.03125, %v5404_v10 }
0x1cd2   :  { %v5411_v26 = vsub.f32 %v5401_v17, %v5409_v6 }
0x1cd3   :  { %v5410_v16 = vsub.f32 %v5400_v2, %v5408_v15 }
0x1cd4   :  { %v5413_v13 = vmul.f32 %v5411_v26, %v5411_v26 }
0x1cd5   :  { %v5412_v4 = vmul.f32 %v5410_v16, %v5410_v16 }
0x1cd6   :  { %v5417_v14 = vsel %vm130_vm0, %v5413_v13, 0.0 }
0x1cd7   :  { %v5414_v20 = vsel %vm130_vm0, %v5412_v4, 0.0 }
0x1cd8   :  { %5415 = vadd.xlane.f32.xlu0 %v5414_v20 }
0x1cdc   :  { %5418 = vadd.xlane.f32.xlu0 %v5417_v14 }
0x1d65   :  { %v5416_v31 = vpop.xlane.xlu0 %5415 }
0x1d66   :  { %v5420_v32 = vmul.f32 0.03125, %v5416_v31 }
0x1d68   :  { %v5422_v33 = vadd.f32 1e-05, %v5420_v32 }
0x1d69   :  { %v5419_v34 = vpop.xlane.xlu0 %5418 }
0x1d6a   :  { %6896 = vrsqrt.f32 %v5422_v33  ;;  %v5421_v9 = vmul.f32 0.03125, %v5419_v34 }
0x1d6c   :  { %v5423_v35 = vadd.f32 1e-05, %v5421_v9 }
0x1d6e   :  { %6898 = vrsqrt.f32 %v5423_v35 }
0x1d74   :  { %v6897_v19 = vpop.eup %6896 }
0x1d75   :  { %v5426_v36 = vmul.f32 %v6897_v19, %v5410_v16  ;;  %v6037_v16 = vld [vmem:[%s8076_s10 + $0x2] ss:$0 sm:$0xff] }
0x1d77   :  { %v5434_v5 = vmul.f32 %v6032_v11, %v5426_v36  ;;  %v5834_v36 = vsel %vm5833_vm8, %v7862_v18, 0.0 }
0x1d78   :  { %v6899_v37 = vpop.eup %6898 }
0x1d79   :  { %v5427_v38 = vmul.f32 %v6899_v37, %v5411_v26  ;;  %v5442_v39 = vadd.f32 %v6033_v7, %v5434_v5 }
0x1d7b   :  { %v5435_v27 = vmul.f32 %v6032_v11, %v5427_v38  ;;  %6602 = vmatprep.mubr.msk.f32.mxu1 %vm130_vm0, %v5442_v39 }
0x1d7d   :  { %v5443_v40 = vadd.f32 %v6033_v7, %v5435_v27  ;;  %v5754_v7 = vsel %vm5753_vm9, %v7862_v18, 0.0 }
0x1d7f   :  { %6603 = vmatmul.mubr.msk.f32.vlgmr.msra.gmra.mrb[64].mxu1 %vm130_vm0, %v5443_v40 }
0x1d80   :  { %6626 = vmatprep.mubr.msk.f32.mxu1 %vm7012_vm1, %v7011_v8 }
0x1e52   :  { %v6604_v52 = vpop.f32.mrb[64].mxu1 }
0x1e53   :  { %v5528_v53 = vadd.f32 %v6604_v52, %v6034_v51  ;;  %v5522_v54 = vpop.f32.mrb[65].mxu1 }
0x1e54   :  { %v5523_v55 = vadd.f32 %v6034_v51, %v5522_v54 }
0x1e55   :  { %v5532_v56 = vmul.f32 %v5528_v53, %v5528_v53 }
0x1e56   :  { %v5531_v57 = vmul.f32 %v5523_v55, %v5523_v55 }
0x1e57   :  { %v5534_v58 = vmul.f32 %v5532_v56, %v5528_v53 }
0x1e58   :  { %v5533_v59 = vmul.f32 %v5531_v57, %v5523_v55 }
0x1e59   :  { %v5536_v60 = vmul.f32 0.044715, %v5534_v58 }
0x1e5a   :  { %v5535_v61 = vmul.f32 0.044715, %v5533_v59 }
0x1e5b   :  { %v5538_v63 = vadd.f32 %v5536_v60, %v5528_v53 }
0x1e5c   :  { %v5537_v0 = vadd.f32 %v5535_v61, %v5523_v55 }
0x1e5d   :  { %v5540_v1 = vmul.f32 0.7978846, %v5538_v63 }
0x1e5e   :  { %v5539_v17 = vmul.f32 0.7978846, %v5537_v0 }
0x1e5f   :  { %6900 = vtanh.f32 %v5540_v1 }
0x1e60   :  { %6902 = vtanh.f32 %v5539_v17 }
0x1e69   :  { %v6901_v2 = vpop.eup %6900 }
0x1e6a   :  { %v6903_v22 = vpop.eup %6902  ;;  %v5544_v62 = vadd.f32 1.0, %v6901_v2 }
0x1e6b   :  { %v5543_v3 = vadd.f32 1.0, %v6903_v22 }
0x1e6c   :  { %v5546_v6 = vmul.f32 0.5, %v5544_v62 }
0x1e6d   :  { %v5545_v10 = vmul.f32 0.5, %v5543_v3 }
0x1e6e   :  { %v5548_v26 = vmul.f32 %v5546_v6, %v5528_v53 }
0x1e6f   :  { %v5547_v15 = vmul.f32 %v5545_v10, %v5523_v55 }
0x1e71   :  { %6621 = vmatprep.mubr.msk.f32.mxu0 %vm1830_vm6, %v5547_v15 }
0x1e72   :  { %6622 = vmatmul.mubr.msk.f32.vlgmr.msra.gmra.mrb[52].mxu0 %vm1830_vm6, %v5548_v26 }
0x1f45   :  { %v6623_v4 = vpop.f32.mrb[52].mxu0 }
0x1f46   :  { %v5633_v20 = vadd.f32 %v6623_v4, %v6037_v16  ;;  %v5627_v13 = vpop.f32.mrb[53].mxu0 }
0x1f47   :  { %v5628_v14 = vadd.f32 %v6037_v16, %v5627_v13 }
0x1f48   :  { %v5637_v12 = vadd.f32 %v5633_v20, %v5443_v40 }
0x1f49   :  { %v5636_v21 = vadd.f32 %v5628_v14, %v5442_v39 }
0x1f4a   :  { %v5641_v28 = vsel %vm130_vm0, %v5637_v12, 0.0 }
0x1f4b   :  { %5642 = vadd.xlane.f32.xlu0 %v5641_v28  ;;  %v5638_v25 = vsel %vm130_vm0, %v5636_v21, 0.0 }
0x1f4c   :  { %5639 = vadd.xlane.f32.xlu1 %v5638_v25 }
0x1fd8   :  { %v5643_v29 = vpop.xlane.xlu0 %5642 }
0x1fd9   :  { %v5645_v30 = vmul.f32 0.03125, %v5643_v29  ;;  %v5640_v31 = vpop.xlane.xlu1 %5639 }
0x1fda   :  { %v5644_v32 = vmul.f32 0.03125, %v5640_v31 }
0x1fdb   :  { %v5647_v33 = vsub.f32 %v5637_v12, %v5645_v30 }
0x1fdc   :  { %v5646_v34 = vsub.f32 %v5636_v21, %v5644_v32 }
0x1fdd   :  { %v5649_v9 = vmul.f32 %v5647_v33, %v5647_v33 }
0x1fde   :  { %v5648_v35 = vmul.f32 %v5646_v34, %v5646_v34 }
0x1fdf   :  { %v5653_v19 = vsel %vm130_vm0, %v5649_v9, 0.0 }
0x1fe0   :  { %5654 = vadd.xlane.f32.xlu0 %v5653_v19  ;;  %v5650_v11 = vsel %vm130_vm0, %v5648_v35, 0.0 }
0x1fe1   :  { %5651 = vadd.xlane.f32.xlu1 %v5650_v11 }
0x1fe4   :  { %5835 = vadd.xlane.f32.xlu0 %v5834_v36 }
0x1fe5   :  { %5755 = vadd.xlane.f32.xlu1 %v5754_v7 }
0x206d   :  { %v5655_v5 = vpop.xlane.xlu0 %5654 }
0x206e   :  { %v5657_v37 = vmul.f32 0.03125, %v5655_v5  ;;  %v5652_v38 = vpop.xlane.xlu1 %5651 }
0x206f   :  { %v5656_v39 = vmul.f32 0.03125, %v5652_v38 }
0x2070   :  { %v5659_v27 = vadd.f32 1e-05, %v5657_v37 }
0x2071   :  { %v5658_v40 = vadd.f32 1e-05, %v5656_v39  ;;  %v5836_v50 = vpop.xlane.xlu0 %5835 }
0x2072   :  { %6904 = vrsqrt.f32 %v5659_v27  ;;  %v5837_v51 = vmax.f32 %v5836_v50, 1.0  ;;  %v5756_v52 = vpop.xlane.xlu1 %5755 }
0x2073   :  { %6906 = vrsqrt.f32 %v5658_v40  ;;  %v5757_v53 = vmax.f32 %v5756_v52, 1.0 }
0x2074   :  { %6908 = vrcp.f32 %v5837_v51 }
0x2075   :  { %6910 = vrcp.f32 %v5757_v53 }
0x207c   :  { %v6905_v41 = vpop.eup %6904 }
0x207d   :  { %v6907_v42 = vpop.eup %6906  ;;  %v5663_v44 = vmul.f32 %v6905_v41, %v5647_v33 }
0x207e   :  { %v5662_v45 = vmul.f32 %v6907_v42, %v5646_v34  ;;  %v6909_v54 = vpop.eup %6908 }
0x207f   :  { %v5671_v47 = vmul.f32 %v6040_v43, %v5663_v44  ;;  %v5840_v57 = vrot.slane %v6909_v54, 1  ;;  %v6911_v58 = vpop.eup %6910 }
0x2080   :  { %v5670_v24 = vmul.f32 %v6040_v43, %v5662_v45 }
0x2081   :  { %v5679_v23 = vadd.f32 %v6041_v46, %v5671_v47 }
0x2082   :  { %v5678_v48 = vadd.f32 %v6041_v46, %v5670_v24 }
0x2084   :  { %6625 = vmatpush3.msra.mxu1 %v5678_v48 }
0x2085   :  { %6627 = vmatmul.mubr.msk.f32.vlgmr.msra.gmra.mrb[66].mxu1 %vm215_vm2, %v7862_v18  ;;  %6629 = vmatprep.subr.mxu1 %v7011_v8 }
0x2086   :  { %6630 = vmatpush3.msra.mxu1 %v5679_v23  ;;  %6631 = vmatprep.mubr.msk.f32.mxu1 %vm7012_vm1, %v7011_v8 }
0x2089   :  { %6632 = vmatmul.mubr.msk.f32.vlgmr.msra.gmra.mrb[68].mxu1 %vm215_vm2, %v5760_v49 }
0x2158   :  { %v5749_v55 = vpop.f32.mrb[66].mxu1 }
0x2159   :  { %v6628_v56 = vpop.f32.mrb[67].mxu1  ;;  %v5759_v8 = vmul.f32 %v6911_v58, %v5749_v55 }
0x215c   :  { %v5829_v59 = vpop.f32.mrb[68].mxu1 }
0x215d   :  { %v5842_v60 = vmul.f32 %v5840_v57, %v5829_v59  ;;  %v6633_v18 = vpop.f32.mrb[69].mxu1 }
0x215f   :  { %v5844_v61 = vrot.slane %v5842_v60, 7 }
0x2161   :  { %v5847_v63 = vsel %vm5846_vm10, %v5759_v8, %v5844_v61 }
0x2162   :  { %5849 = vst.msk [vmem:[#allocation8] sm:$0x3] %vm5848_vm11, %v5847_v63 }
0x2163   :  { %6989 = shalt.err (!%p6986_p0)
}
0x2164   :  { %s6990_s20 = scalar_lea.hbm %s8081_s15, 32 }
0x2165   :  { %p6991_p1 = scmp.ne.s32.totalorder %s8081_s15, %s6990_s20  ;;  %p6994_p2 = scmp.lt.u32.totalorder %s6990_s20, %s8081_s15 }
0x2167   :  { %p6996_p3 = pnand %p6994_p2, %p6991_p1 }
0x2169   :  { %6999 = shalt.err (!%p6996_p3)
}
0x216a   :  { %5859 = dma.vmem_to_hbm [thread:$0]  %s5857_s14, 32, %s8081_s15, [#allocation4]  }
0x216b   :  { %7004 = dma.done.wait [#allocation4], 32  }
0x216c   :  { %7005 = vsyncadd [#allocation4], 4294967264 }
0x216d   :  { %5863 = vsyncpa [#allocation3], 1 }
0x216e   :  { %5864 = vsyncpa [#allocation6], 1 }
0x216f   :  { %5865 = vsyncpa [#allocation4], 1 }

</bundles_post_ra>
